<compile_context>
chip_gen: v6e
topology: v6e:2x2x1
jax: 0.10.0
libtpu: 0.0.40
codegen_flags: <defaults>
</compile_context>

<pallas_src>
import functools

import jax
import jax.numpy as jnp
from jax.experimental import pallas as pl
from jax.experimental.pallas import tpu as pltpu


# --------------------------------------------------------------------------
# In-kernel helpers
# --------------------------------------------------------------------------
def _dwconv3x3(x_lc, w9_ref, m_left, m_right, pad_ref, *, W, padr):
    """Depthwise 3x3 conv with zero padding on a channels-last (L, C) slab.

    The vertical halo is provided by a zero-padded VMEM scratch (the interior
    store is sublane-aligned: `padr` is a multiple of 8); the horizontal wrap
    of the flattened layout is removed with the precomputed column masks.
    Pure convolution: BN bias / blending is handled by the caller.
    """
    L, _ = x_lc.shape
    pad_ref[padr:padr + L, :] = x_lc          # aligned interior store
    xp = pad_ref[...]                         # (L + 2*padr, C)
    acc = jnp.zeros(x_lc.shape, jnp.float32)
    k = 0
    for di in (-1, 0, 1):
        for dj in (-1, 0, 1):
            start = padr + di * W + dj
            v = xp[start:start + L, :]        # static (unaligned) value slice
            if dj == -1:
                v = v * m_left
            elif dj == 1:
                v = v * m_right
            acc = acc + v * w9_ref[k]         # (1, C) tap weight
            k += 1
    return acc


# --------------------------------------------------------------------------
# Fused EfficientViMBlock kernel (one grid step == one batch sample)
# --------------------------------------------------------------------------
def _evim_block_kernel(
    x_ref, msk_ref, cvec_ref, fb1_ref, dw1_ref, dwm_ref, dw2_ref,
    wbcdt_ref, whz_ref, wout_ref, w1_ref, w2_ref, aparam_ref, d_ref,
    out_ref, h_ref, padc_ref, pads_ref,
    *, W, S, d_inner, padr):
    f32 = jnp.float32
    bf16 = jnp.bfloat16

    # Zero the conv halo scratch once; the interiors are fully overwritten by
    # each _dwconv3x3 call, so the halo rows stay zero for the whole step.
    padc_ref[...] = jnp.zeros_like(padc_ref)
    pads_ref[...] = jnp.zeros_like(pads_ref)

    x = x_ref[0]                                     # (L, C) f32
    m_left = msk_ref[0]                              # (L, 1): col-1 valid
    m_right = msk_ref[1]                             # (L, 1): col+1 valid

    cv = cvec_ref[...]                               # (9, C) packed vectors
    a0, a1, a2, a3 = cv[0:1], cv[1:2], cv[2:3], cv[3:4]
    bn1_b, ln_w, ln_b = cv[4:5], cv[5:6], cv[6:7]
    bn2_b, ffn_b2 = cv[7:8], cv[8:9]

    # (1) x1 = (1 - a0)*x + a0*(dwconv1(x) + bn1_b)   [BN scale folded in w]
    c1 = _dwconv3x3(x, dw1_ref, m_left, m_right, padc_ref, W=W, padr=padr)
    x1 = (1.0 - a0) * x + a0 * (c1 + bn1_b)

    # (2) LayerNorm1D over channels, then 1x1 BCdt projection (bf16 MXU).
    mu = jnp.mean(x1, axis=-1, keepdims=True)
    var = jnp.mean((x1 - mu) ** 2, axis=-1, keepdims=True)
    xn = (x1 - mu) * jax.lax.rsqrt(var + 1e-6) * ln_w + ln_b
    xn_b = xn.astype(bf16)
    bcdt = jnp.dot(xn_b, wbcdt_ref[...], preferred_element_type=f32)  # (L, 3S)

    # (3) plain depthwise 3x3 conv on BCdt (no norm, no blend).
    bcdt = _dwconv3x3(bcdt, dwm_ref, m_left, m_right, pads_ref, W=W, padr=padr)

    # (4) HSMSSD core: static lane slices instead of an HBM reshape/transpose.
    Bm = bcdt[:, 0:S]                                # (L, S)
    Cm = bcdt[:, S:2 * S]                            # (L, S)
    dt = bcdt[:, 2 * S:3 * S]                        # (L, S)
    dtA = dt + aparam_ref[...]                       # (L, S)
    mx = jnp.max(dtA, axis=0, keepdims=True)
    e = jnp.exp(dtA - mx)
    A = e / jnp.sum(e, axis=0, keepdims=True)        # softmax over L
    AB = (A * Bm).astype(bf16)
    # h = xn^T @ AB (contract over L) -> (C, S)
    h = jax.lax.dot_general(xn_b, AB, (((0,), (0,)), ((), ())),
                            preferred_element_type=f32)
    hz = jnp.dot(whz_ref[...], h.astype(bf16),
                 preferred_element_type=f32)          # (2*d_inner, S)
    h1 = hz[:d_inner]
    z = hz[d_inner:]
    dsc = d_ref[0, 0]                                 # scalar D from SMEM
    g = h1 * (z * jax.nn.sigmoid(z) + dsc)            # h*SiLU(z) + h*D
    hout = jnp.dot(wout_ref[...], g.astype(bf16),
                   preferred_element_type=f32)        # (C, S)
    # y[l, c] = sum_s Cm[l, s] * hout[c, s]  -> (L, C)
    y = jax.lax.dot_general(Cm.astype(bf16), hout.astype(bf16),
                            (((1,), (1,)), ((), ())),
                            preferred_element_type=f32)
    x2 = (1.0 - a1) * x1 + a1 * y

    # (5) x3 = (1 - a2)*x2 + a2*(dwconv2(x2) + bn2_b)  [BN scale folded in w]
    c2 = _dwconv3x3(x2, dw2_ref, m_left, m_right, padc_ref, W=W, padr=padr)
    x3 = (1.0 - a2) * x2 + a2 * (c2 + bn2_b)

    # (6) FFN (1x1 -> ReLU -> 1x1, BN scales folded into weights) + blend.
    t = jnp.dot(x3.astype(bf16), w1_ref[...],
                preferred_element_type=f32) + fb1_ref[...]
    t = jnp.maximum(t, 0.0)
    ffn = jnp.dot(t.astype(bf16), w2_ref[...],
                  preferred_element_type=f32) + ffn_b2

    out_ref[0] = (1.0 - a3) * x3 + a3 * ffn
    h_ref[0] = hout


# --------------------------------------------------------------------------
# Wrapper: parameter folding + single pallas_call
# --------------------------------------------------------------------------
def efficientvim_block(x_nchw, p):
    B, C, H, W = x_nchw.shape
    L = H * W
    S = p["A"].shape[1]
    S3 = 3 * S
    d_inner = p["w_out"].shape[1]
    hidden = p["ffn_w1"].shape[1]
    padr = ((W + 1 + 7) // 8) * 8          # halo depth, sublane aligned
    f32, bf16 = jnp.float32, jnp.bfloat16

    # NCHW -> channels-last flattened (B, L, C); single entry transpose.
    x_lc = jnp.transpose(x_nchw.reshape(B, C, L), (0, 2, 1)).astype(f32)

    # Pack all per-channel vectors into one (9, C) slab (one small DMA).
    alpha = jax.nn.sigmoid(p["alpha"]).astype(f32)                   # (4, C)
    cvec = jnp.concatenate([alpha, p["bn1_b"], p["ln_w"], p["ln_b"],
                            p["bn2_b"], p["ffn_b2"]], axis=0).astype(f32)

    # Fold BatchNorm / affine scales into the adjacent conv / FFN weights.
    dw1_w = (p["dw1_w"] * p["bn1_s"]).astype(f32)                    # (9,1,C)
    dw2_w = (p["dw2_w"] * p["bn2_s"]).astype(f32)                    # (9,1,C)
    dwm_w = p["dwm_w"].astype(f32)                                   # (9,1,3S)
    w1 = (p["ffn_w1"] * p["ffn_s1"]).astype(bf16)                    # (C, hid)
    w2 = (p["ffn_w2"] * p["ffn_s2"]).astype(bf16)                    # (hid, C)
    w_bcdt = p["w_bcdt"].astype(bf16)                                # (C, 3S)
    w_hz = p["w_hz"].astype(bf16)                                    # (2di, C)
    w_out = p["w_out"].astype(bf16)                                  # (C, di)

    # Column masks killing the horizontal wrap of the flattened 3x3 conv.
    col = jnp.arange(L, dtype=jnp.int32) % W
    msk = jnp.stack([(col >= 1).astype(f32),
                     (col <= W - 2).astype(f32)], axis=0).reshape(2, L, 1)

    d_param = p["D"].reshape(1, 1).astype(f32)

    kernel = functools.partial(_evim_block_kernel, W=W, S=S,
                               d_inner=d_inner, padr=padr)

    out_lc, h = pl.pallas_call(
        kernel,
        out_shape=(jax.ShapeDtypeStruct((B, L, C), f32),
                   jax.ShapeDtypeStruct((B, C, S), f32)),
        grid=(B,),
        in_specs=[
            pl.BlockSpec((1, L, C), lambda b: (b, 0, 0)),        # x (flattened)
            pl.BlockSpec((2, L, 1), lambda b: (0, 0, 0)),        # conv col masks
            pl.BlockSpec((9, C), lambda b: (0, 0)),              # packed C-vectors
            pl.BlockSpec((1, hidden), lambda b: (0, 0)),         # FFN bias 1
            pl.BlockSpec((9, 1, C), lambda b: (0, 0, 0)),        # dwconv1 (BN folded)
            pl.BlockSpec((9, 1, S3), lambda b: (0, 0, 0)),       # mixer dwconv
            pl.BlockSpec((9, 1, C), lambda b: (0, 0, 0)),        # dwconv2 (BN folded)
            pl.BlockSpec((C, S3), lambda b: (0, 0)),             # W_BCdt  (bf16)
            pl.BlockSpec((2 * d_inner, C), lambda b: (0, 0)),    # W_hz    (bf16)
            pl.BlockSpec((C, d_inner), lambda b: (0, 0)),        # W_out   (bf16)
            pl.BlockSpec((C, hidden), lambda b: (0, 0)),         # FFN W1  (bf16)
            pl.BlockSpec((hidden, C), lambda b: (0, 0)),         # FFN W2  (bf16)
            pl.BlockSpec((1, S), lambda b: (0, 0)),              # A param
            pl.BlockSpec(memory_space=pltpu.MemorySpace.SMEM),   # D scalar
        ],
        out_specs=(pl.BlockSpec((1, L, C), lambda b: (b, 0, 0)),
                   pl.BlockSpec((1, C, S), lambda b: (b, 0, 0))),
        scratch_shapes=[pltpu.VMEM((L + 2 * padr, C), f32),
                        pltpu.VMEM((L + 2 * padr, S3), f32)],
        compiler_params=pltpu.CompilerParams(
            dimension_semantics=("parallel",)),
    )(x_lc, msk, cvec, p["ffn_b1"].astype(f32), dw1_w, dwm_w, dw2_w,
      w_bcdt, w_hz, w_out, w1, w2, p["A"].astype(f32), d_param)

    out = jnp.transpose(out_lc, (0, 2, 1)).reshape(B, C, H, W)
    return out, h


# --------------------------------------------------------------------------
# Deterministic parameter init + demo
# --------------------------------------------------------------------------
def make_params(key, C, S, d_inner, hidden):
    ks = jax.random.split(key, 20)

    def rn(k, shape, scale=0.1):
        return scale * jax.random.normal(k, shape, jnp.float32)

    return dict(
        alpha=1e-4 * jnp.ones((4, C), jnp.float32),          # nn.Parameter init
        # dwconv1 (depthwise 3x3 stored as (9, 1, C)) + folded BN
        dw1_w=rn(ks[0], (9, 1, C)),
        bn1_s=1.0 + rn(ks[1], (1, C)),
        bn1_b=rn(ks[2], (1, C)),
        # LayerNorm1D
        ln_w=1.0 + rn(ks[3], (1, C)),
        ln_b=rn(ks[4], (1, C)),
        # HSMSSD
        w_bcdt=rn(ks[5], (C, 3 * S)),        # BCdt_proj (transposed 1x1 conv)
        dwm_w=rn(ks[6], (9, 1, 3 * S)),      # mixer depthwise conv
        w_hz=rn(ks[7], (2 * d_inner, C)),    # hz_proj
        w_out=rn(ks[8], (C, d_inner)),       # out_proj
        A=jax.random.uniform(ks[9], (1, S), jnp.float32, 1.0, 16.0),
        D=jnp.ones((1, 1), jnp.float32),
        # dwconv2 + folded BN
        dw2_w=rn(ks[10], (9, 1, C)),
        bn2_s=1.0 + rn(ks[11], (1, C)),
        bn2_b=rn(ks[12], (1, C)),
        # FFN (1x1 convs with folded BN)
        ffn_w1=rn(ks[13], (C, hidden)),
        ffn_s1=1.0 + rn(ks[14], (1, hidden)),
        ffn_b1=rn(ks[15], (1, hidden)),
        ffn_w2=rn(ks[16], (hidden, C)),
        ffn_s2=1.0 + rn(ks[17], (1, C)),
        ffn_b2=rn(ks[18], (1, C)),
    )


if __name__ == "__main__":
    B, C, H, W = 2, 32, 8, 8          # dim=32
    S = 16                            # state_dim
    d_inner = 32                      # ssd_expand=1 -> d_inner = dim
    hidden = int(4.0 * C)             # mlp_ratio=4

    key = jax.random.PRNGKey(0)
    kp, kx = jax.random.split(key)
    params = make_params(kp, C, S, d_inner, hidden)
    x = jax.random.normal(kx, (B, C, H, W), jnp.float32)

    fwd = jax.jit(lambda inp: efficientvim_block(inp, params))
    out, h = fwd(x)
    jax.block_until_ready((out, h))

    assert out.shape == (B, C, H, W), out.shape
    assert h.shape == (B, C, S), h.shape
    assert bool(jnp.all(jnp.isfinite(out))) and bool(jnp.all(jnp.isfinite(h)))
    print("KERNEL_OK")
</pallas_src>

<mosaic_0001>
module attributes {stable_mosaic.version = 11 : i64} {
  func.func @_evim_block_kernel(%arg0: i32, %arg1: memref<1x64x32xf32, #tpu.memory_space<vmem>>, %arg2: memref<2x64x1xf32, #tpu.memory_space<vmem>>, %arg3: memref<9x32xf32, #tpu.memory_space<vmem>>, %arg4: memref<1x128xf32, #tpu.memory_space<vmem>>, %arg5: memref<9x1x32xf32, #tpu.memory_space<vmem>>, %arg6: memref<9x1x48xf32, #tpu.memory_space<vmem>>, %arg7: memref<9x1x32xf32, #tpu.memory_space<vmem>>, %arg8: memref<32x48xbf16, #tpu.memory_space<vmem>>, %arg9: memref<64x32xbf16, #tpu.memory_space<vmem>>, %arg10: memref<32x32xbf16, #tpu.memory_space<vmem>>, %arg11: memref<32x128xbf16, #tpu.memory_space<vmem>>, %arg12: memref<128x32xbf16, #tpu.memory_space<vmem>>, %arg13: memref<1x16xf32, #tpu.memory_space<vmem>>, %arg14: memref<1x1xf32, #tpu.memory_space<smem>>, %arg15: memref<1x64x32xf32, #tpu.memory_space<vmem>>, %arg16: memref<1x32x16xf32, #tpu.memory_space<vmem>>, %arg17: memref<96x32xf32, #tpu.memory_space<vmem>>, %arg18: memref<96x48xf32, #tpu.memory_space<vmem>>) attributes {dimension_semantics = [#tpu.dimension_semantics<parallel>], iteration_bounds = array<i64: 2>, scalar_prefetch = 0 : i64, scratch_operands = 2 : i64, tpu.core_type = #tpu.core_type<tc>, window_params = [{transform_indices = @transform_0, window_bounds = array<i64: 1, 64, 32>}, {pipeline_mode = #tpu.pipeline_mode<synchronous>, transform_indices = @transform_1, window_bounds = array<i64: 2, 64, 1>}, {pipeline_mode = #tpu.pipeline_mode<synchronous>, transform_indices = @transform_2, window_bounds = array<i64: 9, 32>}, {pipeline_mode = #tpu.pipeline_mode<synchronous>, transform_indices = @transform_3, window_bounds = array<i64: 1, 128>}, {pipeline_mode = #tpu.pipeline_mode<synchronous>, transform_indices = @transform_4, window_bounds = array<i64: 9, 1, 32>}, {pipeline_mode = #tpu.pipeline_mode<synchronous>, transform_indices = @transform_5, window_bounds = array<i64: 9, 1, 48>}, {pipeline_mode = #tpu.pipeline_mode<synchronous>, transform_indices = @transform_6, window_bounds = array<i64: 9, 1, 32>}, {pipeline_mode = #tpu.pipeline_mode<synchronous>, transform_indices = @transform_7, window_bounds = array<i64: 32, 48>}, {pipeline_mode = #tpu.pipeline_mode<synchronous>, transform_indices = @transform_8, window_bounds = array<i64: 64, 32>}, {pipeline_mode = #tpu.pipeline_mode<synchronous>, transform_indices = @transform_9, window_bounds = array<i64: 32, 32>}, {pipeline_mode = #tpu.pipeline_mode<synchronous>, transform_indices = @transform_10, window_bounds = array<i64: 32, 128>}, {pipeline_mode = #tpu.pipeline_mode<synchronous>, transform_indices = @transform_11, window_bounds = array<i64: 128, 32>}, {pipeline_mode = #tpu.pipeline_mode<synchronous>, transform_indices = @transform_12, window_bounds = array<i64: 1, 16>}, {transform_indices = @transform_13, window_bounds = array<i64: 1, 1>}, {transform_indices = @transform_14, window_bounds = array<i64: 1, 64, 32>}, {transform_indices = @transform_15, window_bounds = array<i64: 1, 32, 16>}]} {
    %cst = arith.constant 0.000000e+00 : f32
    %0 = vector.broadcast %cst : f32 to vector<96x32xf32>
    %c0 = arith.constant 0 : index
    %c0_0 = arith.constant 0 : index
    %1 = vector.load %arg17[%c0, %c0_0] : memref<96x32xf32, #tpu.memory_space<vmem>>, vector<96x32xf32>
    tpu.vector_store %arg17[%c0, %c0_0], %0 {strides = array<i32>} : memref<96x32xf32, #tpu.memory_space<vmem>>, vector<96x32xf32>,
    %cst_1 = arith.constant 0.000000e+00 : f32
    %2 = vector.broadcast %cst_1 : f32 to vector<96x48xf32>
    %c0_2 = arith.constant 0 : index
    %c0_3 = arith.constant 0 : index
    %3 = vector.load %arg18[%c0_2, %c0_3] : memref<96x48xf32, #tpu.memory_space<vmem>>, vector<96x48xf32>
    tpu.vector_store %arg18[%c0_2, %c0_3], %2 {strides = array<i32>} : memref<96x48xf32, #tpu.memory_space<vmem>>, vector<96x48xf32>,
    %c0_4 = arith.constant 0 : index
    %c0_5 = arith.constant 0 : index
    %c0_6 = arith.constant 0 : index
    %4 = vector.load %arg1[%c0_4, %c0_5, %c0_6] : memref<1x64x32xf32, #tpu.memory_space<vmem>>, vector<1x64x32xf32>
    %5 = vector.shape_cast %4 : vector<1x64x32xf32> to vector<64x32xf32>
    %c0_7 = arith.constant 0 : index
    %c0_8 = arith.constant 0 : index
    %c0_9 = arith.constant 0 : index
    %6 = vector.load %arg2[%c0_7, %c0_8, %c0_9] : memref<2x64x1xf32, #tpu.memory_space<vmem>>, vector<1x64x1xf32>
    %7 = vector.shape_cast %6 : vector<1x64x1xf32> to vector<64x1xf32>
    %c1 = arith.constant 1 : index
    %c0_10 = arith.constant 0 : index
    %c0_11 = arith.constant 0 : index
    %8 = vector.load %arg2[%c1, %c0_10, %c0_11] : memref<2x64x1xf32, #tpu.memory_space<vmem>>, vector<1x64x1xf32>
    %9 = vector.shape_cast %8 : vector<1x64x1xf32> to vector<64x1xf32>
    %c0_12 = arith.constant 0 : index
    %c0_13 = arith.constant 0 : index
    %10 = vector.load %arg3[%c0_12, %c0_13] : memref<9x32xf32, #tpu.memory_space<vmem>>, vector<9x32xf32>
    %11 = vector.extract_strided_slice %10 {offsets = [0, 0], sizes = [1, 32], strides = [1, 1]} : vector<9x32xf32> to vector<1x32xf32>
    %12 = vector.extract_strided_slice %10 {offsets = [1, 0], sizes = [1, 32], strides = [1, 1]} : vector<9x32xf32> to vector<1x32xf32>
    %13 = vector.extract_strided_slice %10 {offsets = [2, 0], sizes = [1, 32], strides = [1, 1]} : vector<9x32xf32> to vector<1x32xf32>
    %14 = vector.extract_strided_slice %10 {offsets = [3, 0], sizes = [1, 32], strides = [1, 1]} : vector<9x32xf32> to vector<1x32xf32>
    %15 = vector.extract_strided_slice %10 {offsets = [4, 0], sizes = [1, 32], strides = [1, 1]} : vector<9x32xf32> to vector<1x32xf32>
    %16 = vector.extract_strided_slice %10 {offsets = [5, 0], sizes = [1, 32], strides = [1, 1]} : vector<9x32xf32> to vector<1x32xf32>
    %17 = vector.extract_strided_slice %10 {offsets = [6, 0], sizes = [1, 32], strides = [1, 1]} : vector<9x32xf32> to vector<1x32xf32>
    %18 = vector.extract_strided_slice %10 {offsets = [7, 0], sizes = [1, 32], strides = [1, 1]} : vector<9x32xf32> to vector<1x32xf32>
    %19 = vector.extract_strided_slice %10 {offsets = [8, 0], sizes = [1, 32], strides = [1, 1]} : vector<9x32xf32> to vector<1x32xf32>
    %c16 = arith.constant 16 : index
    %c0_14 = arith.constant 0 : index
    %20 = vector.load %arg17[%c16, %c0_14] : memref<96x32xf32, #tpu.memory_space<vmem>>, vector<64x32xf32>
    tpu.vector_store %arg17[%c16, %c0_14], %5 {strides = array<i32>} : memref<96x32xf32, #tpu.memory_space<vmem>>, vector<64x32xf32>,
    %c0_15 = arith.constant 0 : index
    %c0_16 = arith.constant 0 : index
    %21 = vector.load %arg17[%c0_15, %c0_16] : memref<96x32xf32, #tpu.memory_space<vmem>>, vector<96x32xf32>
    %cst_17 = arith.constant 0.000000e+00 : f32
    %22 = vector.broadcast %cst_17 : f32 to vector<64x32xf32>
    %23 = vector.extract_strided_slice %21 {offsets = [7, 0], sizes = [64, 32], strides = [1, 1]} : vector<96x32xf32> to vector<64x32xf32>
    %24 = vector.broadcast %7 : vector<64x1xf32> to vector<64x32xf32>
    %25 = arith.mulf %23, %24 : vector<64x32xf32>
    %c0_18 = arith.constant 0 : index
    %c0_19 = arith.constant 0 : index
    %c0_20 = arith.constant 0 : index
    %26 = vector.load %arg5[%c0_18, %c0_19, %c0_20] : memref<9x1x32xf32, #tpu.memory_space<vmem>>, vector<1x1x32xf32>
    %27 = vector.shape_cast %26 : vector<1x1x32xf32> to vector<1x32xf32>
    %28 = vector.broadcast %27 : vector<1x32xf32> to vector<64x32xf32>
    %29 = arith.mulf %25, %28 : vector<64x32xf32>
    %30 = arith.addf %22, %29 : vector<64x32xf32>
    %31 = vector.extract_strided_slice %21 {offsets = [8, 0], sizes = [64, 32], strides = [1, 1]} : vector<96x32xf32> to vector<64x32xf32>
    %c1_21 = arith.constant 1 : index
    %c0_22 = arith.constant 0 : index
    %c0_23 = arith.constant 0 : index
    %32 = vector.load %arg5[%c1_21, %c0_22, %c0_23] : memref<9x1x32xf32, #tpu.memory_space<vmem>>, vector<1x1x32xf32>
    %33 = vector.shape_cast %32 : vector<1x1x32xf32> to vector<1x32xf32>
    %34 = vector.broadcast %33 : vector<1x32xf32> to vector<64x32xf32>
    %35 = arith.mulf %31, %34 : vector<64x32xf32>
    %36 = arith.addf %30, %35 : vector<64x32xf32>
    %37 = vector.extract_strided_slice %21 {offsets = [9, 0], sizes = [64, 32], strides = [1, 1]} : vector<96x32xf32> to vector<64x32xf32>
    %38 = vector.broadcast %9 : vector<64x1xf32> to vector<64x32xf32>
    %39 = arith.mulf %37, %38 : vector<64x32xf32>
    %c2 = arith.constant 2 : index
    %c0_24 = arith.constant 0 : index
    %c0_25 = arith.constant 0 : index
    %40 = vector.load %arg5[%c2, %c0_24, %c0_25] : memref<9x1x32xf32, #tpu.memory_space<vmem>>, vector<1x1x32xf32>
    %41 = vector.shape_cast %40 : vector<1x1x32xf32> to vector<1x32xf32>
    %42 = vector.broadcast %41 : vector<1x32xf32> to vector<64x32xf32>
    %43 = arith.mulf %39, %42 : vector<64x32xf32>
    %44 = arith.addf %36, %43 : vector<64x32xf32>
    %45 = vector.extract_strided_slice %21 {offsets = [15, 0], sizes = [64, 32], strides = [1, 1]} : vector<96x32xf32> to vector<64x32xf32>
    %46 = vector.broadcast %7 : vector<64x1xf32> to vector<64x32xf32>
    %47 = arith.mulf %45, %46 : vector<64x32xf32>
    %c3 = arith.constant 3 : index
    %c0_26 = arith.constant 0 : index
    %c0_27 = arith.constant 0 : index
    %48 = vector.load %arg5[%c3, %c0_26, %c0_27] : memref<9x1x32xf32, #tpu.memory_space<vmem>>, vector<1x1x32xf32>
    %49 = vector.shape_cast %48 : vector<1x1x32xf32> to vector<1x32xf32>
    %50 = vector.broadcast %49 : vector<1x32xf32> to vector<64x32xf32>
    %51 = arith.mulf %47, %50 : vector<64x32xf32>
    %52 = arith.addf %44, %51 : vector<64x32xf32>
    %53 = vector.extract_strided_slice %21 {offsets = [16, 0], sizes = [64, 32], strides = [1, 1]} : vector<96x32xf32> to vector<64x32xf32>
    %c4 = arith.constant 4 : index
    %c0_28 = arith.constant 0 : index
    %c0_29 = arith.constant 0 : index
    %54 = vector.load %arg5[%c4, %c0_28, %c0_29] : memref<9x1x32xf32, #tpu.memory_space<vmem>>, vector<1x1x32xf32>
    %55 = vector.shape_cast %54 : vector<1x1x32xf32> to vector<1x32xf32>
    %56 = vector.broadcast %55 : vector<1x32xf32> to vector<64x32xf32>
    %57 = arith.mulf %53, %56 : vector<64x32xf32>
    %58 = arith.addf %52, %57 : vector<64x32xf32>
    %59 = vector.extract_strided_slice %21 {offsets = [17, 0], sizes = [64, 32], strides = [1, 1]} : vector<96x32xf32> to vector<64x32xf32>
    %60 = vector.broadcast %9 : vector<64x1xf32> to vector<64x32xf32>
    %61 = arith.mulf %59, %60 : vector<64x32xf32>
    %c5 = arith.constant 5 : index
    %c0_30 = arith.constant 0 : index
    %c0_31 = arith.constant 0 : index
    %62 = vector.load %arg5[%c5, %c0_30, %c0_31] : memref<9x1x32xf32, #tpu.memory_space<vmem>>, vector<1x1x32xf32>
    %63 = vector.shape_cast %62 : vector<1x1x32xf32> to vector<1x32xf32>
    %64 = vector.broadcast %63 : vector<1x32xf32> to vector<64x32xf32>
    %65 = arith.mulf %61, %64 : vector<64x32xf32>
    %66 = arith.addf %58, %65 : vector<64x32xf32>
    %67 = vector.extract_strided_slice %21 {offsets = [23, 0], sizes = [64, 32], strides = [1, 1]} : vector<96x32xf32> to vector<64x32xf32>
    %68 = vector.broadcast %7 : vector<64x1xf32> to vector<64x32xf32>
    %69 = arith.mulf %67, %68 : vector<64x32xf32>
    %c6 = arith.constant 6 : index
    %c0_32 = arith.constant 0 : index
    %c0_33 = arith.constant 0 : index
    %70 = vector.load %arg5[%c6, %c0_32, %c0_33] : memref<9x1x32xf32, #tpu.memory_space<vmem>>, vector<1x1x32xf32>
    %71 = vector.shape_cast %70 : vector<1x1x32xf32> to vector<1x32xf32>
    %72 = vector.broadcast %71 : vector<1x32xf32> to vector<64x32xf32>
    %73 = arith.mulf %69, %72 : vector<64x32xf32>
    %74 = arith.addf %66, %73 : vector<64x32xf32>
    %75 = vector.extract_strided_slice %21 {offsets = [24, 0], sizes = [64, 32], strides = [1, 1]} : vector<96x32xf32> to vector<64x32xf32>
    %c7 = arith.constant 7 : index
    %c0_34 = arith.constant 0 : index
    %c0_35 = arith.constant 0 : index
    %76 = vector.load %arg5[%c7, %c0_34, %c0_35] : memref<9x1x32xf32, #tpu.memory_space<vmem>>, vector<1x1x32xf32>
    %77 = vector.shape_cast %76 : vector<1x1x32xf32> to vector<1x32xf32>
    %78 = vector.broadcast %77 : vector<1x32xf32> to vector<64x32xf32>
    %79 = arith.mulf %75, %78 : vector<64x32xf32>
    %80 = arith.addf %74, %79 : vector<64x32xf32>
    %81 = vector.extract_strided_slice %21 {offsets = [25, 0], sizes = [64, 32], strides = [1, 1]} : vector<96x32xf32> to vector<64x32xf32>
    %82 = vector.broadcast %9 : vector<64x1xf32> to vector<64x32xf32>
    %83 = arith.mulf %81, %82 : vector<64x32xf32>
    %c8 = arith.constant 8 : index
    %c0_36 = arith.constant 0 : index
    %c0_37 = arith.constant 0 : index
    %84 = vector.load %arg5[%c8, %c0_36, %c0_37] : memref<9x1x32xf32, #tpu.memory_space<vmem>>, vector<1x1x32xf32>
    %85 = vector.shape_cast %84 : vector<1x1x32xf32> to vector<1x32xf32>
    %86 = vector.broadcast %85 : vector<1x32xf32> to vector<64x32xf32>
    %87 = arith.mulf %83, %86 : vector<64x32xf32>
    %88 = arith.addf %80, %87 : vector<64x32xf32>
    %cst_38 = arith.constant 1.000000e+00 : f32
    %89 = vector.broadcast %cst_38 : f32 to vector<1x32xf32>
    %90 = arith.subf %89, %11 : vector<1x32xf32>
    %91 = vector.broadcast %90 : vector<1x32xf32> to vector<64x32xf32>
    %92 = arith.mulf %91, %5 : vector<64x32xf32>
    %93 = vector.broadcast %15 : vector<1x32xf32> to vector<64x32xf32>
    %94 = arith.addf %88, %93 : vector<64x32xf32>
    %95 = vector.broadcast %11 : vector<1x32xf32> to vector<64x32xf32>
    %96 = arith.mulf %95, %94 : vector<64x32xf32>
    %97 = arith.addf %92, %96 : vector<64x32xf32>
    %cst_39 = arith.constant dense<0.000000e+00> : vector<64xf32>
    %98 = vector.multi_reduction <add>, %97, %cst_39 [1] : vector<64x32xf32> to vector<64xf32>
    %99 = vector.shape_cast %98 : vector<64xf32> to vector<64x1xf32>
    %cst_40 = arith.constant 3.200000e+01 : f32
    %100 = vector.broadcast %cst_40 : f32 to vector<64x1xf32>
    %101 = arith.divf %99, %100 : vector<64x1xf32>
    %102 = vector.broadcast %101 : vector<64x1xf32> to vector<64x32xf32>
    %103 = arith.subf %97, %102 : vector<64x32xf32>
    %104 = arith.mulf %103, %103 : vector<64x32xf32>
    %cst_41 = arith.constant dense<0.000000e+00> : vector<64xf32>
    %105 = vector.multi_reduction <add>, %104, %cst_41 [1] : vector<64x32xf32> to vector<64xf32>
    %106 = vector.shape_cast %105 : vector<64xf32> to vector<64x1xf32>
    %cst_42 = arith.constant 3.200000e+01 : f32
    %107 = vector.broadcast %cst_42 : f32 to vector<64x1xf32>
    %108 = arith.divf %106, %107 : vector<64x1xf32>
    %109 = vector.broadcast %101 : vector<64x1xf32> to vector<64x32xf32>
    %110 = arith.subf %97, %109 : vector<64x32xf32>
    %cst_43 = arith.constant 9.99999997E-7 : f32
    %111 = vector.broadcast %cst_43 : f32 to vector<64x1xf32>
    %112 = arith.addf %108, %111 : vector<64x1xf32>
    %113 = math.rsqrt %112 : vector<64x1xf32>
    %114 = vector.broadcast %113 : vector<64x1xf32> to vector<64x32xf32>
    %115 = arith.mulf %110, %114 : vector<64x32xf32>
    %116 = vector.broadcast %16 : vector<1x32xf32> to vector<64x32xf32>
    %117 = arith.mulf %115, %116 : vector<64x32xf32>
    %118 = vector.broadcast %17 : vector<1x32xf32> to vector<64x32xf32>
    %119 = arith.addf %117, %118 : vector<64x32xf32>
    %120 = arith.truncf %119 : vector<64x32xf32> to vector<64x32xbf16>
    %c0_44 = arith.constant 0 : index
    %c0_45 = arith.constant 0 : index
    %121 = vector.load %arg8[%c0_44, %c0_45] : memref<32x48xbf16, #tpu.memory_space<vmem>>, vector<32x48xbf16>
    %cst_46 = arith.constant dense<0.000000e+00> : vector<64x48xf32>
    %122 = tpu.matmul %120, %121, %cst_46 {dimension_numbers = #tpu.dot_dimension_numbers<[1], [0], [0], [1], [0, 0, 1, 1], [], []>} : vector<64x32xbf16>, vector<32x48xbf16>, vector<64x48xf32> -> vector<64x48xf32>
    %c16_47 = arith.constant 16 : index
    %c0_48 = arith.constant 0 : index
    %123 = vector.load %arg18[%c16_47, %c0_48] : memref<96x48xf32, #tpu.memory_space<vmem>>, vector<64x48xf32>
    tpu.vector_store %arg18[%c16_47, %c0_48], %122 {strides = array<i32>} : memref<96x48xf32, #tpu.memory_space<vmem>>, vector<64x48xf32>,
    %c0_49 = arith.constant 0 : index
    %c0_50 = arith.constant 0 : index
    %124 = vector.load %arg18[%c0_49, %c0_50] : memref<96x48xf32, #tpu.memory_space<vmem>>, vector<96x48xf32>
    %cst_51 = arith.constant 0.000000e+00 : f32
    %125 = vector.broadcast %cst_51 : f32 to vector<64x48xf32>
    %126 = vector.extract_strided_slice %124 {offsets = [7, 0], sizes = [64, 48], strides = [1, 1]} : vector<96x48xf32> to vector<64x48xf32>
    %127 = vector.broadcast %7 : vector<64x1xf32> to vector<64x48xf32>
    %128 = arith.mulf %126, %127 : vector<64x48xf32>
    %c0_52 = arith.constant 0 : index
    %c0_53 = arith.constant 0 : index
    %c0_54 = arith.constant 0 : index
    %129 = vector.load %arg6[%c0_52, %c0_53, %c0_54] : memref<9x1x48xf32, #tpu.memory_space<vmem>>, vector<1x1x48xf32>
    %130 = vector.shape_cast %129 : vector<1x1x48xf32> to vector<1x48xf32>
    %131 = vector.broadcast %130 : vector<1x48xf32> to vector<64x48xf32>
    %132 = arith.mulf %128, %131 : vector<64x48xf32>
    %133 = arith.addf %125, %132 : vector<64x48xf32>
    %134 = vector.extract_strided_slice %124 {offsets = [8, 0], sizes = [64, 48], strides = [1, 1]} : vector<96x48xf32> to vector<64x48xf32>
    %c1_55 = arith.constant 1 : index
    %c0_56 = arith.constant 0 : index
    %c0_57 = arith.constant 0 : index
    %135 = vector.load %arg6[%c1_55, %c0_56, %c0_57] : memref<9x1x48xf32, #tpu.memory_space<vmem>>, vector<1x1x48xf32>
    %136 = vector.shape_cast %135 : vector<1x1x48xf32> to vector<1x48xf32>
    %137 = vector.broadcast %136 : vector<1x48xf32> to vector<64x48xf32>
    %138 = arith.mulf %134, %137 : vector<64x48xf32>
    %139 = arith.addf %133, %138 : vector<64x48xf32>
    %140 = vector.extract_strided_slice %124 {offsets = [9, 0], sizes = [64, 48], strides = [1, 1]} : vector<96x48xf32> to vector<64x48xf32>
    %141 = vector.broadcast %9 : vector<64x1xf32> to vector<64x48xf32>
    %142 = arith.mulf %140, %141 : vector<64x48xf32>
    %c2_58 = arith.constant 2 : index
    %c0_59 = arith.constant 0 : index
    %c0_60 = arith.constant 0 : index
    %143 = vector.load %arg6[%c2_58, %c0_59, %c0_60] : memref<9x1x48xf32, #tpu.memory_space<vmem>>, vector<1x1x48xf32>
    %144 = vector.shape_cast %143 : vector<1x1x48xf32> to vector<1x48xf32>
    %145 = vector.broadcast %144 : vector<1x48xf32> to vector<64x48xf32>
    %146 = arith.mulf %142, %145 : vector<64x48xf32>
    %147 = arith.addf %139, %146 : vector<64x48xf32>
    %148 = vector.extract_strided_slice %124 {offsets = [15, 0], sizes = [64, 48], strides = [1, 1]} : vector<96x48xf32> to vector<64x48xf32>
    %149 = vector.broadcast %7 : vector<64x1xf32> to vector<64x48xf32>
    %150 = arith.mulf %148, %149 : vector<64x48xf32>
    %c3_61 = arith.constant 3 : index
    %c0_62 = arith.constant 0 : index
    %c0_63 = arith.constant 0 : index
    %151 = vector.load %arg6[%c3_61, %c0_62, %c0_63] : memref<9x1x48xf32, #tpu.memory_space<vmem>>, vector<1x1x48xf32>
    %152 = vector.shape_cast %151 : vector<1x1x48xf32> to vector<1x48xf32>
    %153 = vector.broadcast %152 : vector<1x48xf32> to vector<64x48xf32>
    %154 = arith.mulf %150, %153 : vector<64x48xf32>
    %155 = arith.addf %147, %154 : vector<64x48xf32>
    %156 = vector.extract_strided_slice %124 {offsets = [16, 0], sizes = [64, 48], strides = [1, 1]} : vector<96x48xf32> to vector<64x48xf32>
    %c4_64 = arith.constant 4 : index
    %c0_65 = arith.constant 0 : index
    %c0_66 = arith.constant 0 : index
    %157 = vector.load %arg6[%c4_64, %c0_65, %c0_66] : memref<9x1x48xf32, #tpu.memory_space<vmem>>, vector<1x1x48xf32>
    %158 = vector.shape_cast %157 : vector<1x1x48xf32> to vector<1x48xf32>
    %159 = vector.broadcast %158 : vector<1x48xf32> to vector<64x48xf32>
    %160 = arith.mulf %156, %159 : vector<64x48xf32>
    %161 = arith.addf %155, %160 : vector<64x48xf32>
    %162 = vector.extract_strided_slice %124 {offsets = [17, 0], sizes = [64, 48], strides = [1, 1]} : vector<96x48xf32> to vector<64x48xf32>
    %163 = vector.broadcast %9 : vector<64x1xf32> to vector<64x48xf32>
    %164 = arith.mulf %162, %163 : vector<64x48xf32>
    %c5_67 = arith.constant 5 : index
    %c0_68 = arith.constant 0 : index
    %c0_69 = arith.constant 0 : index
    %165 = vector.load %arg6[%c5_67, %c0_68, %c0_69] : memref<9x1x48xf32, #tpu.memory_space<vmem>>, vector<1x1x48xf32>
    %166 = vector.shape_cast %165 : vector<1x1x48xf32> to vector<1x48xf32>
    %167 = vector.broadcast %166 : vector<1x48xf32> to vector<64x48xf32>
    %168 = arith.mulf %164, %167 : vector<64x48xf32>
    %169 = arith.addf %161, %168 : vector<64x48xf32>
    %170 = vector.extract_strided_slice %124 {offsets = [23, 0], sizes = [64, 48], strides = [1, 1]} : vector<96x48xf32> to vector<64x48xf32>
    %171 = vector.broadcast %7 : vector<64x1xf32> to vector<64x48xf32>
    %172 = arith.mulf %170, %171 : vector<64x48xf32>
    %c6_70 = arith.constant 6 : index
    %c0_71 = arith.constant 0 : index
    %c0_72 = arith.constant 0 : index
    %173 = vector.load %arg6[%c6_70, %c0_71, %c0_72] : memref<9x1x48xf32, #tpu.memory_space<vmem>>, vector<1x1x48xf32>
    %174 = vector.shape_cast %173 : vector<1x1x48xf32> to vector<1x48xf32>
    %175 = vector.broadcast %174 : vector<1x48xf32> to vector<64x48xf32>
    %176 = arith.mulf %172, %175 : vector<64x48xf32>
    %177 = arith.addf %169, %176 : vector<64x48xf32>
    %178 = vector.extract_strided_slice %124 {offsets = [24, 0], sizes = [64, 48], strides = [1, 1]} : vector<96x48xf32> to vector<64x48xf32>
    %c7_73 = arith.constant 7 : index
    %c0_74 = arith.constant 0 : index
    %c0_75 = arith.constant 0 : index
    %179 = vector.load %arg6[%c7_73, %c0_74, %c0_75] : memref<9x1x48xf32, #tpu.memory_space<vmem>>, vector<1x1x48xf32>
    %180 = vector.shape_cast %179 : vector<1x1x48xf32> to vector<1x48xf32>
    %181 = vector.broadcast %180 : vector<1x48xf32> to vector<64x48xf32>
    %182 = arith.mulf %178, %181 : vector<64x48xf32>
    %183 = arith.addf %177, %182 : vector<64x48xf32>
    %184 = vector.extract_strided_slice %124 {offsets = [25, 0], sizes = [64, 48], strides = [1, 1]} : vector<96x48xf32> to vector<64x48xf32>
    %185 = vector.broadcast %9 : vector<64x1xf32> to vector<64x48xf32>
    %186 = arith.mulf %184, %185 : vector<64x48xf32>
    %c8_76 = arith.constant 8 : index
    %c0_77 = arith.constant 0 : index
    %c0_78 = arith.constant 0 : index
    %187 = vector.load %arg6[%c8_76, %c0_77, %c0_78] : memref<9x1x48xf32, #tpu.memory_space<vmem>>, vector<1x1x48xf32>
    %188 = vector.shape_cast %187 : vector<1x1x48xf32> to vector<1x48xf32>
    %189 = vector.broadcast %188 : vector<1x48xf32> to vector<64x48xf32>
    %190 = arith.mulf %186, %189 : vector<64x48xf32>
    %191 = arith.addf %183, %190 : vector<64x48xf32>
    %192 = vector.extract_strided_slice %191 {offsets = [0, 0], sizes = [64, 16], strides = [1, 1]} : vector<64x48xf32> to vector<64x16xf32>
    %193 = vector.extract_strided_slice %191 {offsets = [0, 16], sizes = [64, 16], strides = [1, 1]} : vector<64x48xf32> to vector<64x16xf32>
    %194 = vector.extract_strided_slice %191 {offsets = [0, 32], sizes = [64, 16], strides = [1, 1]} : vector<64x48xf32> to vector<64x16xf32>
    %c0_79 = arith.constant 0 : index
    %c0_80 = arith.constant 0 : index
    %195 = vector.load %arg13[%c0_79, %c0_80] : memref<1x16xf32, #tpu.memory_space<vmem>>, vector<1x16xf32>
    %196 = vector.broadcast %195 : vector<1x16xf32> to vector<64x16xf32>
    %197 = arith.addf %194, %196 : vector<64x16xf32>
    %cst_81 = arith.constant dense<0xFF800000> : vector<16xf32>
    %198 = vector.multi_reduction <maximumf>, %197, %cst_81 [0] : vector<64x16xf32> to vector<16xf32>
    %199 = vector.shape_cast %198 : vector<16xf32> to vector<1x16xf32>
    %200 = vector.broadcast %199 : vector<1x16xf32> to vector<64x16xf32>
    %201 = arith.subf %197, %200 : vector<64x16xf32>
    %202 = math.exp %201 : vector<64x16xf32>
    %cst_82 = arith.constant dense<0.000000e+00> : vector<16xf32>
    %203 = vector.multi_reduction <add>, %202, %cst_82 [0] : vector<64x16xf32> to vector<16xf32>
    %204 = vector.shape_cast %203 : vector<16xf32> to vector<1x16xf32>
    %205 = vector.broadcast %204 : vector<1x16xf32> to vector<64x16xf32>
    %206 = arith.divf %202, %205 : vector<64x16xf32>
    %207 = arith.mulf %206, %192 : vector<64x16xf32>
    %208 = arith.truncf %207 : vector<64x16xf32> to vector<64x16xbf16>
    %cst_83 = arith.constant dense<0.000000e+00> : vector<32x16xf32>
    %209 = tpu.matmul %120, %208, %cst_83 {dimension_numbers = #tpu.dot_dimension_numbers<[0], [0], [1], [1], [0, 1, 1, 1], [], []>} : vector<64x32xbf16>, vector<64x16xbf16>, vector<32x16xf32> -> vector<32x16xf32>
    %c0_84 = arith.constant 0 : index
    %c0_85 = arith.constant 0 : index
    %210 = vector.load %arg9[%c0_84, %c0_85] : memref<64x32xbf16, #tpu.memory_space<vmem>>, vector<64x32xbf16>
    %211 = arith.truncf %209 : vector<32x16xf32> to vector<32x16xbf16>
    %cst_86 = arith.constant dense<0.000000e+00> : vector<64x16xf32>
    %212 = tpu.matmul %210, %211, %cst_86 {dimension_numbers = #tpu.dot_dimension_numbers<[1], [0], [0], [1], [0, 0, 1, 1], [], []>} : vector<64x32xbf16>, vector<32x16xbf16>, vector<64x16xf32> -> vector<64x16xf32>
    %213 = vector.extract_strided_slice %212 {offsets = [0, 0], sizes = [32, 16], strides = [1, 1]} : vector<64x16xf32> to vector<32x16xf32>
    %214 = vector.extract_strided_slice %212 {offsets = [32, 0], sizes = [32, 16], strides = [1, 1]} : vector<64x16xf32> to vector<32x16xf32>
    %c0_87 = arith.constant 0 : index
    %c0_88 = arith.constant 0 : index
    %215 = memref.load %arg14[%c0_87, %c0_88] : memref<1x1xf32, #tpu.memory_space<smem>>
    %216 = arith.negf %214 : vector<32x16xf32>
    %217 = math.exp %216 : vector<32x16xf32>
    %cst_89 = arith.constant 1.000000e+00 : f32
    %218 = vector.broadcast %cst_89 : f32 to vector<32x16xf32>
    %219 = arith.addf %218, %217 : vector<32x16xf32>
    %220 = arith.divf %218, %219 : vector<32x16xf32>
    %221 = arith.mulf %214, %220 : vector<32x16xf32>
    %222 = vector.broadcast %215 : f32 to vector<32x16xf32>
    %223 = arith.addf %221, %222 : vector<32x16xf32>
    %224 = arith.mulf %213, %223 : vector<32x16xf32>
    %c0_90 = arith.constant 0 : index
    %c0_91 = arith.constant 0 : index
    %225 = vector.load %arg10[%c0_90, %c0_91] : memref<32x32xbf16, #tpu.memory_space<vmem>>, vector<32x32xbf16>
    %226 = arith.truncf %224 : vector<32x16xf32> to vector<32x16xbf16>
    %cst_92 = arith.constant dense<0.000000e+00> : vector<32x16xf32>
    %227 = tpu.matmul %225, %226, %cst_92 {dimension_numbers = #tpu.dot_dimension_numbers<[1], [0], [0], [1], [0, 0, 1, 1], [], []>} : vector<32x32xbf16>, vector<32x16xbf16>, vector<32x16xf32> -> vector<32x16xf32>
    %228 = arith.truncf %193 : vector<64x16xf32> to vector<64x16xbf16>
    %229 = arith.truncf %227 : vector<32x16xf32> to vector<32x16xbf16>
    %cst_93 = arith.constant dense<0.000000e+00> : vector<64x32xf32>
    %230 = tpu.matmul %228, %229, %cst_93 {dimension_numbers = #tpu.dot_dimension_numbers<[1], [1], [0], [0], [0, 0, 1, 0], [], []>} : vector<64x16xbf16>, vector<32x16xbf16>, vector<64x32xf32> -> vector<64x32xf32>
    %cst_94 = arith.constant 1.000000e+00 : f32
    %231 = vector.broadcast %cst_94 : f32 to vector<1x32xf32>
    %232 = arith.subf %231, %12 : vector<1x32xf32>
    %233 = vector.broadcast %232 : vector<1x32xf32> to vector<64x32xf32>
    %234 = arith.mulf %233, %97 : vector<64x32xf32>
    %235 = vector.broadcast %12 : vector<1x32xf32> to vector<64x32xf32>
    %236 = arith.mulf %235, %230 : vector<64x32xf32>
    %237 = arith.addf %234, %236 : vector<64x32xf32>
    %c16_95 = arith.constant 16 : index
    %c0_96 = arith.constant 0 : index
    %238 = vector.load %arg17[%c16_95, %c0_96] : memref<96x32xf32, #tpu.memory_space<vmem>>, vector<64x32xf32>
    tpu.vector_store %arg17[%c16_95, %c0_96], %237 {strides = array<i32>} : memref<96x32xf32, #tpu.memory_space<vmem>>, vector<64x32xf32>,
    %c0_97 = arith.constant 0 : index
    %c0_98 = arith.constant 0 : index
    %239 = vector.load %arg17[%c0_97, %c0_98] : memref<96x32xf32, #tpu.memory_space<vmem>>, vector<96x32xf32>
    %cst_99 = arith.constant 0.000000e+00 : f32
    %240 = vector.broadcast %cst_99 : f32 to vector<64x32xf32>
    %241 = vector.extract_strided_slice %239 {offsets = [7, 0], sizes = [64, 32], strides = [1, 1]} : vector<96x32xf32> to vector<64x32xf32>
    %242 = vector.broadcast %7 : vector<64x1xf32> to vector<64x32xf32>
    %243 = arith.mulf %241, %242 : vector<64x32xf32>
    %c0_100 = arith.constant 0 : index
    %c0_101 = arith.constant 0 : index
    %c0_102 = arith.constant 0 : index
    %244 = vector.load %arg7[%c0_100, %c0_101, %c0_102] : memref<9x1x32xf32, #tpu.memory_space<vmem>>, vector<1x1x32xf32>
    %245 = vector.shape_cast %244 : vector<1x1x32xf32> to vector<1x32xf32>
    %246 = vector.broadcast %245 : vector<1x32xf32> to vector<64x32xf32>
    %247 = arith.mulf %243, %246 : vector<64x32xf32>
    %248 = arith.addf %240, %247 : vector<64x32xf32>
    %249 = vector.extract_strided_slice %239 {offsets = [8, 0], sizes = [64, 32], strides = [1, 1]} : vector<96x32xf32> to vector<64x32xf32>
    %c1_103 = arith.constant 1 : index
    %c0_104 = arith.constant 0 : index
    %c0_105 = arith.constant 0 : index
    %250 = vector.load %arg7[%c1_103, %c0_104, %c0_105] : memref<9x1x32xf32, #tpu.memory_space<vmem>>, vector<1x1x32xf32>
    %251 = vector.shape_cast %250 : vector<1x1x32xf32> to vector<1x32xf32>
    %252 = vector.broadcast %251 : vector<1x32xf32> to vector<64x32xf32>
    %253 = arith.mulf %249, %252 : vector<64x32xf32>
    %254 = arith.addf %248, %253 : vector<64x32xf32>
    %255 = vector.extract_strided_slice %239 {offsets = [9, 0], sizes = [64, 32], strides = [1, 1]} : vector<96x32xf32> to vector<64x32xf32>
    %256 = vector.broadcast %9 : vector<64x1xf32> to vector<64x32xf32>
    %257 = arith.mulf %255, %256 : vector<64x32xf32>
    %c2_106 = arith.constant 2 : index
    %c0_107 = arith.constant 0 : index
    %c0_108 = arith.constant 0 : index
    %258 = vector.load %arg7[%c2_106, %c0_107, %c0_108] : memref<9x1x32xf32, #tpu.memory_space<vmem>>, vector<1x1x32xf32>
    %259 = vector.shape_cast %258 : vector<1x1x32xf32> to vector<1x32xf32>
    %260 = vector.broadcast %259 : vector<1x32xf32> to vector<64x32xf32>
    %261 = arith.mulf %257, %260 : vector<64x32xf32>
    %262 = arith.addf %254, %261 : vector<64x32xf32>
    %263 = vector.extract_strided_slice %239 {offsets = [15, 0], sizes = [64, 32], strides = [1, 1]} : vector<96x32xf32> to vector<64x32xf32>
    %264 = vector.broadcast %7 : vector<64x1xf32> to vector<64x32xf32>
    %265 = arith.mulf %263, %264 : vector<64x32xf32>
    %c3_109 = arith.constant 3 : index
    %c0_110 = arith.constant 0 : index
    %c0_111 = arith.constant 0 : index
    %266 = vector.load %arg7[%c3_109, %c0_110, %c0_111] : memref<9x1x32xf32, #tpu.memory_space<vmem>>, vector<1x1x32xf32>
    %267 = vector.shape_cast %266 : vector<1x1x32xf32> to vector<1x32xf32>
    %268 = vector.broadcast %267 : vector<1x32xf32> to vector<64x32xf32>
    %269 = arith.mulf %265, %268 : vector<64x32xf32>
    %270 = arith.addf %262, %269 : vector<64x32xf32>
    %271 = vector.extract_strided_slice %239 {offsets = [16, 0], sizes = [64, 32], strides = [1, 1]} : vector<96x32xf32> to vector<64x32xf32>
    %c4_112 = arith.constant 4 : index
    %c0_113 = arith.constant 0 : index
    %c0_114 = arith.constant 0 : index
    %272 = vector.load %arg7[%c4_112, %c0_113, %c0_114] : memref<9x1x32xf32, #tpu.memory_space<vmem>>, vector<1x1x32xf32>
    %273 = vector.shape_cast %272 : vector<1x1x32xf32> to vector<1x32xf32>
    %274 = vector.broadcast %273 : vector<1x32xf32> to vector<64x32xf32>
    %275 = arith.mulf %271, %274 : vector<64x32xf32>
    %276 = arith.addf %270, %275 : vector<64x32xf32>
    %277 = vector.extract_strided_slice %239 {offsets = [17, 0], sizes = [64, 32], strides = [1, 1]} : vector<96x32xf32> to vector<64x32xf32>
    %278 = vector.broadcast %9 : vector<64x1xf32> to vector<64x32xf32>
    %279 = arith.mulf %277, %278 : vector<64x32xf32>
    %c5_115 = arith.constant 5 : index
    %c0_116 = arith.constant 0 : index
    %c0_117 = arith.constant 0 : index
    %280 = vector.load %arg7[%c5_115, %c0_116, %c0_117] : memref<9x1x32xf32, #tpu.memory_space<vmem>>, vector<1x1x32xf32>
    %281 = vector.shape_cast %280 : vector<1x1x32xf32> to vector<1x32xf32>
    %282 = vector.broadcast %281 : vector<1x32xf32> to vector<64x32xf32>
    %283 = arith.mulf %279, %282 : vector<64x32xf32>
    %284 = arith.addf %276, %283 : vector<64x32xf32>
    %285 = vector.extract_strided_slice %239 {offsets = [23, 0], sizes = [64, 32], strides = [1, 1]} : vector<96x32xf32> to vector<64x32xf32>
    %286 = vector.broadcast %7 : vector<64x1xf32> to vector<64x32xf32>
    %287 = arith.mulf %285, %286 : vector<64x32xf32>
    %c6_118 = arith.constant 6 : index
    %c0_119 = arith.constant 0 : index
    %c0_120 = arith.constant 0 : index
    %288 = vector.load %arg7[%c6_118, %c0_119, %c0_120] : memref<9x1x32xf32, #tpu.memory_space<vmem>>, vector<1x1x32xf32>
    %289 = vector.shape_cast %288 : vector<1x1x32xf32> to vector<1x32xf32>
    %290 = vector.broadcast %289 : vector<1x32xf32> to vector<64x32xf32>
    %291 = arith.mulf %287, %290 : vector<64x32xf32>
    %292 = arith.addf %284, %291 : vector<64x32xf32>
    %293 = vector.extract_strided_slice %239 {offsets = [24, 0], sizes = [64, 32], strides = [1, 1]} : vector<96x32xf32> to vector<64x32xf32>
    %c7_121 = arith.constant 7 : index
    %c0_122 = arith.constant 0 : index
    %c0_123 = arith.constant 0 : index
    %294 = vector.load %arg7[%c7_121, %c0_122, %c0_123] : memref<9x1x32xf32, #tpu.memory_space<vmem>>, vector<1x1x32xf32>
    %295 = vector.shape_cast %294 : vector<1x1x32xf32> to vector<1x32xf32>
    %296 = vector.broadcast %295 : vector<1x32xf32> to vector<64x32xf32>
    %297 = arith.mulf %293, %296 : vector<64x32xf32>
    %298 = arith.addf %292, %297 : vector<64x32xf32>
    %299 = vector.extract_strided_slice %239 {offsets = [25, 0], sizes = [64, 32], strides = [1, 1]} : vector<96x32xf32> to vector<64x32xf32>
    %300 = vector.broadcast %9 : vector<64x1xf32> to vector<64x32xf32>
    %301 = arith.mulf %299, %300 : vector<64x32xf32>
    %c8_124 = arith.constant 8 : index
    %c0_125 = arith.constant 0 : index
    %c0_126 = arith.constant 0 : index
    %302 = vector.load %arg7[%c8_124, %c0_125, %c0_126] : memref<9x1x32xf32, #tpu.memory_space<vmem>>, vector<1x1x32xf32>
    %303 = vector.shape_cast %302 : vector<1x1x32xf32> to vector<1x32xf32>
    %304 = vector.broadcast %303 : vector<1x32xf32> to vector<64x32xf32>
    %305 = arith.mulf %301, %304 : vector<64x32xf32>
    %306 = arith.addf %298, %305 : vector<64x32xf32>
    %cst_127 = arith.constant 1.000000e+00 : f32
    %307 = vector.broadcast %cst_127 : f32 to vector<1x32xf32>
    %308 = arith.subf %307, %13 : vector<1x32xf32>
    %309 = vector.broadcast %308 : vector<1x32xf32> to vector<64x32xf32>
    %310 = arith.mulf %309, %237 : vector<64x32xf32>
    %311 = vector.broadcast %18 : vector<1x32xf32> to vector<64x32xf32>
    %312 = arith.addf %306, %311 : vector<64x32xf32>
    %313 = vector.broadcast %13 : vector<1x32xf32> to vector<64x32xf32>
    %314 = arith.mulf %313, %312 : vector<64x32xf32>
    %315 = arith.addf %310, %314 : vector<64x32xf32>
    %316 = arith.truncf %315 : vector<64x32xf32> to vector<64x32xbf16>
    %c0_128 = arith.constant 0 : index
    %c0_129 = arith.constant 0 : index
    %317 = vector.load %arg11[%c0_128, %c0_129] : memref<32x128xbf16, #tpu.memory_space<vmem>>, vector<32x128xbf16>
    %cst_130 = arith.constant dense<0.000000e+00> : vector<64x128xf32>
    %318 = tpu.matmul %316, %317, %cst_130 {dimension_numbers = #tpu.dot_dimension_numbers<[1], [0], [0], [1], [0, 0, 1, 1], [], []>} : vector<64x32xbf16>, vector<32x128xbf16>, vector<64x128xf32> -> vector<64x128xf32>
    %c0_131 = arith.constant 0 : index
    %c0_132 = arith.constant 0 : index
    %319 = vector.load %arg4[%c0_131, %c0_132] : memref<1x128xf32, #tpu.memory_space<vmem>>, vector<1x128xf32>
    %320 = vector.broadcast %319 : vector<1x128xf32> to vector<64x128xf32>
    %321 = arith.addf %318, %320 : vector<64x128xf32>
    %cst_133 = arith.constant 0.000000e+00 : f32
    %322 = vector.broadcast %cst_133 : f32 to vector<64x128xf32>
    %323 = arith.maximumf %321, %322 : vector<64x128xf32>
    %324 = arith.truncf %323 : vector<64x128xf32> to vector<64x128xbf16>
    %c0_134 = arith.constant 0 : index
    %c0_135 = arith.constant 0 : index
    %325 = vector.load %arg12[%c0_134, %c0_135] : memref<128x32xbf16, #tpu.memory_space<vmem>>, vector<128x32xbf16>
    %cst_136 = arith.constant dense<0.000000e+00> : vector<64x32xf32>
    %326 = tpu.matmul %324, %325, %cst_136 {dimension_numbers = #tpu.dot_dimension_numbers<[1], [0], [0], [1], [0, 0, 1, 1], [], []>} : vector<64x128xbf16>, vector<128x32xbf16>, vector<64x32xf32> -> vector<64x32xf32>
    %327 = vector.broadcast %19 : vector<1x32xf32> to vector<64x32xf32>
    %328 = arith.addf %326, %327 : vector<64x32xf32>
    %cst_137 = arith.constant 1.000000e+00 : f32
    %329 = vector.broadcast %cst_137 : f32 to vector<1x32xf32>
    %330 = arith.subf %329, %14 : vector<1x32xf32>
    %331 = vector.broadcast %330 : vector<1x32xf32> to vector<64x32xf32>
    %332 = arith.mulf %331, %315 : vector<64x32xf32>
    %333 = vector.broadcast %14 : vector<1x32xf32> to vector<64x32xf32>
    %334 = arith.mulf %333, %328 : vector<64x32xf32>
    %335 = arith.addf %332, %334 : vector<64x32xf32>
    %c0_138 = arith.constant 0 : index
    %c0_139 = arith.constant 0 : index
    %c0_140 = arith.constant 0 : index
    %336 = vector.load %arg15[%c0_138, %c0_139, %c0_140] : memref<1x64x32xf32, #tpu.memory_space<vmem>>, vector<1x64x32xf32>
    %337 = vector.shape_cast %336 : vector<1x64x32xf32> to vector<64x32xf32>
    %338 = vector.shape_cast %335 : vector<64x32xf32> to vector<1x64x32xf32>
    tpu.vector_store %arg15[%c0_138, %c0_139, %c0_140], %338 {strides = array<i32>} : memref<1x64x32xf32, #tpu.memory_space<vmem>>, vector<1x64x32xf32>,
    %c0_141 = arith.constant 0 : index
    %c0_142 = arith.constant 0 : index
    %c0_143 = arith.constant 0 : index
    %339 = vector.load %arg16[%c0_141, %c0_142, %c0_143] : memref<1x32x16xf32, #tpu.memory_space<vmem>>, vector<1x32x16xf32>
    %340 = vector.shape_cast %339 : vector<1x32x16xf32> to vector<32x16xf32>
    %341 = vector.shape_cast %227 : vector<32x16xf32> to vector<1x32x16xf32>
    tpu.vector_store %arg16[%c0_141, %c0_142, %c0_143], %341 {strides = array<i32>} : memref<1x32x16xf32, #tpu.memory_space<vmem>>, vector<1x32x16xf32>,
    return
  }
  func.func @transform_0(%arg0: i32) -> (i32, i32, i32) {
    %c0_i32 = arith.constant 0 : i32
    %c0_i32_0 = arith.constant 0 : i32
    %c0_i32_1 = arith.constant 0 : i32
    return %arg0, %c0_i32, %c0_i32_0 : i32, i32, i32
  }
  func.func @transform_1(%arg0: i32) -> (i32, i32, i32) {
    %c0_i32 = arith.constant 0 : i32
    %c0_i32_0 = arith.constant 0 : i32
    %c0_i32_1 = arith.constant 0 : i32
    %c0_i32_2 = arith.constant 0 : i32
    return %c0_i32, %c0_i32_0, %c0_i32_1 : i32, i32, i32
  }
  func.func @transform_2(%arg0: i32) -> (i32, i32) {
    %c0_i32 = arith.constant 0 : i32
    %c0_i32_0 = arith.constant 0 : i32
    %c0_i32_1 = arith.constant 0 : i32
    return %c0_i32, %c0_i32_0 : i32, i32
  }
  func.func @transform_3(%arg0: i32) -> (i32, i32) {
    %c0_i32 = arith.constant 0 : i32
    %c0_i32_0 = arith.constant 0 : i32
    %c0_i32_1 = arith.constant 0 : i32
    return %c0_i32, %c0_i32_0 : i32, i32
  }
  func.func @transform_4(%arg0: i32) -> (i32, i32, i32) {
    %c0_i32 = arith.constant 0 : i32
    %c0_i32_0 = arith.constant 0 : i32
    %c0_i32_1 = arith.constant 0 : i32
    %c0_i32_2 = arith.constant 0 : i32
    return %c0_i32, %c0_i32_0, %c0_i32_1 : i32, i32, i32
  }
  func.func @transform_5(%arg0: i32) -> (i32, i32, i32) {
    %c0_i32 = arith.constant 0 : i32
    %c0_i32_0 = arith.constant 0 : i32
    %c0_i32_1 = arith.constant 0 : i32
    %c0_i32_2 = arith.constant 0 : i32
    return %c0_i32, %c0_i32_0, %c0_i32_1 : i32, i32, i32
  }
  func.func @transform_6(%arg0: i32) -> (i32, i32, i32) {
    %c0_i32 = arith.constant 0 : i32
    %c0_i32_0 = arith.constant 0 : i32
    %c0_i32_1 = arith.constant 0 : i32
    %c0_i32_2 = arith.constant 0 : i32
    return %c0_i32, %c0_i32_0, %c0_i32_1 : i32, i32, i32
  }
  func.func @transform_7(%arg0: i32) -> (i32, i32) {
    %c0_i32 = arith.constant 0 : i32
    %c0_i32_0 = arith.constant 0 : i32
    %c0_i32_1 = arith.constant 0 : i32
    return %c0_i32, %c0_i32_0 : i32, i32
  }
  func.func @transform_8(%arg0: i32) -> (i32, i32) {
    %c0_i32 = arith.constant 0 : i32
    %c0_i32_0 = arith.constant 0 : i32
    %c0_i32_1 = arith.constant 0 : i32
    return %c0_i32, %c0_i32_0 : i32, i32
  }
  func.func @transform_9(%arg0: i32) -> (i32, i32) {
    %c0_i32 = arith.constant 0 : i32
    %c0_i32_0 = arith.constant 0 : i32
    %c0_i32_1 = arith.constant 0 : i32
    return %c0_i32, %c0_i32_0 : i32, i32
  }
  func.func @transform_10(%arg0: i32) -> (i32, i32) {
    %c0_i32 = arith.constant 0 : i32
    %c0_i32_0 = arith.constant 0 : i32
    %c0_i32_1 = arith.constant 0 : i32
    return %c0_i32, %c0_i32_0 : i32, i32
  }
  func.func @transform_11(%arg0: i32) -> (i32, i32) {
    %c0_i32 = arith.constant 0 : i32
    %c0_i32_0 = arith.constant 0 : i32
    %c0_i32_1 = arith.constant 0 : i32
    return %c0_i32, %c0_i32_0 : i32, i32
  }
  func.func @transform_12(%arg0: i32) -> (i32, i32) {
    %c0_i32 = arith.constant 0 : i32
    %c0_i32_0 = arith.constant 0 : i32
    %c0_i32_1 = arith.constant 0 : i32
    return %c0_i32, %c0_i32_0 : i32, i32
  }
  func.func @transform_13(%arg0: i32) -> (i32, i32) {
    %c0_i32 = arith.constant 0 : i32
    %c0_i32_0 = arith.constant 0 : i32
    %c0_i32_1 = arith.constant 0 : i32
    return %c0_i32, %c0_i32_0 : i32, i32
  }
  func.func @transform_14(%arg0: i32) -> (i32, i32, i32) {
    %c0_i32 = arith.constant 0 : i32
    %c0_i32_0 = arith.constant 0 : i32
    %c0_i32_1 = arith.constant 0 : i32
    return %arg0, %c0_i32, %c0_i32_0 : i32, i32, i32
  }
  func.func @transform_15(%arg0: i32) -> (i32, i32, i32) {
    %c0_i32 = arith.constant 0 : i32
    %c0_i32_0 = arith.constant 0 : i32
    %c0_i32_1 = arith.constant 0 : i32
    return %arg0, %c0_i32, %c0_i32_0 : i32, i32, i32
  }
}

</mosaic_0001>

<bundles_post_ra>
// kernel: _lambda_.1
= control target key start
LH: loop header
LB: loop body
LE: loop exit
PB: predicated region body
PF: predicated region fallthrough
CT: control target
= control target key end

     0   :  { %s7252_s0 = inlined_call_operand.vmem [shape: f32[2,64,32], index: 0, kind: input, shape index: {}]   ;;  %s7253_s1 = inlined_call_operand.vmem [shape: f32[2,64,1], index: 1, kind: input, shape index: {}]   ;;  %s7254_s2 = inlined_call_operand.hbm [shape: f32[9,32], index: 2, kind: input, shape index: {}]   ;;  %s7255_s3 = inlined_call_operand.hbm [shape: f32[1,128], index: 3, kind: input, shape index: {}]   ;;  %s7256_s4 = inlined_call_operand.hbm [shape: f32[9,1,32], index: 4, kind: input, shape index: {}]   ;;  %s7257_s5 = inlined_call_operand.hbm [shape: f32[9,1,48], index: 5, kind: input, shape index: {}]   ;;  %s7258_s6 = inlined_call_operand.vmem [shape: f32[9,1,32], index: 6, kind: input, shape index: {}]   ;;  %s7259_s7 = inlined_call_operand.hbm [shape: bf16[32,48], index: 7, kind: input, shape index: {}]   ;;  %s7260_s8 = inlined_call_operand.hbm [shape: bf16[64,32], index: 8, kind: input, shape index: {}]   ;;  %s7261_s9 = inlined_call_operand.hbm [shape: bf16[32,32], index: 9, kind: input, shape index: {}]   ;;  %s7262_s10 = inlined_call_operand.vmem [shape: bf16[32,128], index: 10, kind: input, shape index: {}]   ;;  %s7263_s11 = inlined_call_operand.hbm [shape: bf16[128,32], index: 11, kind: input, shape index: {}]   ;;  %s7264_s12 = inlined_call_operand.vmem [shape: f32[1,16], index: 12, kind: input, shape index: {}]   ;;  %s7265_s13 = inlined_call_operand.<no memory space> [shape: f32[1,1], index: 13, kind: input, shape index: {}]   ;;  %s7266_s14 = inlined_call_operand.hbm [shape: f32[2,64,32], index: 14, kind: output, shape index: {0}]   ;;  %s7267_s15 = inlined_call_operand.vmem [shape: f32[2,32,16], index: 15, kind: output, shape index: {1}]  }
   0x1   :  { %7417 = sst [smem:[#allocation73_spill]] %s7255_s3 }
   0x2   :  { %21 = sst [smem:[#allocation4]] %s7265_s13 }
   0x3   :  { %22 = vsyncpa [#allocation6], 0 }
   0x4   :  { %23 = vsyncpa [#allocation9], 0 }
   0x5   :  { %24 = vsyncpa [#allocation12], 0 }
   0x6   :  { %25 = vsyncpa [#allocation15], 0 }
   0x7   :  { %26 = vsyncpa [#allocation18], 0 }
   0x8   :  { %27 = vsyncpa [#allocation7], 0 }
   0x9   :  { %29 = vsyncpa [#allocation7 + $0x1], 0  ;;  %s4743_s20 = smov 0   ;;  %s4745_s21 = smov 0  }
   0xa   :  { %s4747_s22 = smov 0   ;;  %s4749_s23 = smov 0  }
   0xb LB: > { %7418 = sst [smem:[#allocation26_spill]] %s4624_s20  ;;  %s4764_s13 = sadd.s32 4294967295, %s4636_s23   ;;  %s4636_s23 = sphi %s4749_s23, %s7715_s23   ;;  %s4632_s22 = sphi %s4747_s22, %s7717_s22   ;;  %s4628_s21 = sphi %s4745_s21, %s7719_s21   ;;  %s4624_s20 = sphi %s4743_s20, %s7718_s20  }
   0xc   : > { %7419 = sst [smem:[#allocation27_spill]] %s4632_s22  ;;  %s3880_s24 = sadd.s32 4294967294, %s4636_s23  }
   0xd   : > { %7420 = sst [smem:[#allocation28_spill]] %s4636_s23  ;;  %s4768_s25 = sadd.s32 1, %s4636_s23  }
   0xe   : > { %7421 = sst [smem:[#allocation29_spill]] %s4768_s25  ;;  %s341_s26 = sadd.s32 1, %s4632_s22 }
   0xf   : > { %s338_s27 = ssub.s32 %s4636_s23, %s4768_s25  ;;  %p351_p0 = scmp.ne.s32.totalorder %s4632_s22, %s4628_s21 }
  0x10   : > { %p339_p1 = scmp.eq.s32.totalorder %s338_s27, 0  ;;  %p352_p2 = scmp.eq.s32.totalorder %s4764_s13, 1 }
  0x11   : > { %p357_p3 = scmp.ne.s32.totalorder %s4628_s21, %s4624_s20  ;;  %p358_p4 = scmp.eq.s32.totalorder %s3880_s24, 1 }
  0x12   : > { %s4779_s28 = scalar_select %p339_p1, %s4632_s22, %s341_s26  }
  0x13   : > { %p4781_p5 = por %p352_p2, %p351_p0  ;;  %p4785_p6 = por %p358_p4, %p357_p3 }
  0x14   : > { %7422 = sst [smem:[#allocation30_spill]] %s4779_s28  ;;  %p3881_p7 = scmp.ge.s32.totalorder %s4636_s23, 1 }
  0x15   : > { %s7423_s29 = scalar_select %p4781_p5, 1, 0 }
  0x16   : > { %s7424_s30 = scalar_select %p4785_p6, 1, 0 }
  0x17   : > { %p391_p8 = scmp.lt.s32.totalorder %s4636_s23, 3  ;;  %p7271_p9 = scmp.eq.s32.totalorder %s4764_s13, 0 }
  0x18   : > { %7425 = sst [smem:[#allocation31_spill]] %s7424_s30  ;;  %s4638_s17 = smov [#allocation8]  }
  0x19   : > { %p4792_p10 = pnand %p3881_p7, %p391_p8  ;;  %s420_s18 = sshll.u32 %s4638_s17, 4  ;;  %s421_s18 = int_to_ptr.vmem [resolvable:$true] %s420_s18 }
  0x1a   : > { %s4639_s24 = smov [#allocation11]   ;;  %s4359_s28 = scalar_lea.vmem %s421_s18, 16 }
  0x1b   : > { %s7426_s16 = scalar_select %p4792_p10, 1, 0 }
  0x1c   : > { %p4175_p11 = pneg %p4792_p10  ;;  %s443_s26 = sshll.u32 %s4639_s24, 4  ;;  %s444_s26 = int_to_ptr.vmem [resolvable:$true] %s443_s26 }
  0x1d   : > { %p4360_p0 = scmp.ne.s32.totalorder %s421_s18, %s4359_s28  ;;  %s4366_s17 = scalar_lea.vmem %s421_s18, 32 }
  0x1e   : > { %p4800_p12 = pnand %p7271_p9, %p4175_p11  ;;  %p4367_p3 = scmp.lt.s32.totalorder %s421_s18, %s421_s18 }
  0x1f   : > { %p4368_p4 = scmp.lt.s32.totalorder %s4366_s17, %s4359_s28 }
  0x20   : > { %p4806_p13 = pneg %p4800_p12 }
  0x21   : > { %p4369_p7 = por %p4368_p4, %p4367_p3 }
  0x22   : > { %p4362_p1 = pnand %p4360_p0, %p4806_p13 }
  0x24   : > { %p4363_p2 = pneg %p4362_p1 }
  0x26   : > { %p4370_p8 = pnand %p4369_p7, %p4363_p2 }
  0x28   : > { %4373 = shalt.err (!%p4370_p8)
}
  0x29   : > { %s7429_s3 = sld [smem:[#allocation73_spill]]  ;;  %s4385_s25 = scalar_lea.vmem %s444_s26, 144 }
  0x2a   : > { %p4386_p11 = scmp.ne.s32.totalorder %s444_s26, %s4385_s25  ;;  %s4392_s30 = scalar_lea.vmem %s444_s26, 160 }
  0x2b   : > { %p4393_p0 = scmp.lt.s32.totalorder %s444_s26, %s444_s26  ;;  %p4394_p1 = scmp.lt.s32.totalorder %s4392_s30, %s4385_s25 }
  0x2c   : > { %p4388_p9 = pnand %p4386_p11, %p4806_p13 }
  0x2d   : > { %p4395_p5 = por %p4394_p1, %p4393_p0 }
  0x2e   : > { %p4389_p6 = pneg %p4388_p9 }
  0x2f   : > { %4181 = dma.hbm_to_vmem [thread:$0]  (!%p4800_p12), %s7429_s3, 16, %s421_s18, [#allocation9]  }
  0x30   : > { %p4396_p10 = pnand %p4395_p5, %p4389_p6 }
  0x32   : > { %4399 = shalt.err (!%p4396_p10)
}
  0x33   : > { %s7277_s28 = smov 16   ;;  %s7278_s17 = smov 1  }
  0x34   : > { %4187 = dma.hbm_to_vmem [thread:$0]  (!%p4800_p12), %s7257_s5, 144, %s444_s26, [#allocation12], %s7277_s28, %s7277_s28, %s7278_s17  }
  0x35   : > { %s4642_s24 = smov [#allocation14]   ;;  %s4643_s20 = smov [#allocation5]  }
  0x36   : > { %s472_s3 = sshll.u32 %s4642_s24, 4  ;;  %s406_s23 = sshll.u32 %s4643_s20, 4  ;;  %s473_s3 = int_to_ptr.vmem [resolvable:$true] %s472_s3  ;;  %s407_s23 = int_to_ptr.vmem [resolvable:$true] %s406_s23 }
  0x37   : > { %s4411_s25 = scalar_lea.vmem %s473_s3, 512  ;;  %p4419_p10 = scmp.lt.s32.totalorder %s473_s3, %s473_s3 }
  0x38   : > { %p4412_p5 = scmp.ne.s32.totalorder %s473_s3, %s4411_s25  ;;  %p4420_p2 = scmp.lt.s32.totalorder %s4411_s25, %s4411_s25 }
  0x3a   : > { %p4414_p6 = pnand %p4412_p5, %p4806_p13  ;;  %p4421_p3 = por %p4420_p2, %p4419_p10 }
  0x3c   : > { %p4415_p9 = pneg %p4414_p6 }
  0x3e   : > { %p4422_p4 = pnand %p4421_p3, %p4415_p9 }
  0x40   : > { %4425 = shalt.err (!%p4422_p4)
}
  0x41   : > { %s7279_s30 = smov 64   ;;  %s7281_s26 = smov 4  }
  0x42   : > { %4193 = dma.hbm_to_vmem [thread:$0]  (!%p4800_p12), %s7260_s8, 512, %s473_s3, [#allocation15], %s7279_s30, %s7279_s30, %s7281_s26  }
  0x43   : > { %s4437_s18 = scalar_lea.vmem %s407_s23, 256  ;;  %p4445_p0 = scmp.lt.s32.totalorder %s407_s23, %s407_s23 }
  0x44   : > { %p4438_p7 = scmp.ne.s32.totalorder %s407_s23, %s4437_s18  ;;  %p4446_p1 = scmp.lt.s32.totalorder %s4437_s18, %s4437_s18 }
  0x46   : > { %p4440_p8 = pnand %p4438_p7, %p4806_p13  ;;  %p4447_p5 = por %p4446_p1, %p4445_p0 }
  0x48   : > { %p4441_p11 = pneg %p4440_p8 }
  0x4a   : > { %p4448_p6 = pnand %p4447_p5, %p4441_p11 }
  0x4c   : > { %4451 = shalt.err (!%p4448_p6)
}
  0x4d   : > { %s4646_s24 = smov 128   ;;  %s4647_s25 = smov 8  }
  0x4e   : > { %4178 = dma.hbm_to_vmem [thread:$0]  (!%p4800_p12), %s7254_s2, 256, %s407_s23, [#allocation6], %s4646_s24, %s4646_s24, %s4647_s25  }
  0x4f   : > { %s4648_s3 = smov [#allocation10]   ;;  %s4649_s22 = smov [#allocation13]  }
  0x50   : > { %s430_s20 = sshll.u32 %s4648_s3, 4  ;;  %s459_s30 = sshll.u32 %s4649_s22, 4  ;;  %s431_s20 = int_to_ptr.vmem [resolvable:$true] %s430_s20  ;;  %s460_s30 = int_to_ptr.vmem [resolvable:$true] %s459_s30 }
  0x51   : > { %s4463_s26 = scalar_lea.vmem %s431_s20, 144  ;;  %s4470_s18 = scalar_lea.vmem %s431_s20, 160 }
  0x52   : > { %p4464_p9 = scmp.ne.s32.totalorder %s431_s20, %s4463_s26  ;;  %p4471_p3 = scmp.lt.s32.totalorder %s431_s20, %s431_s20 }
  0x53   : > { %p4472_p4 = scmp.lt.s32.totalorder %s4470_s18, %s4463_s26 }
  0x54   : > { %p4466_p10 = pnand %p4464_p9, %p4806_p13 }
  0x55   : > { %p4473_p7 = por %p4472_p4, %p4471_p3 }
  0x56   : > { %p4467_p2 = pneg %p4466_p10 }
  0x58   : > { %p4474_p8 = pnand %p4473_p7, %p4467_p2 }
  0x5a   : > { %4477 = shalt.err (!%p4474_p8)
}
  0x5b   : > { %s7430_s23 = smov 1   ;;  %s7431_s28 = smov 16  }
  0x5c   : > { %4184 = dma.hbm_to_vmem [thread:$0]  (!%p4800_p12), %s7256_s4, 144, %s431_s20, [#allocation9], %s7431_s28, %s7431_s28, %s7430_s23  }
  0x5d   : > { %s4489_s25 = scalar_lea.vmem %s460_s30, 256  ;;  %p4497_p5 = scmp.lt.s32.totalorder %s460_s30, %s460_s30 }
  0x5e   : > { %p4490_p11 = scmp.ne.s32.totalorder %s460_s30, %s4489_s25  ;;  %p4498_p6 = scmp.lt.s32.totalorder %s4489_s25, %s4489_s25 }
  0x60   : > { %p4492_p0 = pnand %p4490_p11, %p4806_p13  ;;  %p4499_p9 = por %p4498_p6, %p4497_p5 }
  0x62   : > { %p4493_p1 = pneg %p4492_p0 }
  0x64   : > { %p4500_p10 = pnand %p4499_p9, %p4493_p1 }
  0x66   : > { %4503 = shalt.err (!%p4500_p10)
}
  0x67   : > { %s7432_s26 = smov 4   ;;  %s7433_s3 = smov 64  }
  0x68   : > { %4190 = dma.hbm_to_vmem [thread:$0]  (!%p4800_p12), %s7259_s7, 256, %s460_s30, [#allocation12], %s7433_s3, %s7433_s3, %s7432_s26  }
  0x69   : > { %s4650_s20 = smov [#allocation16]   ;;  %s4651_s28 = smov [#allocation17]  }
  0x6a   : > { %s485_s23 = sshll.u32 %s4650_s20, 4  ;;  %s501_s17 = sshll.u32 %s4651_s28, 4  ;;  %s486_s23 = int_to_ptr.vmem [resolvable:$true] %s485_s23  ;;  %s502_s17 = int_to_ptr.vmem [resolvable:$true] %s501_s17 }
  0x6b   : > { %s4515_s24 = scalar_lea.vmem %s486_s23, 256  ;;  %p4523_p7 = scmp.lt.s32.totalorder %s486_s23, %s486_s23 }
  0x6c   : > { %p4516_p2 = scmp.ne.s32.totalorder %s486_s23, %s4515_s24  ;;  %p4524_p8 = scmp.lt.s32.totalorder %s4515_s24, %s4515_s24 }
  0x6e   : > { %p4518_p3 = pnand %p4516_p2, %p4806_p13  ;;  %p4525_p11 = por %p4524_p8, %p4523_p7 }
  0x70   : > { %p4519_p4 = pneg %p4518_p3 }
  0x72   : > { %p4526_p0 = pnand %p4525_p11, %p4519_p4 }
  0x74   : > { %4529 = shalt.err (!%p4526_p0)
}
  0x75   : > { %4196 = dma.hbm_to_vmem [thread:$0]  (!%p4800_p12), %s7261_s9, 256, %s486_s23, [#allocation15], %s7433_s3, %s7433_s3, %s7432_s26  }
  0x76   : > { %s4541_s22 = scalar_lea.vmem %s502_s17, 1024  ;;  %p4549_p9 = scmp.lt.s32.totalorder %s502_s17, %s502_s17 }
  0x77   : > { %p4542_p1 = scmp.ne.s32.totalorder %s502_s17, %s4541_s22  ;;  %p4550_p10 = scmp.lt.s32.totalorder %s4541_s22, %s4541_s22 }
  0x79   : > { %p4544_p5 = pnand %p4542_p1, %p4806_p13  ;;  %p4551_p2 = por %p4550_p10, %p4549_p9 }
  0x7b   : > { %p4545_p6 = pneg %p4544_p5 }
  0x7d   : > { %p4552_p3 = pnand %p4551_p2, %p4545_p6 }
  0x7f   : > { %4555 = shalt.err (!%p4552_p3)
}
  0x80   : > { %4199 = dma.hbm_to_vmem [thread:$0]  (!%p4800_p12), %s7263_s11, 1024, %s502_s17, [#allocation18], %s7433_s3, %s7433_s3, %s7432_s26  }
  0x81   : > { %p7434_p4 = scmp.ne.s32.totalorder %s7426_s16, 0 }
  0x83   : > { %531 = sbr.rel (%p7434_p4) target bundleno = 2611 (0xa33), region = 76 }
  0x88   : > { %p7435_p13 = scmp.eq.s32.totalorder %s4764_s13, 0 }
  0x8a   : > { %4599 = dma.done.wait (%p7435_p13), [#allocation6], 256   ;;  %p7436_p7 = pmov %p7435_p13 }
  0x8c   : > { %4601 = vsyncadd (%p7436_p7), [#allocation6], 4294967040  ;;  %p7437_p8 = pmov %p7436_p7 }
  0x8d   : > { %p7438_p11 = pmov %p7436_p7 }
  0x8e   : > { %4603 = dma.done.wait (%p7437_p8), [#allocation9], 160  }
  0x8f   : > { %4605 = vsyncadd (%p7438_p11), [#allocation9], 4294967136  ;;  %p7439_p0 = pmov %p7436_p7 }
  0x91   : > { %4607 = dma.done.wait (%p7439_p0), [#allocation12], 400   ;;  %p7440_p12 = pmov %p7439_p0 }
  0x92   : > { %p7441_p1 = pmov %p7439_p0 }
  0x93   : > { %4609 = vsyncadd (%p7440_p12), [#allocation12], 4294966896 }
  0x94   : > { %4611 = dma.done.wait (%p7441_p1), [#allocation15], 768   ;;  %p7442_p5 = pmov %p7439_p0 }
  0x95   : > { %p7443_p6 = pmov %p7439_p0 }
  0x96   : > { %4613 = vsyncadd (%p7442_p5), [#allocation15], 4294966528 }
  0x97   : > { %4615 = dma.done.wait (%p7443_p6), [#allocation18], 1024   ;;  %p7444_p9 = pmov %p7439_p0 }
  0x98   : > { %vm623_vm0 = vcmask 261120   ;;  %p612_p10 = scmp.lt.s32.totalorder %s4764_s13, 1  ;;  %v4652_v0 = vmov 0   ;;  %v4653_v1 = vmov 0.0   ;;  %v3907_v2 = vld [vmem:[%s7253_s1 + $0x50] sm:$0xff]  ;;  %v3905_v3 = vld [vmem:[%s7253_s1 + $0x40] sm:$0xff]  ;;  %v1297_v27 = vlaneseq }
  0x99   : > { %4617 = vsyncadd (%p7444_p9), [#allocation18], 4294966272  ;;  %4275 = vset.pattern.permute.xlu1 %v4652_v0  ;;  %4274 = vset.pattern.permute.xlu0 %v4652_v0  ;;  %625 = vst.msk [vmem:[#allocation2 + $0x8] sm:$0xff] %vm623_vm0, %v4653_v1  ;;  %v3906_v4 = vld [vmem:[%s7253_s1 + $0x48] sm:$0xff]  ;;  %v657_v5 = vld [vmem:[%s7253_s1] sm:$0xff]  ;;  %vm636_vm1 = vcmask 392192  }
  0x9a   : > { %624 = vst.msk [vmem:[#allocation2] sm:$0xff] %vm623_vm0, %v4653_v1  ;;  %626 = vst.msk [vmem:[#allocation2 + $0x10] sm:$0xff] %vm623_vm0, %v4653_v1  ;;  %s4934_s16 = scalar_select %p612_p10, %s4764_s13, 1  ;;  %854 = vperm.xlu1 %4275, %v3907_v2   ;;  %846 = vperm.xlu0 %4274, %v3905_v3   ;;  %v658_v6 = vld [vmem:[%s7253_s1 + $0x8] sm:$0xff]  ;;  %v659_v7 = vld [vmem:[%s7253_s1 + $0x10] sm:$0xff]  ;;  %v5078_v42 = vshrl.u32 %v1297_v27, 7 }
  0x9b   : > { %627 = vst.msk [vmem:[#allocation2 + $0x18] sm:$0xff] %vm623_vm0, %v4653_v1  ;;  %628 = vst.msk [vmem:[#allocation2 + $0x20] sm:$0xff] %vm623_vm0, %v4653_v1  ;;  %v3908_v14 = vld [vmem:[%s7253_s1 + $0x58] sm:$0xff]  ;;  %v3909_v15 = vld [vmem:[%s7253_s1 + $0x60] sm:$0xff]  ;;  %vm728_vm2 = vcmask 1046528   ;;  %vm876_vm3 = vcmask 1040384  }
  0x9c   : > { %629 = vst.msk [vmem:[#allocation2 + $0x28] sm:$0xff] %vm623_vm0, %v4653_v1  ;;  %630 = vst.msk [vmem:[#allocation2 + $0x30] sm:$0xff] %vm623_vm0, %v4653_v1  ;;  %s3998_s23 = sshll.u32 %s4934_s16, 6  ;;  %v660_v18 = vld [vmem:[%s7253_s1 + $0x18] sm:$0xff]  ;;  %v661_v19 = vld [vmem:[%s7253_s1 + $0x20] sm:$0xff]  ;;  %v1311_v54 = vsub.s32 4, %v5078_v42 }
  0x9d   : > { %631 = vst.msk [vmem:[#allocation2 + $0x38] sm:$0xff] %vm623_vm0, %v4653_v1  ;;  %632 = vst.msk [vmem:[#allocation2 + $0x40] sm:$0xff] %vm623_vm0, %v4653_v1  ;;  %s616_s18 = scalar_lea.vmem %s7252_s0, %s3998_s23  ;;  %v3910_v20 = vld [vmem:[%s7253_s1 + $0x68] sm:$0xff]  ;;  %v3911_v21 = vld [vmem:[%s7253_s1 + $0x70] sm:$0xff]  ;;  %v1299_v56 = vsub.s32 0, %v5078_v42  ;;  %vm936_vm4 = vcmask 1045504  }
  0x9e   : > { %633 = vst.msk [vmem:[#allocation2 + $0x48] sm:$0xff] %vm623_vm0, %v4653_v1  ;;  %634 = vst.msk [vmem:[#allocation2 + $0x50] sm:$0xff] %vm623_vm0, %v4653_v1  ;;  %850 = vperm.xlu0 %4274, %v3906_v4   ;;  %698 = vperm.xlu1 %4275, %v657_v5   ;;  %v4958_v8 = vld [vmem:[%s616_s18] sm:$0xff]  ;;  %v4960_v9 = vld [vmem:[%s616_s18 + $0x8] sm:$0xff]  ;;  %s4654_s20 = smov 32   ;;  %vm2128_vm5 = vcmask 392448  }
  0x9f   : > { %635 = vst.msk [vmem:[#allocation2 + $0x58] sm:$0xff] %vm623_vm0, %v4653_v1  ;;  %v4962_v10 = vld [vmem:[%s616_s18 + $0x10] sm:$0xff]  ;;  %v4964_v11 = vld [vmem:[%s616_s18 + $0x18] sm:$0xff]  ;;  %v4966_v12 = vld [vmem:[%s616_s18 + $0x20] sm:$0xff]  ;;  %vm2140_vm6 = vcmask 391424   ;;  %vm2126_vm7 = vcmask 392455  }
  0xa0   : > { %v4968_v13 = vld [vmem:[%s616_s18 + $0x28] sm:$0xff]  ;;  %676 = vst.msk [vmem:[#allocation2 + $0x10] sm:$0xff] %vm623_vm0, %v4958_v8  ;;  %677 = vst.msk [vmem:[#allocation2 + $0x18] sm:$0xff] %vm623_vm0, %v4960_v9  ;;  %v4988_v16 = vld [vmem:[%s616_s18 + $0x30] sm:$0xff]  ;;  %vm2310_vm8 = vsmask.f32 4352 }
  0xa1   : > { %7445 = vst [vmem:[#allocation32_spill] sm:$0xff] %v4968_v13  ;;  %678 = vst.msk [vmem:[#allocation2 + $0x20] sm:$0xff] %vm623_vm0, %v4962_v10  ;;  %v4990_v17 = vld [vmem:[%s616_s18 + $0x38] sm:$0xff]  ;;  %v662_v22 = vld [vmem:[%s7253_s1 + $0x28] sm:$0xff]  ;;  %s4655_s19 = smov 96   ;;  %s4656_s27 = smov 112  }
  0xa2   : > { %702 = vperm.xlu0 %4274, %v658_v6   ;;  %706 = vperm.xlu1 %4275, %v659_v7   ;;  %679 = vst.msk [vmem:[#allocation2 + $0x28] sm:$0xff] %vm623_vm0, %v4964_v11  ;;  %680 = vst.msk [vmem:[#allocation2 + $0x30] sm:$0xff] %vm623_vm0, %v4966_v12  ;;  %v663_v23 = vld [vmem:[%s7253_s1 + $0x30] sm:$0xff]  ;;  %v3912_v24 = vld [vmem:[%s7253_s1 + $0x78] sm:$0xff]  ;;  %vm2367_vm9 = vcmask 523264   ;;  %vm2698_vm10 = vcmask 130048  }
  0xa3   : > { %681 = vst.msk [vmem:[#allocation2 + $0x38] sm:$0xff] %vm623_vm0, %v4968_v13  ;;  %7446 = vst [vmem:[#allocation33_spill] sm:$0xff] %v4988_v16  ;;  %v664_v25 = vld [vmem:[%s7253_s1 + $0x38] sm:$0xff]  ;;  %v5044_v26 = vld [vmem:[#allocation10 + $0x1] ss:$0 sm:$0xff]  ;;  %s2530_s26 = sld [smem:[#allocation4]] }
  0xa4   : > { %7447 = vst [vmem:[#allocation34_spill] sm:$0xff] %v4990_v17  ;;  %682 = vst.msk [vmem:[#allocation2 + $0x40] sm:$0xff] %vm623_vm0, %v4988_v16  ;;  %v5048_v29 = vld [vmem:[#allocation2 + $0x8] sm:$0xff]  ;;  %v5054_v32 = vld [vmem:[#allocation10 + $0x4] ss:$0 sm:$0xff]  ;;  %s3999_s3 = sshll.u32 %s4934_s16, 5 }
  0xa5   : > { %683 = vst.msk [vmem:[#allocation2 + $0x48] sm:$0xff] %vm623_vm0, %v4990_v17  ;;  %v5058_v33 = vmul.f32 %v5044_v26, %v5048_v29  ;;  %v5068_v38 = vld [vmem:[#allocation10 + $0x7] ss:$0 sm:$0xff]  ;;  %7448 = vst [vmem:[#allocation35_spill] sm:$0xff] %v5078_v42  ;;  %v5084_v44 = vld [vmem:[#allocation5] sm:$0xff]  ;;  %s621_s17 = scalar_lea.vmem %s7267_s15, %s3999_s3  ;;  %s4000_s23 = sshll.u32 %s4764_s13, 10 }
  0xa6   : > { %858 = vperm.xlu0 %4274, %v3908_v14   ;;  %862 = vperm.xlu1 %4275, %v3909_v15   ;;  %641 = vst.msk [vmem:[#allocation3 + $0x20] sm:$0xff] %vm636_vm1, %v4653_v1  ;;  %637 = vst.msk [vmem:[#allocation3] sm:$0xff] %vm636_vm1, %v4653_v1  ;;  %v5092_v50 = vsub.f32 1.0, %v5084_v44  ;;  %v5137_v6 = vrot.slane %v5084_v44, %v1311_v54  ;;  %v5158_v27 = vrot.slane %v5084_v44, %v1299_v56  ;;  %s7202_s24 = scalar_lea.hbm %s7266_s14, %s4000_s23  ;;  %p7710_p3 = scmp.ne.s32.totalorder %s7423_s29, 0 }
  0xa7   : > { %638 = vst.msk [vmem:[#allocation3 + $0x8] sm:$0xff] %vm636_vm1, %v4653_v1  ;;  %639 = vst.msk [vmem:[#allocation3 + $0x10] sm:$0xff] %vm636_vm1, %v4653_v1  ;;  %v5046_v28 = vld [vmem:[#allocation2 + $0x10] sm:$0xff]  ;;  %v5050_v30 = vld [vmem:[#allocation2 + $0x18] sm:$0xff]  ;;  %v7285_v47 = vrot.slane %v5058_v33, 1  ;;  %s4657_s25 = smov [#allocation19]  }
  0xa8   : > { %640 = vst.msk [vmem:[#allocation3 + $0x18] sm:$0xff] %vm636_vm1, %v4653_v1  ;;  %642 = vst.msk [vmem:[#allocation3 + $0x28] sm:$0xff] %vm636_vm1, %v4653_v1  ;;  %v796_v31 = vmul.f32 %v5044_v26, %v5046_v28  ;;  %v5060_v34 = vld [vmem:[#allocation2 + $0x20] sm:$0xff]  ;;  %v797_v36 = vmul.f32 %v5044_v26, %v5050_v30  ;;  %v1016_v37 = vmul.f32 %v5054_v32, %v5050_v30  ;;  %s4560_s22 = sshll.u32 %s4657_s25, 4  ;;  %s4561_s22 = int_to_ptr.vmem [resolvable:$false] %s4560_s22 }
  0xa9   : > { %643 = vst.msk [vmem:[#allocation3 + $0x30] sm:$0xff] %vm636_vm1, %v4653_v1  ;;  %644 = vst.msk [vmem:[#allocation3 + $0x38] sm:$0xff] %vm636_vm1, %v4653_v1  ;;  %v5062_v35 = vld [vmem:[#allocation2 + $0x28] sm:$0xff]  ;;  %v1017_v39 = vmul.f32 %v5054_v32, %v5060_v34  ;;  %v1178_v40 = vmul.f32 %v5068_v38, %v5060_v34  ;;  %v5082_v43 = vmul.f32 %v5054_v32, %v5046_v28  ;;  %v5106_v60 = vld [vmem:[#allocation2 + $0x30] sm:$0xff]  ;;  %s4562_s18 = scalar_lea.vmem %s4561_s22, 2048 }
  0xaa   : > { %710 = vperm.xlu0 %4274, %v660_v18   ;;  %714 = vperm.xlu1 %4275, %v661_v19   ;;  %645 = vst.msk [vmem:[#allocation3 + $0x40] sm:$0xff] %vm636_vm1, %v4653_v1  ;;  %646 = vst.msk [vmem:[#allocation3 + $0x48] sm:$0xff] %vm636_vm1, %v4653_v1  ;;  %v5076_v41 = vmul.f32 %v5068_v38, %v5062_v35  ;;  %v812_v45 = vrot.slane %v796_v31, 1  ;;  %v5088_v46 = vmul.f32 %v5068_v38, %v5050_v30  ;;  %v5139_v7 = vld [vmem:[#allocation2 + $0x38] sm:$0xff] }
  0xab   : > { %647 = vst.msk [vmem:[#allocation3 + $0x50] sm:$0xff] %vm636_vm1, %v4653_v1  ;;  %648 = vst.msk [vmem:[#allocation3 + $0x58] sm:$0xff] %vm636_vm1, %v4653_v1  ;;  %v814_v48 = vrot.slane %v797_v36, 1  ;;  %v1032_v49 = vrot.slane %v1016_v37, 1  ;;  %v1034_v51 = vrot.slane %v1017_v39, 1  ;;  %v1194_v52 = vrot.slane %v1178_v40, 1 }
  0xac   : > { %7449 = vst [vmem:[#allocation36_spill] sm:$0xff] %v5084_v44  ;;  %7450 = vst [vmem:[#allocation37_spill] sm:$0xff] %v5092_v50  ;;  %v1196_v53 = vrot.slane %v5076_v41, 1  ;;  %v7284_v55 = vrot.slane %v5082_v43, 1  ;;  %v798_v57 = vmul.f32 %v5044_v26, %v5060_v34  ;;  %v5103_v58 = vsel %vm728_vm2, %v7285_v47, %v812_v45  ;;  %v5160_v36 = vld [vmem:[#allocation2 + $0x48] sm:$0xff] }
  0xad   : > { %v7283_v59 = vrot.slane %v5088_v46, 1  ;;  %v1018_v61 = vmul.f32 %v5054_v32, %v5062_v35  ;;  %v799_v62 = vmul.f32 %v5044_v26, %v5062_v35  ;;  %v5113_v63 = vsel %vm728_vm2, %v812_v45, %v814_v48  ;;  %7453 = vst [vmem:[#allocation40_spill] sm:$0xff] %v5160_v36 }
  0xae   : > { %866 = vperm.xlu0 %4274, %v3910_v20   ;;  %870 = vperm.xlu1 %4275, %v3911_v21   ;;  %v5118_v0 = vsel %vm728_vm2, %v7284_v55, %v1032_v49  ;;  %v5121_v1 = vrot.slane %v5092_v50, %v1299_v56  ;;  %v1019_v2 = vmul.f32 %v5054_v32, %v5106_v60  ;;  %v816_v14 = vrot.slane %v798_v57, 1  ;;  %v5218_v55 = vld [vmem:[#allocation10 + $0x2] ss:$0 sm:$0xff] }
  0xaf   : > { %v5126_v3 = vsel %vm728_vm2, %v1032_v49, %v1034_v51  ;;  %v5131_v4 = vsel %vm728_vm2, %v7283_v59, %v1194_v52  ;;  %v5134_v5 = vsel %vm728_vm2, %v1194_v52, %v1196_v53  ;;  %v1180_v15 = vmul.f32 %v5068_v38, %v5106_v60 }
  0xb0   : > { %7451 = vst [vmem:[#allocation38_spill] sm:$0xff] %v5121_v1  ;;  %v800_v18 = vmul.f32 %v5044_v26, %v5106_v60  ;;  %v801_v19 = vmul.f32 %v5044_v26, %v5139_v7  ;;  %v1036_v20 = vrot.slane %v1018_v61, 1  ;;  %v818_v21 = vrot.slane %v799_v62, 1 }
  0xb1   : > { %v1038_v31 = vrot.slane %v1019_v2, 1  ;;  %v5168_v39 = vmul.f32 %v5121_v1, %v4958_v8  ;;  %v5181_v45 = vsel %vm728_vm2, %v814_v48, %v816_v14  ;;  %v1198_v49 = vrot.slane %v1180_v15, 1 }
  0xb2   : > { %718 = vperm.xlu0 %4274, %v662_v22   ;;  %722 = vperm.xlu1 %4275, %v663_v23   ;;  %v1181_v22 = vmul.f32 %v5068_v38, %v5139_v7  ;;  %v5149_v23 = vld [vmem:[#allocation2 + $0x40] sm:$0xff]  ;;  %v820_v52 = vrot.slane %v800_v18, 1  ;;  %v822_v54 = vrot.slane %v801_v19, 1  ;;  %v5186_v57 = vsel %vm728_vm2, %v1034_v51, %v1036_v20 }
  0xb3   : > { %7452 = vst [vmem:[#allocation39_spill] sm:$0xff] %v5149_v23  ;;  %v5164_v37 = vmul.f32 %v5054_v32, %v5149_v23  ;;  %7455 = vst [vmem:[#allocation42_spill] sm:$0xff] %v5168_v39  ;;  %v1182_v40 = vmul.f32 %v5068_v38, %v5149_v23  ;;  %v5178_v41 = vmul.f32 %v5044_v26, %v5149_v23 }
  0xb4   : > { %v5189_v61 = vsel %vm728_vm2, %v816_v14, %v818_v21  ;;  %v1200_v62 = vrot.slane %v1181_v22, 1  ;;  %v5195_v26 = vmul.f32 %v5121_v1, %v4962_v10  ;;  %v5198_v48 = vsel %vm728_vm2, %v1036_v20, %v1038_v31 }
  0xb5   : > { %7454 = vst [vmem:[#allocation41_spill] sm:$0xff] %v5164_v37  ;;  %7457 = vst [vmem:[#allocation44_spill] sm:$0xff] %v5178_v41  ;;  %v7290_v15 = vrot.slane %v5164_v37, 1  ;;  %v1202_v18 = vrot.slane %v1182_v40, 1  ;;  %v5205_v14 = vmul.f32 %v5054_v32, %v5160_v36  ;;  %v5210_v10 = vsel %vm728_vm2, %v1196_v53, %v1198_v49 }
  0xb6   : > { %874 = vperm.xlu0 %4274, %v3912_v24   ;;  %726 = vperm.xlu1 %4275, %v664_v25   ;;  %v1020_v24 = vmul.f32 %v5054_v32, %v5139_v7  ;;  %v5155_v25 = vmul.f32 %v5121_v1, %v4960_v9  ;;  %v5174_v9 = vmul.f32 %v5068_v38, %v5160_v36 }
  0xb7   : > { %7459 = vst [vmem:[#allocation46_spill] sm:$0xff] %v5195_v26  ;;  %7460 = vst [vmem:[#allocation47_spill] sm:$0xff] %v5205_v14  ;;  %v5213_v20 = vsel %vm728_vm2, %v818_v21, %v820_v52  ;;  %v5221_v32 = vsel %vm728_vm2, %v1198_v49, %v1200_v62  ;;  %v5225_v47 = vmul.f32 %v5121_v1, %v4964_v11  ;;  %v5242_v11 = vld [vmem:[#allocation10 + $0x5] ss:$0 sm:$0xff] }
  0xb8   : > { %7456 = vst [vmem:[#allocation43_spill] sm:$0xff] %v5174_v9  ;;  %v1040_v2 = vrot.slane %v1020_v24, 1  ;;  %7461 = vst [vmem:[#allocation48_spill] sm:$0xff] %v5213_v20  ;;  %v5216_v24 = vsel %vm728_vm2, %v820_v52, %v822_v54  ;;  %v5232_v21 = vmul.f32 %v5121_v1, %v4966_v12  ;;  %v7469_v50 = vrot.slane %v5174_v9, 1  ;;  %v5287_v9 = vld [vmem:[#allocation2 + $0x50] sm:$0xff] }
  0xb9   : > { %7462 = vst [vmem:[#allocation49_spill] sm:$0xff] %v5216_v24  ;;  %7463 = vst [vmem:[#allocation50_spill] sm:$0xff] %v5221_v32 }
  0xba   : > { %7464 = vst [vmem:[#allocation51_spill] sm:$0xff] %v5225_v47  ;;  %v5228_v53 = vsel %vm728_vm2, %v1038_v31, %v1040_v2  ;;  %7466 = vst [vmem:[#allocation53_spill] sm:$0xff] %v5232_v21  ;;  %v5240_v49 = vsel %vm728_vm2, %v1040_v2, %v7290_v15  ;;  %v5245_v31 = vsel %vm728_vm2, %v1200_v62, %v1202_v18 }
  0xbb   : > { %7465 = vst [vmem:[#allocation52_spill] sm:$0xff] %v5228_v53  ;;  %7467 = vst [vmem:[#allocation54_spill] sm:$0xff] %v5240_v49  ;;  %v5250_v12 = vsel %vm728_vm2, %v1202_v18, %v7469_v50  ;;  %v5315_v49 = vld [vmem:[#allocation10] ss:$0 sm:$0xff] }
  0xbc   : > { %7468 = vst [vmem:[#allocation55_spill] sm:$0xff] %v5245_v31  ;;  %7470 = vst [vmem:[#allocation56_spill] sm:$0xff] %v5250_v12 }
  0xbd   : > { %7477 = vst [vmem:[#allocation61_spill] sm:$0xff] %v5287_v9 }
 0x115   : > { %v5183_v56 = vpop.permute.xlu1 %854  ;;  %v847_v8 = vpop.permute.xlu0 %846 }
 0x116   : > { %v5191_v59 = vrot.slane %v847_v8, 7  ;;  %v7474_v15 = vrot.slane %v5183_v56, 7 }
 0x118   : > { %7458 = vst [vmem:[#allocation45_spill] sm:$0xff] %v5191_v59  ;;  %v901_v22 = vmul.f32 %v5191_v59, %v5048_v29  ;;  %v1064_v51 = vmul.f32 %v5191_v59, %v5046_v28  ;;  %v1226_v50 = vmul.f32 %v5191_v59, %v5050_v30 }
 0x119   : > { %v851_v40 = vpop.permute.xlu0 %850  ;;  %v699_v8 = vpop.permute.xlu1 %698 }
 0x11a   : > { %v878_v19 = vrot.slane %v851_v40, 7  ;;  %v7471_v40 = vrot.slane %v5178_v41, 1  ;;  %v5268_v42 = vmul.f32 %v5218_v55, %v901_v22  ;;  %v5272_v18 = vrot.slane %v699_v8, 1 }
 0x11b   : > { %v5285_v8 = vmul.f32 %v5242_v11, %v1064_v51 }
 0x11c   : > { %v5255_v52 = vsel %vm728_vm2, %v822_v54, %v7471_v40  ;;  %v5260_v2 = vsel %vm876_vm3, %v5191_v59, %v878_v19  ;;  %v5265_v62 = vsel %vm876_vm3, %v878_v19, %v7474_v15  ;;  %7476 = vst [vmem:[#allocation60_spill] sm:$0xff] %v5272_v18  ;;  %v5280_v19 = vld [vmem:[#allocation10 + $0x8] ss:$0 sm:$0xff] }
 0x11d   : > { %7472 = vst [vmem:[#allocation57_spill] sm:$0xff] %v5255_v52  ;;  %7473 = vst [vmem:[#allocation58_spill] sm:$0xff] %v5260_v2  ;;  %v703_v54 = vpop.permute.xlu0 %702  ;;  %v707_v40 = vpop.permute.xlu1 %706  ;;  %v902_v44 = vmul.f32 %v5260_v2, %v5046_v28  ;;  %v903_v17 = vmul.f32 %v5265_v62, %v5050_v30  ;;  %v1065_v15 = vmul.f32 %v5260_v2, %v5050_v30 }
 0x11e   : > { %7475 = vst [vmem:[#allocation59_spill] sm:$0xff] %v5265_v62  ;;  %v730_v22 = vrot.slane %v703_v54, 1  ;;  %v732_v16 = vrot.slane %v707_v40, 1  ;;  %v1066_v59 = vmul.f32 %v5265_v62, %v5060_v34  ;;  %v1227_v41 = vmul.f32 %v5260_v2, %v5060_v34 }
 0x11f   : > { %v919_v1 = vmul.f32 %v5218_v55, %v902_v44  ;;  %v5291_v13 = vmul.f32 %v5218_v55, %v903_v17  ;;  %v5297_v54 = vmul.f32 %v5068_v38, %v5287_v9  ;;  %v5308_v44 = vmul.f32 %v5280_v19, %v1226_v50 }
 0x120   : > { %v5301_v40 = vsel %vm728_vm2, %v5272_v18, %v730_v22  ;;  %v5304_v51 = vsel %vm728_vm2, %v730_v22, %v732_v16  ;;  %v1082_v52 = vmul.f32 %v5242_v11, %v1065_v15  ;;  %v5321_v50 = vmul.f32 %v5242_v11, %v1066_v59 }
 0x121   : > { %7478 = vst [vmem:[#allocation62_spill] sm:$0xff] %v5297_v54  ;;  %7479 = vst [vmem:[#allocation63_spill] sm:$0xff] %v5301_v40  ;;  %v754_v17 = vmul.f32 %v5301_v40, %v5048_v29  ;;  %v859_v2 = vpop.permute.xlu0 %858  ;;  %v863_v12 = vpop.permute.xlu1 %862  ;;  %v755_v38 = vmul.f32 %v5304_v51, %v5046_v28  ;;  %v938_v9 = vrot.slane %v919_v1, 2  ;;  %v973_v21 = vmul.f32 %v5301_v40, %v5046_v28 }
 0x122   : > { %7480 = vst [vmem:[#allocation64_spill] sm:$0xff] %v5304_v51  ;;  %v1228_v1 = vmul.f32 %v5265_v62, %v5062_v35  ;;  %v1244_v15 = vmul.f32 %v5280_v19, %v1227_v41  ;;  %v882_v14 = vrot.slane %v859_v2, 7  ;;  %v884_v31 = vrot.slane %v863_v12, 7  ;;  %v5339_v41 = vld [vmem:[#allocation10 + $0x3] ss:$0 sm:$0xff] }
 0x123   : > { %v770_v47 = vmul.f32 %v5315_v49, %v754_v17  ;;  %v771_v37 = vmul.f32 %v5315_v49, %v755_v38  ;;  %v7481_v22 = vrot.slane %v5268_v42, 2  ;;  %v974_v59 = vmul.f32 %v5304_v51, %v5050_v30 }
 0x124   : > { %v7482_v26 = vrot.slane %v5291_v13, 2  ;;  %v1100_v12 = vrot.slane %v1082_v52, 2  ;;  %v7316_v32 = vrot.slane %v5321_v50, 2 }
 0x125   : > { %v939_v36 = vsel %vm936_vm4, %v7481_v22, %v938_v9  ;;  %v711_v24 = vpop.permute.xlu0 %710  ;;  %v715_v54 = vpop.permute.xlu1 %714  ;;  %v836_v17 = vadd.f32 %v5103_v58, %v770_v47  ;;  %v837_v38 = vadd.f32 %v5113_v63, %v771_v37  ;;  %v990_v22 = vmul.f32 %v5339_v41, %v973_v21 }
 0x126   : > { %v941_v62 = vsel %vm936_vm4, %v938_v9, %v7482_v26  ;;  %v734_v2 = vrot.slane %v711_v24, 1  ;;  %v736_v53 = vrot.slane %v715_v54, 1  ;;  %v991_v20 = vmul.f32 %v5339_v41, %v974_v59 }
 0x127   : > { %v964_v39 = vadd.f32 %v939_v36, %v836_v17  ;;  %v965_v23 = vadd.f32 %v941_v62, %v837_v38  ;;  %v1135_v47 = vmul.f32 %v5301_v40, %v5050_v30  ;;  %v7483_v58 = vrot.slane %v5183_v56, 7 }
 0x128   : > { %v5352_v37 = vsel %vm876_vm3, %v882_v14, %v884_v31  ;;  %v7486_v9 = vrot.slane %v5285_v8, 2  ;;  %v1136_v36 = vmul.f32 %v5304_v51, %v5060_v34  ;;  %v5360_v24 = vsel %vm728_vm2, %v732_v16, %v734_v2 }
 0x129   : > { %v5349_v63 = vsel %vm876_vm3, %v7483_v58, %v882_v14  ;;  %7485 = vst [vmem:[#allocation66_spill] sm:$0xff] %v5352_v37  ;;  %7487 = vst [vmem:[#allocation67_spill] sm:$0xff] %v5360_v24  ;;  %v867_v21 = vpop.permute.xlu0 %866  ;;  %v5362_v52 = vpop.permute.xlu1 %870  ;;  %v999_v56 = vadd.f32 %v990_v22, %v964_v39  ;;  %v1000_v62 = vadd.f32 %v991_v20, %v965_v23  ;;  %v684_v14 = vld [vmem:[#allocation2] sm:$0xff]  ;;  %v5374_v58 = vld [vmem:[#allocation10 + $0x6] ss:$0 sm:$0xff]  ;;  %v1262_v20 = vrot.slane %v1244_v15, 2 }
 0x12a   : > { %7484 = vst [vmem:[#allocation65_spill] sm:$0xff] %v5349_v63  ;;  %v1101_v26 = vsel %vm936_vm4, %v7486_v9, %v1100_v12  ;;  %v5365_v54 = vmul.f32 %v5280_v19, %v1228_v1  ;;  %v5368_v59 = vsel %vm728_vm2, %v734_v2, %v736_v53  ;;  %v886_v17 = vrot.slane %v867_v21, 7 }
 0x12b   : > { %7488 = vst [vmem:[#allocation68_spill] sm:$0xff] %v5368_v59  ;;  %v1103_v16 = vsel %vm936_vm4, %v1100_v12, %v7316_v32  ;;  %v1056_v9 = vadd.f32 %v5118_v0, %v999_v56  ;;  %v1057_v23 = vadd.f32 %v5126_v3, %v1000_v62  ;;  %v1152_v39 = vmul.f32 %v5374_v58, %v1135_v47 }
 0x12c   : > { %v1153_v1 = vmul.f32 %v5374_v58, %v1136_v36  ;;  %v1261_v2 = vrot.slane %v5308_v44, 2  ;;  %v753_v21 = vmul.f32 %v5272_v18, %v684_v14  ;;  %v5384_v38 = vsel %vm876_vm3, %v884_v31, %v886_v17 }
 0x12d   : > { %7489 = vst [vmem:[#allocation69_spill] sm:$0xff] %v5384_v38  ;;  %v719_v12 = vpop.permute.xlu0 %718  ;;  %v5386_v32 = vpop.permute.xlu1 %722  ;;  %v1126_v0 = vadd.f32 %v1101_v26, %v1056_v9  ;;  %v1127_v56 = vadd.f32 %v1103_v16, %v1057_v23  ;;  %v972_v3 = vmul.f32 %v5272_v18, %v5048_v29  ;;  %v7490_v15 = vrot.slane %v5362_v52, 7 }
 0x12e   : > { %v738_v36 = vrot.slane %v719_v12, 1  ;;  %v740_v62 = vrot.slane %v5386_v32, 1  ;;  %v769_v14 = vmul.f32 %v5315_v49, %v753_v21  ;;  %v1263_v26 = vsel %vm936_vm4, %v1261_v2, %v1262_v20 }
 0x12f   : > { %v5393_v47 = vsel %vm876_vm3, %v886_v17, %v7490_v15  ;;  %v1161_v31 = vadd.f32 %v1152_v39, %v1126_v0  ;;  %v1162_v22 = vadd.f32 %v1153_v1, %v1127_v56  ;;  %v756_v16 = vmul.f32 %v5360_v24, %v5050_v30 }
 0x130   : > { %7491 = vst [vmem:[#allocation70_spill] sm:$0xff] %v5393_v47  ;;  %v7492_v29 = vrot.slane %v5365_v54, 2  ;;  %v7493_v17 = vrot.slane %v5058_v33, 1  ;;  %v1134_v12 = vmul.f32 %v5272_v18, %v5046_v28  ;;  %v904_v39 = vmul.f32 %v5349_v63, %v5060_v34 }
 0x131   : > { %v1218_v1 = vadd.f32 %v5131_v4, %v1161_v31  ;;  %v1219_v21 = vadd.f32 %v5134_v5, %v1162_v22  ;;  %v989_v0 = vmul.f32 %v5339_v41, %v972_v3  ;;  %v772_v30 = vmul.f32 %v5315_v49, %v756_v16 }
 0x132   : > { %v1265_v9 = vsel %vm936_vm4, %v1262_v20, %v7492_v29  ;;  %v835_v23 = vadd.f32 %v7493_v17, %v769_v14  ;;  %v5416_v56 = vsel %vm728_vm2, %v736_v53, %v738_v36  ;;  %v5421_v33 = vsel %vm728_vm2, %v738_v36, %v740_v62 }
 0x133   : > { %7494 = vst [vmem:[#allocation71_spill] sm:$0xff] %v5421_v33  ;;  %v7495_v28 = vrot.slane %v5268_v42, 2  ;;  %v921_v15 = vmul.f32 %v5218_v55, %v904_v39  ;;  %v1288_v4 = vadd.f32 %v1263_v26, %v1218_v1  ;;  %v1289_v14 = vadd.f32 %v1265_v9, %v1219_v21 }
 0x134   : > { %v838_v5 = vadd.f32 %v5181_v45, %v772_v30  ;;  %v975_v22 = vmul.f32 %v5360_v24, %v5060_v34  ;;  %v1151_v53 = vmul.f32 %v5374_v58, %v1134_v12  ;;  %v1067_v36 = vmul.f32 %v5349_v63, %v5062_v35 }
 0x135   : > { %v963_v20 = vadd.f32 %v7495_v28, %v835_v23  ;;  %v942_v31 = vrot.slane %v921_v15, 2  ;;  %v1314_v16 = vadd.f32 %v5137_v6, %v1288_v4  ;;  %v1315_v42 = vadd.f32 %v5137_v6, %v1289_v14 }
 0x136   : > { %v1137_v26 = vmul.f32 %v5360_v24, %v5062_v35  ;;  %v1229_v45 = vmul.f32 %v5349_v63, %v5106_v60  ;;  %v7496_v29 = vrot.slane %v5082_v43, 1  ;;  %v7497_v17 = vrot.slane %v5291_v13, 2 }
 0x137   : > { %v998_v3 = vadd.f32 %v989_v0, %v963_v20  ;;  %v992_v12 = vmul.f32 %v5339_v41, %v975_v22  ;;  %v1084_v39 = vmul.f32 %v5242_v11, %v1067_v36  ;;  %v5446_v1 = vmul.f32 %v5158_v27, %v1314_v16 }
 0x138   : > { %v943_v23 = vsel %vm936_vm4, %v7497_v17, %v942_v31  ;;  %v5449_v21 = vmul.f32 %v5158_v27, %v1315_v42  ;;  %v5452_v30 = vmul.f32 %v5280_v19, %v1229_v45  ;;  %v7498_v43 = vrot.slane %v5285_v8, 2 }
 0x139   : > { %v1055_v9 = vadd.f32 %v7496_v29, %v998_v3  ;;  %v966_v0 = vadd.f32 %v943_v23, %v838_v5  ;;  %v1104_v13 = vrot.slane %v1084_v39, 2  ;;  %v757_v20 = vmul.f32 %v5368_v59, %v5060_v34 }
 0x13a   : > { %v905_v15 = vmul.f32 %v5352_v37, %v5062_v35  ;;  %v1345_v4 = vrot.slane %v5446_v1, 7  ;;  %v1347_v14 = vrot.slane %v5449_v21, 7  ;;  %v1266_v5 = vrot.slane %v5452_v30, 2 }
 0x13b   : > { %v1125_v28 = vadd.f32 %v7498_v43, %v1055_v9  ;;  %v1001_v22 = vadd.f32 %v992_v12, %v966_v0  ;;  %v1154_v36 = vmul.f32 %v5374_v58, %v1137_v26  ;;  %v773_v8 = vmul.f32 %v5315_v49, %v757_v20 }
 0x13c   : > { %v922_v16 = vmul.f32 %v5218_v55, %v905_v15  ;;  %v1348_v34 = vsel %vm876_vm3, %v1345_v4, %v1347_v14  ;;  %v7499_v45 = vrot.slane %v5321_v50, 2  ;;  %v976_v9 = vmul.f32 %v5368_v59, %v5062_v35 }
 0x13d   : > { %v1160_v3 = vadd.f32 %v1151_v53, %v1125_v28  ;;  %v1058_v42 = vadd.f32 %v5186_v57, %v1001_v22  ;;  %v5476_v53 = vadd.f32 %v1348_v34, %v5155_v25  ;;  %v7501_v26 = vrot.slane %v5088_v46, 1 }
 0x13e   : > { %v1105_v29 = vsel %vm936_vm4, %v7499_v45, %v1104_v13  ;;  %v839_v23 = vadd.f32 %v5189_v61, %v773_v8  ;;  %v944_v12 = vrot.slane %v922_v16, 2  ;;  %v7502_v57 = vrot.slane %v5365_v54, 2 }
 0x13f   : > { %7500 = vst [vmem:[#allocation72_spill] sm:$0xff] %v5476_v53  ;;  %v1217_v17 = vadd.f32 %v7501_v26, %v1160_v3  ;;  %v1128_v39 = vadd.f32 %v1105_v29, %v1058_v42  ;;  %v1068_v1 = vmul.f32 %v5352_v37, %v5106_v60  ;;  %v1138_v25 = vmul.f32 %v5368_v59, %v5106_v60 }
 0x140   : > { %v1267_v50 = vsel %vm936_vm4, %v7502_v57, %v1266_v5  ;;  %v1380_v46 = vsel %vm623_vm0, %v5476_v53, 0.0  ;;  %v945_v0 = vsel %vm936_vm4, %v942_v31, %v944_v12  ;;  %v1230_v43 = vmul.f32 %v5352_v37, %v5139_v7 }
 0x141   : > { %v1287_v61 = vadd.f32 %v1261_v2, %v1217_v17  ;;  %1381 = vadd.xlane.f32.xlu1 %v1380_v46  ;;  %v1163_v54 = vadd.f32 %v1154_v36, %v1128_v39  ;;  %v967_v28 = vadd.f32 %v945_v0, %v839_v23  ;;  %v993_v20 = vmul.f32 %v5339_v41, %v976_v9  ;;  %v7503_v23 = vld [vmem:[#allocation48_spill] sm:$0xff]  ;;  %v875_v46 = vpop.permute.xlu0 %874 }
 0x142   : > { %v1085_v15 = vmul.f32 %v5242_v11, %v1068_v1  ;;  %v5501_v3 = vmul.f32 %v5280_v19, %v1230_v43  ;;  %v758_v44 = vmul.f32 %v5416_v56, %v5062_v35  ;;  %v906_v2 = vmul.f32 %v5384_v38, %v5106_v60 }
 0x143   : > { %v1313_v22 = vadd.f32 %v5137_v6, %v1287_v61  ;;  %v1220_v31 = vadd.f32 %v5210_v10, %v1163_v54  ;;  %v1002_v8 = vadd.f32 %v993_v20, %v967_v28  ;;  %v977_v16 = vmul.f32 %v5416_v56, %v5106_v60  ;;  %v727_v61 = vpop.permute.xlu1 %726  ;;  %v7504_v54 = vld [vmem:[#allocation39_spill] sm:$0xff] }
 0x144   : > { %v1106_v36 = vrot.slane %v1085_v15, 2  ;;  %v1155_v42 = vmul.f32 %v5374_v58, %v1138_v25  ;;  %v774_v45 = vmul.f32 %v5315_v49, %v758_v44  ;;  %v923_v29 = vmul.f32 %v5218_v55, %v906_v2  ;;  %v7505_v15 = vld [vmem:[#allocation42_spill] sm:$0xff] }
 0x145   : > { %v1326_v34 = vmul.f32 %v5158_v27, %v1313_v22  ;;  %v1290_v9 = vadd.f32 %v1267_v50, %v1220_v31  ;;  %v1059_v35 = vadd.f32 %v5198_v48, %v1002_v8  ;;  %v1268_v10 = vrot.slane %v5501_v3, 2 }
 0x146   : > { %v1107_v26 = vsel %vm936_vm4, %v1104_v13, %v1106_v36  ;;  %v840_v39 = vadd.f32 %v7503_v23, %v774_v45  ;;  %v946_v57 = vrot.slane %v923_v29, 2  ;;  %v994_v1 = vmul.f32 %v5339_v41, %v977_v16 }
 0x147   : > { %v1344_v17 = vrot.slane %v1326_v34, 7  ;;  %v1316_v25 = vadd.f32 %v5137_v6, %v1290_v9  ;;  %v1129_v0 = vadd.f32 %v1107_v26, %v1059_v35  ;;  %v1069_v50 = vmul.f32 %v5384_v38, %v5139_v7 }
 0x148   : > { %v1139_v48 = vmul.f32 %v5416_v56, %v5139_v7  ;;  %v947_v43 = vsel %vm936_vm4, %v944_v12, %v946_v57  ;;  %v1231_v28 = vmul.f32 %v5384_v38, %v7504_v54  ;;  %v759_v20 = vmul.f32 %v5421_v33, %v5106_v60  ;;  %v7509_v60 = vld [vmem:[#allocation50_spill] sm:$0xff] }
 0x149   : > { %v1346_v13 = vsel %vm876_vm3, %v1344_v17, %v1345_v4  ;;  %v1329_v3 = vmul.f32 %v5158_v27, %v1316_v25  ;;  %v1164_v44 = vadd.f32 %v1155_v42, %v1129_v0  ;;  %v968_v2 = vadd.f32 %v947_v43, %v840_v39  ;;  %v7510_v39 = vld [vmem:[#allocation52_spill] sm:$0xff] }
 0x14a   : > { %v5531_v22 = vadd.f32 %v1346_v13, %v7505_v15  ;;  %v5534_v31 = vrot.slane %v875_v46, 7  ;;  %v5536_v8 = vrot.slane %v727_v61, 1  ;;  %v1086_v4 = vmul.f32 %v5242_v11, %v1069_v50  ;;  %v7511_v61 = vld [vmem:[#allocation46_spill] sm:$0xff]  ;;  %v7513_v13 = vld [vmem:[#allocation49_spill] sm:$0xff] }
 0x14b   : > { %v775_v12 = vmul.f32 %v5315_v49, %v759_v20  ;;  %v1349_v34 = vrot.slane %v1329_v3, 7  ;;  %v1221_v45 = vadd.f32 %v7509_v60, %v1164_v44  ;;  %v1003_v29 = vadd.f32 %v994_v1, %v968_v2 }
 0x14c   : > { %7506 = vst [vmem:[#allocation48_spill] sm:$0xff] %v5531_v22  ;;  %7507 = vst [vmem:[#allocation39_spill] sm:$0xff] %v5534_v31  ;;  %v1377_v16 = vsel %vm623_vm0, %v5531_v22, 0.0  ;;  %v1269_v42 = vsel %vm936_vm4, %v1266_v5, %v1268_v10  ;;  %v1108_v9 = vrot.slane %v1086_v4, 2  ;;  %v5547_v35 = vmul.f32 %v5280_v19, %v1231_v28 }
 0x14d   : > { %7508 = vst [vmem:[#allocation42_spill] sm:$0xff] %v5536_v8  ;;  %1378 = vadd.xlane.f32.xlu0 %v1377_v16  ;;  %v907_v26 = vmul.f32 %v5393_v47, %v5139_v7  ;;  %v1350_v17 = vsel %vm876_vm3, %v1347_v14, %v1349_v34  ;;  %v1291_v23 = vadd.f32 %v1269_v42, %v1221_v45  ;;  %v7516_v42 = vld [vmem:[#allocation55_spill] sm:$0xff] }
 0x14e   : > { %v1060_v46 = vadd.f32 %v7510_v39, %v1003_v29  ;;  %v1156_v1 = vmul.f32 %v5374_v58, %v1139_v48  ;;  %v5557_v30 = vadd.f32 %v1350_v17, %v7511_v61  ;;  %v1109_v5 = vsel %vm936_vm4, %v1106_v36, %v1108_v9  ;;  %v7514_v36 = vld [vmem:[#allocation40_spill] sm:$0xff]  ;;  %v7519_v39 = vld [vmem:[#allocation47_spill] sm:$0xff] }
 0x14f   : > { %v924_v25 = vmul.f32 %v5218_v55, %v907_v26  ;;  %v978_v0 = vmul.f32 %v5421_v33, %v5139_v7  ;;  %v1317_v50 = vadd.f32 %v5137_v6, %v1291_v23  ;;  %v841_v14 = vadd.f32 %v7513_v13, %v775_v12 }
 0x150   : > { %7512 = vst [vmem:[#allocation50_spill] sm:$0xff] %v5557_v30  ;;  %v1130_v21 = vadd.f32 %v1109_v5, %v1060_v46  ;;  %v1070_v43 = vmul.f32 %v5393_v47, %v7504_v54  ;;  %v1383_v48 = vsel %vm623_vm0, %v5557_v30, 0.0  ;;  %v1270_v28 = vrot.slane %v5547_v35, 2 }
 0x151   : > { %v948_v20 = vrot.slane %v924_v25, 2  ;;  %v1232_v15 = vmul.f32 %v5393_v47, %v7514_v36  ;;  %1384 = vadd.xlane.f32.xlu0 %v1383_v48  ;;  %v1330_v3 = vmul.f32 %v5158_v27, %v1317_v50  ;;  %v5580_v4 = vsel %vm728_vm2, %v740_v62, %v5536_v8  ;;  %v7523_v50 = vld [vmem:[#allocation51_spill] sm:$0xff] }
 0x152   : > { %v1165_v44 = vadd.f32 %v1156_v1, %v1130_v21  ;;  %v5574_v2 = vmul.f32 %v5242_v11, %v1070_v43  ;;  %7515 = vst [vmem:[#allocation52_spill] sm:$0xff] %v5580_v4  ;;  %v995_v16 = vmul.f32 %v5339_v41, %v978_v0  ;;  %v1140_v60 = vmul.f32 %v5421_v33, %v7504_v54 }
 0x153   : > { %v949_v12 = vsel %vm936_vm4, %v946_v57, %v948_v20  ;;  %v760_v45 = vmul.f32 %v5580_v4, %v5139_v7  ;;  %v1351_v29 = vrot.slane %v1330_v3, 7  ;;  %v5590_v17 = vmul.f32 %v5280_v19, %v1232_v15  ;;  %v7521_v7 = vld [vmem:[#allocation41_spill] sm:$0xff]  ;;  %v7526_v15 = vld [vmem:[#allocation54_spill] sm:$0xff] }
 0x154   : > { %v1222_v35 = vadd.f32 %v7516_v42, %v1165_v44  ;;  %v969_v26 = vadd.f32 %v949_v12, %v841_v14  ;;  %v1271_v32 = vsel %vm936_vm4, %v1268_v10, %v1270_v28  ;;  %v1110_v62 = vrot.slane %v5574_v2, 2  ;;  %v7525_v14 = vld [vmem:[#allocation62_spill] sm:$0xff] }
 0x155   : > { %v7517_v57 = vrot.slane %v5362_v52, 7  ;;  %v7520_v46 = vrot.slane %v7519_v39, 1  ;;  %v7522_v1 = vrot.slane %v7521_v7, 1  ;;  %v1352_v5 = vsel %vm876_vm3, %v1349_v34, %v1351_v29  ;;  %v7528_v7 = vld [vmem:[#allocation61_spill] sm:$0xff] }
 0x156   : > { %v1292_v25 = vadd.f32 %v1271_v32, %v1222_v35  ;;  %v1004_v0 = vadd.f32 %v995_v16, %v969_v26  ;;  %v776_v10 = vmul.f32 %v5315_v49, %v760_v45  ;;  %v5608_v21 = vadd.f32 %v1352_v5, %v7523_v50  ;;  %v7527_v35 = vld [vmem:[#allocation57_spill] sm:$0xff] }
 0x157   : > { %v5598_v23 = vsel %vm876_vm3, %v7517_v57, %v5534_v31  ;;  %v1045_v61 = vsel %vm728_vm2, %v7522_v1, %v7520_v46  ;;  %v1157_v52 = vmul.f32 %v5374_v58, %v1140_v60  ;;  %v1206_v43 = vrot.slane %v7525_v14, 1 }
 0x158   : > { %7518 = vst [vmem:[#allocation46_spill] sm:$0xff] %v5598_v23  ;;  %7524 = vst [vmem:[#allocation49_spill] sm:$0xff] %v5608_v21  ;;  %v908_v13 = vmul.f32 %v5598_v23, %v7504_v54  ;;  %v1318_v48 = vadd.f32 %v5137_v6, %v1292_v25  ;;  %v1061_v3 = vadd.f32 %v7526_v15, %v1004_v0  ;;  %v1272_v34 = vrot.slane %v5590_v17, 2  ;;  %v7540_v17 = vld [vmem:[#allocation33_spill] sm:$0xff] }
 0x159   : > { %v1071_v44 = vmul.f32 %v5598_v23, %v7514_v36  ;;  %v1386_v2 = vsel %vm623_vm0, %v5608_v21, 0.0  ;;  %v1111_v12 = vsel %vm936_vm4, %v1108_v9, %v1110_v62  ;;  %v979_v60 = vmul.f32 %v5580_v4, %v7504_v54 }
 0x15a   : > { %v925_v16 = vmul.f32 %v5218_v55, %v908_v13  ;;  %1387 = vadd.xlane.f32.xlu0 %v1386_v2  ;;  %v1331_v45 = vmul.f32 %v5158_v27, %v1318_v48  ;;  %v1131_v42 = vadd.f32 %v1111_v12, %v1061_v3  ;;  %v842_v26 = vadd.f32 %v7527_v35, %v776_v10  ;;  %v7529_v3 = vld [vmem:[#allocation56_spill] sm:$0xff]  ;;  %v7530_v12 = vld [vmem:[#allocation53_spill] sm:$0xff] }
 0x15b   : > { %v761_v32 = vmul.f32 %v5536_v8, %v7504_v54  ;;  %v1088_v46 = vmul.f32 %v5242_v11, %v1071_v44  ;;  %v1233_v9 = vmul.f32 %v5598_v23, %v7528_v7  ;;  %v909_v1 = vmul.f32 %v5534_v31, %v7514_v36 }
 0x15c   : > { %v950_v57 = vrot.slane %v925_v16, 2  ;;  %v1353_v5 = vrot.slane %v1331_v45, 7  ;;  %v1166_v25 = vadd.f32 %v1157_v52, %v1131_v42  ;;  %v1273_v0 = vsel %vm936_vm4, %v1270_v28, %v1272_v34  ;;  %v695_v28 = vld [vmem:[#allocation2 + $0x58] sm:$0xff]  ;;  %v7532_v42 = vld [vmem:[#allocation44_spill] sm:$0xff] }
 0x15d   : > { %v777_v10 = vmul.f32 %v5315_v49, %v761_v32  ;;  %v996_v54 = vmul.f32 %v5339_v41, %v979_v60  ;;  %v926_v13 = vmul.f32 %v5218_v55, %v909_v1  ;;  %v980_v48 = vmul.f32 %v5536_v8, %v7514_v36 }
 0x15e   : > { %v951_v50 = vsel %vm936_vm4, %v948_v20, %v950_v57  ;;  %v1354_v15 = vsel %vm876_vm3, %v1351_v29, %v1353_v5  ;;  %v1223_v44 = vadd.f32 %v7529_v3, %v1166_v25  ;;  %v1141_v2 = vmul.f32 %v5580_v4, %v7514_v36  ;;  %v7534_v3 = vld [vmem:[#allocation32_spill] sm:$0xff] }
 0x15f   : > { %v970_v52 = vadd.f32 %v951_v50, %v842_v26  ;;  %v5648_v49 = vadd.f32 %v1354_v15, %v7530_v12  ;;  %v1112_v20 = vrot.slane %v1088_v46, 2  ;;  %v1250_v16 = vmul.f32 %v5280_v19, %v1233_v9 }
 0x160   : > { %v952_v60 = vrot.slane %v926_v13, 2  ;;  %v1293_v55 = vadd.f32 %v1273_v0, %v1223_v44  ;;  %v7533_v35 = vrot.slane %v7532_v42, 1  ;;  %v1072_v29 = vmul.f32 %v5534_v31, %v7528_v7  ;;  %v7535_v44 = vld [vmem:[#allocation38_spill] sm:$0xff] }
 0x161   : > { %7531 = vst [vmem:[#allocation40_spill] sm:$0xff] %v5648_v49  ;;  %v1005_v45 = vadd.f32 %v996_v54, %v970_v52  ;;  %v1389_v26 = vsel %vm623_vm0, %v5648_v49, 0.0  ;;  %v997_v1 = vmul.f32 %v5339_v41, %v980_v48  ;;  %v1234_v46 = vmul.f32 %v5534_v31, %v695_v28 }
 0x162   : > { %v843_v32 = vadd.f32 %v7533_v35, %v777_v10  ;;  %v953_v36 = vsel %vm936_vm4, %v950_v57, %v952_v60  ;;  %1390 = vadd.xlane.f32.xlu1 %v1389_v26  ;;  %v1319_v9 = vadd.f32 %v5137_v6, %v1293_v55  ;;  %v1089_v50 = vmul.f32 %v5242_v11, %v1072_v29 }
 0x163   : > { %v1062_v25 = vadd.f32 %v1045_v61, %v1005_v45  ;;  %v1113_v10 = vsel %vm936_vm4, %v1110_v62, %v1112_v20  ;;  %v1158_v54 = vmul.f32 %v5374_v58, %v1141_v2  ;;  %v1142_v13 = vmul.f32 %v5536_v8, %v7528_v7  ;;  %v7536_v61 = vld [vmem:[#allocation43_spill] sm:$0xff] }
 0x164   : > { %v971_v0 = vadd.f32 %v953_v36, %v843_v32  ;;  %v1332_v57 = vmul.f32 %v5158_v27, %v1319_v9  ;;  %v1114_v48 = vrot.slane %v1089_v50, 2  ;;  %v1306_v52 = vmul.f32 %v7535_v44, %v7534_v3 }
 0x165   : > { %v1132_v15 = vadd.f32 %v1113_v10, %v1062_v25  ;;  %v7537_v28 = vrot.slane %v7536_v61, 1  ;;  %v1274_v62 = vrot.slane %v1250_v16, 2  ;;  %v1251_v2 = vmul.f32 %v5280_v19, %v1234_v46 }
 0x166   : > { %v1006_v41 = vadd.f32 %v997_v1, %v971_v0  ;;  %v1355_v12 = vrot.slane %v1332_v57, 7  ;;  %v7538_v7 = vrot.slane %v7519_v39, 1  ;;  %v1115_v45 = vsel %vm936_vm4, %v1112_v20, %v1114_v48 }
 0x167   : > { %v1207_v11 = vsel %vm728_vm2, %v7537_v28, %v1206_v43  ;;  %v1167_v60 = vadd.f32 %v1158_v54, %v1132_v15  ;;  %v1159_v29 = vmul.f32 %v5374_v58, %v1142_v13  ;;  %v1275_v16 = vsel %vm936_vm4, %v1272_v34, %v1274_v62  ;;  %v7542_v13 = vld [vmem:[#allocation34_spill] sm:$0xff] }
 0x168   : > { %v1063_v55 = vadd.f32 %v7538_v7, %v1006_v41  ;;  %v1356_v42 = vsel %vm876_vm3, %v1353_v5, %v1355_v12  ;;  %v1276_v19 = vrot.slane %v1251_v2, 2  ;;  %v1307_v34 = vmul.f32 %v7535_v44, %v7540_v17 }
 0x169   : > { %v1224_v35 = vadd.f32 %v1207_v11, %v1167_v60  ;;  %v5680_v26 = vadd.f32 %v1356_v42, %v1306_v52  ;;  %v1308_v14 = vmul.f32 %v7535_v44, %v7542_v13 }
 0x16a   : > { %v1133_v32 = vadd.f32 %v1115_v45, %v1063_v55  ;;  %v1277_v58 = vsel %vm936_vm4, %v1274_v62, %v1276_v19 }
 0x16b   : > { %7539 = vst [vmem:[#allocation55_spill] sm:$0xff] %v5680_v26  ;;  %v1294_v36 = vadd.f32 %v1275_v16, %v1224_v35  ;;  %v1392_v39 = vsel %vm623_vm0, %v5680_v26, 0.0 }
 0x16c   : > { %v1168_v1 = vadd.f32 %v1159_v29, %v1133_v32  ;;  %1393 = vadd.xlane.f32.xlu0 %v1392_v39 }
 0x16d   : > { %v1320_v20 = vadd.f32 %v5137_v6, %v1294_v36 }
 0x16e   : > { %v1225_v5 = vadd.f32 %v1206_v43, %v1168_v1 }
 0x16f   : > { %v1333_v46 = vmul.f32 %v5158_v27, %v1320_v20 }
 0x170   : > { %v1295_v9 = vadd.f32 %v1277_v58, %v1225_v5 }
 0x171   : > { %v1357_v25 = vrot.slane %v1333_v46, 7 }
 0x172   : > { %v1321_v0 = vadd.f32 %v5137_v6, %v1295_v9 }
 0x173   : > { %v1358_v50 = vsel %vm876_vm3, %v1355_v12, %v1357_v25 }
 0x174   : > { %v1334_v10 = vmul.f32 %v5158_v27, %v1321_v0  ;;  %v5697_v54 = vadd.f32 %v1358_v50, %v1307_v34 }
 0x176   : > { %7541 = vst [vmem:[#allocation47_spill] sm:$0xff] %v5697_v54  ;;  %v1359_v43 = vrot.slane %v1334_v10, 7  ;;  %v1395_v57 = vsel %vm623_vm0, %v5697_v54, 0.0 }
 0x177   : > { %1396 = vadd.xlane.f32.xlu1 %v1395_v57 }
 0x178   : > { %v1360_v15 = vsel %vm876_vm3, %v1357_v25, %v1359_v43 }
 0x179   : > { %v5704_v41 = vadd.f32 %v1360_v15, %v1308_v14 }
 0x17b   : > { %7543 = vst [vmem:[#allocation41_spill] sm:$0xff] %v5704_v41  ;;  %v1398_v6 = vsel %vm623_vm0, %v5704_v41, 0.0 }
 0x17c   : > { %1399 = vadd.xlane.f32.xlu0 %v1398_v6  ;;  %v4276_v6 = vld [vmem:[#allocation13 + $0x8] sm:$0xff]  }
 0x17d   : > { %4047 = vmatprep.subr.bf16.mxu0 %v4276_v6 }
 0x17e   : > { %4048 = vmatpush3.bf16.msra.mxu0 %v4276_v6 }
 0x1ca   : > { %v1382_v48 = vpop.xlane.xlu1 %1381 }
 0x1cb   : > { %v1403_v27 = vmul.f32 0.03125, %v1382_v48  ;;  %v4277_v48 = vld [vmem:[#allocation13] sm:$0xff]  }
 0x1cc   : > { %4049 = vmatprep.subr.bf16.mxu0 %v4277_v48 }
 0x1cd   : > { %v5709_v3 = vsub.f32 %v5476_v53, %v1403_v27  ;;  %4050 = vmatpush3.bf16.msra.mxu0 %v4277_v48  ;;  %v3937_v27 = vld [vmem:[%s7264_s12] ss:$0 sm:$0xff] }
 0x1cf   : > { %v1419_v44 = vmul.f32 %v5709_v3, %v5709_v3 }
 0x1d1   : > { %v1429_v52 = vsel %vm623_vm0, %v1419_v44, 0.0 }
 0x1d2   : > { %1430 = vadd.xlane.f32.xlu0 %v1429_v52 }
 0x1d6   : > { %v1379_v61 = vpop.xlane.xlu0 %1378 }
 0x1d7   : > { %v1402_v28 = vmul.f32 0.03125, %v1379_v61 }
 0x1d9   : > { %v5715_v11 = vsub.f32 %v5531_v22, %v1402_v28 }
 0x1da   : > { %v1385_v2 = vpop.xlane.xlu0 %1384 }
 0x1db   : > { %v1418_v62 = vmul.f32 %v5715_v11, %v5715_v11  ;;  %v1404_v12 = vmul.f32 0.03125, %v1385_v2 }
 0x1dd   : > { %v1426_v60 = vsel %vm623_vm0, %v1418_v62, 0.0  ;;  %v5721_v7 = vsub.f32 %v5557_v30, %v1404_v12 }
 0x1de   : > { %1427 = vadd.xlane.f32.xlu1 %v1426_v60 }
 0x1df   : > { %v1420_v55 = vmul.f32 %v5721_v7, %v5721_v7 }
 0x1e1   : > { %v1432_v45 = vsel %vm623_vm0, %v1420_v55, 0.0 }
 0x1e2   : > { %1433 = vadd.xlane.f32.xlu1 %v1432_v45  ;;  %v7544_v45 = vld [vmem:[#allocation35_spill] sm:$0xff] }
 0x1e3   : > { %v1388_v42 = vpop.xlane.xlu0 %1387 }
 0x1e4   : > { %v1405_v35 = vmul.f32 0.03125, %v1388_v42  ;;  %v1484_v42 = vsub.s32 5, %v7544_v45 }
 0x1e6   : > { %v5727_v32 = vsub.f32 %v5608_v21, %v1405_v35 }
 0x1e8   : > { %v1421_v29 = vmul.f32 %v5727_v32, %v5727_v32 }
 0x1ea   : > { %v1435_v16 = vsel %vm623_vm0, %v1421_v29, 0.0 }
 0x1eb   : > { %v1391_v19 = vpop.xlane.xlu1 %1390  ;;  %1436 = vadd.xlane.f32.xlu0 %v1435_v16 }
 0x1ec   : > { %v1406_v36 = vmul.f32 0.03125, %v1391_v19  ;;  %v7545_v19 = vld [vmem:[#allocation36_spill] sm:$0xff] }
 0x1ee   : > { %v5733_v1 = vsub.f32 %v5648_v49, %v1406_v36  ;;  %v1485_v36 = vrot.slane %v7545_v19, %v1484_v42 }
 0x1f0   : > { %v1422_v39 = vmul.f32 %v5733_v1, %v5733_v1 }
 0x1f2   : > { %v1438_v20 = vsel %vm623_vm0, %v1422_v39, 0.0  ;;  %v1496_v39 = vsub.s32 6, %v7544_v45 }
 0x1f3   : > { %1439 = vadd.xlane.f32.xlu1 %v1438_v20 }
 0x1f5   : > { %v1394_v5 = vpop.xlane.xlu0 %1393 }
 0x1f6   : > { %v1407_v58 = vmul.f32 0.03125, %v1394_v5 }
 0x1f8   : > { %v5739_v46 = vsub.f32 %v5680_v26, %v1407_v58 }
 0x1fa   : > { %v1423_v9 = vmul.f32 %v5739_v46, %v5739_v46 }
 0x1fc   : > { %v1441_v17 = vsel %vm623_vm0, %v1423_v9, 0.0  ;;  %v1497_v9 = vrot.slane %v7545_v19, %v1496_v39 }
 0x1fd   : > { %1442 = vadd.xlane.f32.xlu0 %v1441_v17 }
 0x200   : > { %v1397_v34 = vpop.xlane.xlu1 %1396 }
 0x201   : > { %v1408_v25 = vmul.f32 0.03125, %v1397_v34 }
 0x203   : > { %v5745_v0 = vsub.f32 %v5697_v54, %v1408_v25 }
 0x205   : > { %v1400_v50 = vpop.xlane.xlu0 %1399  ;;  %v1424_v13 = vmul.f32 %v5745_v0, %v5745_v0 }
 0x206   : > { %v1409_v10 = vmul.f32 0.03125, %v1400_v50 }
 0x207   : > { %v1444_v43 = vsel %vm623_vm0, %v1424_v13, 0.0 }
 0x208   : > { %v5750_v14 = vsub.f32 %v5704_v41, %v1409_v10  ;;  %1445 = vadd.xlane.f32.xlu1 %v1444_v43 }
 0x20a   : > { %v1425_v57 = vmul.f32 %v5750_v14, %v5750_v14 }
 0x20c   : > { %v1447_v15 = vsel %vm623_vm0, %v1425_v57, 0.0 }
 0x20d   : > { %1448 = vadd.xlane.f32.xlu0 %v1447_v15 }
 0x219   : > { %2114 = vrot.lane.b32.xlu1 %v3937_v27, %s4654_s20 }
 0x25b   : > { %v1431_v44 = vpop.xlane.xlu0 %1430 }
 0x25c   : > { %v1451_v52 = vmul.f32 0.03125, %v1431_v44 }
 0x25e   : > { %v1459_v61 = vadd.f32 1e-06, %v1451_v52 }
 0x260   : > { %4294 = vrsqrt.f32 %v1459_v61 }
 0x267   : > { %v1428_v28 = vpop.xlane.xlu1 %1427 }
 0x268   : > { %v1450_v62 = vmul.f32 0.03125, %v1428_v28 }
 0x26a   : > { %v1458_v2 = vadd.f32 1e-06, %v1450_v62 }
 0x26b   : > { %v1434_v12 = vpop.xlane.xlu1 %1433 }
 0x26c   : > { %4296 = vrsqrt.f32 %v1458_v2  ;;  %v1452_v60 = vmul.f32 0.03125, %v1434_v12 }
 0x26d   : > { %v4295_v35 = vpop.eup %4294 }
 0x26e   : > { %v1460_v55 = vadd.f32 1e-06, %v1452_v60  ;;  %v1475_v16 = vmul.f32 %v4295_v35, %v5709_v3 }
 0x270   : > { %4298 = vrsqrt.f32 %v1460_v55  ;;  %v1487_v58 = vmul.f32 %v1485_v36, %v1475_v16 }
 0x272   : > { %v1499_v10 = vadd.f32 %v1497_v9, %v1487_v58 }
 0x274   : > { %v1437_v29 = vpop.xlane.xlu0 %1436 }
 0x275   : > { %v1453_v20 = vmul.f32 0.03125, %v1437_v29 }
 0x277   : > { %v1461_v5 = vadd.f32 1e-06, %v1453_v20 }
 0x279   : > { %v4297_v17 = vpop.eup %4296  ;;  %4300 = vrsqrt.f32 %v1461_v5 }
 0x27a   : > { %v1474_v34 = vmul.f32 %v4297_v17, %v5715_v11 }
 0x27c   : > { %v1440_v25 = vpop.xlane.xlu1 %1439  ;;  %v1486_v50 = vmul.f32 %v1485_v36, %v1474_v34 }
 0x27d   : > { %v1454_v13 = vmul.f32 0.03125, %v1440_v25  ;;  %v4299_v3 = vpop.eup %4298 }
 0x27e   : > { %v1498_v43 = vadd.f32 %v1497_v9, %v1486_v50  ;;  %v1476_v6 = vmul.f32 %v4299_v3, %v5721_v7 }
 0x27f   : > { %v1462_v57 = vadd.f32 1e-06, %v1454_v13 }
 0x280   : > { %v5766_v15 = vpack.c.bf16 %v1499_v10, %v1498_v43  ;;  %v1488_v52 = vmul.f32 %v1485_v36, %v1476_v6 }
 0x281   : > { %4302 = vrsqrt.f32 %v1462_v57 }
 0x282   : > { %7546 = vst [vmem:[#allocation51_spill] sm:$0xff] %v5766_v15  ;;  %4051 = vmatprep.mubr.msk.bf16.mxu0 %vm623_vm0, %v5766_v15  ;;  %v1500_v62 = vadd.f32 %v1497_v9, %v1488_v52 }
 0x286   : > { %v4301_v48 = vpop.eup %4300  ;;  %v1443_v27 = vpop.xlane.xlu0 %1442 }
 0x287   : > { %v1455_v44 = vmul.f32 0.03125, %v1443_v27  ;;  %v1477_v11 = vmul.f32 %v4301_v48, %v5727_v32  ;;  %v1611_v48 = vld [vmem:[#allocation3] sm:$0xff]  ;;  %v1612_v27 = vld [vmem:[#allocation3 + $0x8] sm:$0xff] }
 0x289   : > { %v1463_v61 = vadd.f32 1e-06, %v1455_v44  ;;  %v1489_v28 = vmul.f32 %v1485_v36, %v1477_v11  ;;  %v1621_v44 = vld [vmem:[#allocation3 + $0x50] sm:$0xff]  ;;  %v1622_v11 = vld [vmem:[#allocation3 + $0x58] sm:$0xff] }
 0x28b   : > { %4304 = vrsqrt.f32 %v1463_v61  ;;  %v1501_v2 = vadd.f32 %v1497_v9, %v1489_v28  ;;  %v5797_v61 = vld [vmem:[#allocation11 + $0x2] ss:$0 sm:$0xff]  ;;  %v2045_v28 = vmul.f32 %v1621_v44, %v5598_v23 }
 0x28d   : > { %v5772_v12 = vpack.c.bf16 %v1501_v2, %v1500_v62  ;;  %v2046_v62 = vmul.f32 %v1622_v11, %v5534_v31 }
 0x28e   : > { %v4303_v60 = vpop.eup %4302 }
 0x28f   : > { %7547 = vst [vmem:[#allocation62_spill] sm:$0xff] %v5772_v12  ;;  %4052 = vmatmul.mubr.msk.bf16.vlgmr.msra.gmra.mxu0 %vm623_vm0, %v5772_v12  ;;  %v1478_v35 = vmul.f32 %v4303_v60, %v5733_v1  ;;  %v5801_v60 = vld [vmem:[#allocation11 + $0x8] ss:$0 sm:$0xff] }
 0x291   : > { %v1446_v55 = vpop.xlane.xlu1 %1445  ;;  %v1490_v19 = vmul.f32 %v1485_v36, %v1478_v35 }
 0x292   : > { %v1456_v42 = vmul.f32 0.03125, %v1446_v55 }
 0x293   : > { %v1502_v58 = vadd.f32 %v1497_v9, %v1490_v19 }
 0x294   : > { %v1464_v7 = vadd.f32 1e-06, %v1456_v42 }
 0x296   : > { %v1449_v29 = vpop.xlane.xlu0 %1448  ;;  %4306 = vrsqrt.f32 %v1464_v7 }
 0x297   : > { %v1457_v32 = vmul.f32 0.03125, %v1449_v29  ;;  %v1884_v29 = vmul.f32 %v1621_v44, %v5534_v31 }
 0x298   : > { %v4305_v39 = vpop.eup %4304 }
 0x299   : > { %v1465_v16 = vadd.f32 1e-06, %v1457_v32  ;;  %v1479_v20 = vmul.f32 %v4305_v39, %v5739_v46  ;;  %v5788_v46 = vld [vmem:[#allocation11 + $0x1] ss:$0 sm:$0xff]  ;;  %v5812_v32 = vmul.f32 %v5801_v60, %v2045_v28  ;;  %v5815_v39 = vld [vmem:[#allocation11 + $0x5] ss:$0 sm:$0xff] }
 0x29a   : > { %v5792_v52 = vmul.f32 %v5788_v46, %v1612_v27 }
 0x29b   : > { %4308 = vrsqrt.f32 %v1465_v16  ;;  %v1491_v5 = vmul.f32 %v1485_v36, %v1479_v20  ;;  %7551 = vst [vmem:[#allocation61_spill] sm:$0xff] %v5812_v32  ;;  %v2063_v16 = vmul.f32 %v5801_v60, %v2046_v62 }
 0x29c   : > { %v7319_v42 = vrot.slane %v5792_v52, 1 }
 0x29d   : > { %v1503_v17 = vadd.f32 %v1497_v9, %v1491_v5 }
 0x29f   : > { %v5778_v34 = vpack.c.bf16 %v1503_v17, %v1502_v58  ;;  %v5820_v58 = vld [vmem:[#allocation11 + $0x3] ss:$0 sm:$0xff]  ;;  %v1954_v17 = vmul.f32 %v1621_v44, %v5536_v8 }
 0x2a1   : > { %7548 = vst [vmem:[#allocation54_spill] sm:$0xff] %v5778_v34  ;;  %4055 = vmatprep.mubr.msk.bf16.mxu0 %vm623_vm0, %v5778_v34 }
 0x2a3   : > { %v4307_v25 = vpop.eup %4306 }
 0x2a4   : > { %v1480_v1 = vmul.f32 %v4307_v25, %v5745_v0  ;;  %v1623_v0 = vmul.f32 %v1611_v48, %v5272_v18 }
 0x2a6   : > { %v1492_v50 = vmul.f32 %v1485_v36, %v1480_v1  ;;  %v1784_v1 = vmul.f32 %v1612_v27, %v5272_v18 }
 0x2a8   : > { %v4309_v10 = vpop.eup %4308  ;;  %v1504_v57 = vadd.f32 %v1497_v9, %v1492_v50  ;;  %v5827_v50 = vmul.f32 %v5815_v39, %v1884_v29 }
 0x2a9   : > { %v1481_v13 = vmul.f32 %v4309_v10, %v5750_v14  ;;  %v5794_v14 = vld [vmem:[#allocation11] ss:$0 sm:$0xff]  ;;  %v5829_v10 = vld [vmem:[#allocation11 + $0x6] ss:$0 sm:$0xff] }
 0x2aa   : > { %v1639_v55 = vmul.f32 %v5794_v14, %v1623_v0  ;;  %v5845_v28 = vmul.f32 %v5829_v10, %v1954_v17 }
 0x2ab   : > { %v1493_v43 = vmul.f32 %v1485_v36, %v1481_v13  ;;  %v7550_v36 = vld [vmem:[#allocation45_spill] sm:$0xff]  ;;  %v5831_v13 = vld [vmem:[#allocation11 + $0x7] ss:$0 sm:$0xff] }
 0x2ac   : > { %v1705_v20 = vadd.f32 %v7319_v42, %v1639_v55  ;;  %v5838_v11 = vmul.f32 %v5831_v13, %v1621_v44  ;;  %7553 = vst [vmem:[#allocation53_spill] sm:$0xff] %v5845_v28  ;;  %v7557_v55 = vld [vmem:[#allocation59_spill] sm:$0xff] }
 0x2ad   : > { %v1505_v3 = vadd.f32 %v1497_v9, %v1493_v43  ;;  %v1714_v9 = vmul.f32 %v1612_v27, %v7550_v36  ;;  %v7317_v43 = vrot.slane %v5812_v32, 2 }
 0x2ae   : > { %7552 = vst [vmem:[#allocation56_spill] sm:$0xff] %v5838_v11 }
 0x2af   : > { %v5784_v6 = vpack.c.bf16 %v1505_v3, %v1504_v57  ;;  %v5807_v35 = vmul.f32 %v5797_v61, %v1714_v9  ;;  %v2088_v57 = vrot.slane %v2063_v16, 2  ;;  %v1624_v3 = vmul.f32 %v1612_v27, %v5301_v40  ;;  %v5842_v9 = vld [vmem:[#allocation11 + $0x4] ss:$0 sm:$0xff] }
 0x2b1   : > { %7549 = vst [vmem:[#allocation57_spill] sm:$0xff] %v5784_v6  ;;  %4056 = vmatmul.mubr.msk.bf16.gmra.mxu0 %vm623_vm0, %v5784_v6  ;;  %v7318_v25 = vrot.slane %v5807_v35, 2  ;;  %v5854_v27 = vsel %vm936_vm4, %v7317_v43, %v2088_v57 }
 0x2b2   : > { %7554 = vst [vmem:[#allocation44_spill] sm:$0xff] %v5854_v27 }
 0x2b3   : > { %v1775_v0 = vadd.f32 %v7318_v25, %v1705_v20 }
 0x34f   : > { %v4053_v2 = vpop.f32.mrf.mxu0 }
 0x350   : > { %1605 = vst.msk [vmem:[#allocation3 + $0x20] sm:$0xff] %vm636_vm1, %v4053_v2  ;;  %v1801_v2 = vmul.f32 %v5820_v58, %v1784_v1 }
 0x351   : > { %v1572_v7 = vpop.f32.mrf.mxu0 }
 0x352   : > { %1603 = vst.msk [vmem:[#allocation3 + $0x10] sm:$0xff] %vm636_vm1, %v1572_v7  ;;  %v5859_v7 = vmul.f32 %v5794_v14, %v1624_v3 }
 0x353   : > { %v4054_v19 = vpop.f32.mrf.mxu0 }
 0x354   : > { %1606 = vst.msk [vmem:[#allocation3 + $0x28] sm:$0xff] %vm636_vm1, %v4054_v19 }
 0x355   : > { %v1575_v5 = vpop.f32.mrf.mxu0 }
 0x356   : > { %1604 = vst.msk [vmem:[#allocation3 + $0x18] sm:$0xff] %vm636_vm1, %v1575_v5  ;;  %v5868_v5 = vadd.f32 %v1801_v2, %v1775_v0  ;;  %v7556_v2 = vld [vmem:[#allocation58_spill] sm:$0xff] }
 0x357   : > { %v5835_v48 = vld [vmem:[#allocation3 + $0x20] sm:$0xff] }
 0x358   : > { %v1627_v44 = vmul.f32 %v5835_v48, %v5368_v59  ;;  %v1668_v19 = vmul.f32 %v5788_v46, %v5835_v48  ;;  %v1717_v20 = vmul.f32 %v5835_v48, %v5349_v63  ;;  %v5882_v3 = vmul.f32 %v5842_v9, %v5835_v48 }
 0x359   : > { %v5847_v62 = vld [vmem:[#allocation3 + $0x10] sm:$0xff]  ;;  %v1878_v25 = vmul.f32 %v5835_v48, %v7557_v55  ;;  %v1948_v42 = vmul.f32 %v5835_v48, %v5304_v51  ;;  %v5899_v49 = vmul.f32 %v5831_v13, %v5835_v48  ;;  %v2039_v54 = vmul.f32 %v5835_v48, %v7556_v2 }
 0x35a   : > { %v5878_v57 = vmul.f32 %v5788_v46, %v5847_v62  ;;  %v1625_v0 = vmul.f32 %v5847_v62, %v5304_v51  ;;  %v1715_v16 = vmul.f32 %v5847_v62, %v7556_v2  ;;  %v1643_v41 = vmul.f32 %v5794_v14, %v1627_v44 }
 0x35b   : > { %v5861_v29 = vld [vmem:[#allocation3 + $0x28] sm:$0xff]  ;;  %v1686_v53 = vrot.slane %v1668_v19, 1  ;;  %v1734_v22 = vmul.f32 %v5797_v61, %v1717_v20  ;;  %v1846_v21 = vrot.slane %v5882_v3, 1  ;;  %v5931_v32 = vmul.f32 %v5815_v39, %v1878_v25 }
 0x35c   : > { %v5872_v17 = vmul.f32 %v5788_v46, %v5861_v29  ;;  %v1718_v1 = vmul.f32 %v5861_v29, %v5352_v37  ;;  %v1879_v30 = vmul.f32 %v5861_v29, %v5349_v63  ;;  %v7336_v45 = vrot.slane %v5878_v57, 1 }
 0x35d   : > { %v5884_v43 = vld [vmem:[#allocation3 + $0x18] sm:$0xff]  ;;  %v5915_v12 = vmul.f32 %v5842_v9, %v5861_v29  ;;  %v1641_v19 = vmul.f32 %v5794_v14, %v1625_v0  ;;  %v5919_v20 = vmul.f32 %v5797_v61, %v1715_v16  ;;  %v1754_v11 = vrot.slane %v1734_v22, 2 }
 0x35e   : > { %7555 = vst [vmem:[#allocation32_spill] sm:$0xff] %v5872_v17  ;;  %v1667_v26 = vmul.f32 %v5788_v46, %v5884_v43  ;;  %v5908_v44 = vmul.f32 %v5797_v61, %v1718_v1  ;;  %v1716_v34 = vmul.f32 %v5884_v43, %v7557_v55  ;;  %v5928_v15 = vmul.f32 %v5842_v9, %v5884_v43 }
 0x35f   : > { %v7558_v0 = vrot.slane %v5872_v17, 1  ;;  %v5937_v63 = vmul.f32 %v5815_v39, %v1879_v30  ;;  %v7347_v27 = vrot.slane %v5919_v20, 2  ;;  %v1877_v25 = vmul.f32 %v5884_v43, %v7556_v2 }
 0x360   : > { %v1684_v6 = vrot.slane %v1667_v26, 1  ;;  %v1733_v26 = vmul.f32 %v5797_v61, %v1716_v34  ;;  %v1788_v17 = vmul.f32 %v5861_v29, %v5368_v59  ;;  %v5950_v30 = vmul.f32 %v5831_v13, %v5861_v29 }
 0x361   : > { %v1689_v16 = vsel %vm728_vm2, %v1686_v53, %v7558_v0  ;;  %v2040_v22 = vmul.f32 %v5861_v29, %v7557_v55  ;;  %v7560_v59 = vrot.slane %v5908_v44, 2  ;;  %v1914_v55 = vrot.slane %v5931_v32, 2 }
 0x362   : > { %v1685_v1 = vsel %vm728_vm2, %v7336_v45, %v1684_v6  ;;  %v1786_v45 = vmul.f32 %v5884_v43, %v5304_v51  ;;  %v1752_v37 = vrot.slane %v1733_v26, 2  ;;  %7559 = vst [vmem:[#allocation38_spill] sm:$0xff] %v5950_v30  ;;  %v5957_v26 = vmul.f32 %v5815_v39, %v1877_v25 }
 0x363   : > { %v1707_v3 = vadd.f32 %v1685_v1, %v1641_v19  ;;  %v1709_v34 = vadd.f32 %v1689_v16, %v1643_v41  ;;  %v1626_v51 = vmul.f32 %v5884_v43, %v5360_v24  ;;  %v1757_v28 = vsel %vm936_vm4, %v1754_v11, %v7560_v59 }
 0x364   : > { %v1753_v19 = vsel %vm936_vm4, %v7347_v27, %v1752_v37  ;;  %v1803_v0 = vmul.f32 %v5820_v58, %v1786_v45  ;;  %v7351_v1 = vrot.slane %v5957_v26, 2  ;;  %v1687_v25 = vsel %vm728_vm2, %v1684_v6, %v1686_v53 }
 0x365   : > { %v1777_v2 = vadd.f32 %v1753_v19, %v1707_v3  ;;  %v7353_v41 = vrot.slane %v5950_v30, 1  ;;  %v1642_v45 = vmul.f32 %v5794_v14, %v1626_v51  ;;  %v7561_v16 = vrot.slane %v5928_v15, 1 }
 0x366   : > { %v5977_v19 = vmul.f32 %v5801_v60, %v2040_v22  ;;  %v1755_v59 = vsel %vm936_vm4, %v1752_v37, %v1754_v11  ;;  %v1787_v27 = vmul.f32 %v5835_v48, %v5360_v24  ;;  %v1965_v6 = vmul.f32 %v5829_v10, %v1948_v42 }
 0x367   : > { %v1812_v4 = vadd.f32 %v1803_v0, %v1777_v2  ;;  %v1847_v3 = vsel %vm728_vm2, %v7561_v16, %v1846_v21  ;;  %v2006_v32 = vrot.slane %v5899_v49, 1  ;;  %v1708_v2 = vadd.f32 %v1687_v25, %v1642_v45 }
 0x368   : > { %v1915_v51 = vsel %vm936_vm4, %v7351_v1, %v1914_v55  ;;  %v5988_v0 = vmul.f32 %v5801_v60, %v2039_v54  ;;  %v1827_v22 = vmul.f32 %v5842_v9, %v5847_v62  ;;  %v1876_v37 = vmul.f32 %v5847_v62, %v7550_v36 }
 0x369   : > { %v1869_v53 = vadd.f32 %v1847_v3, %v1812_v4  ;;  %v2009_v4 = vsel %vm728_vm2, %v2006_v32, %v7353_v41  ;;  %v1778_v42 = vadd.f32 %v1755_v59, %v1708_v2  ;;  %v1804_v11 = vmul.f32 %v5820_v58, %v1787_v27 }
 0x36a   : > { %v7354_v25 = vrot.slane %v5977_v19, 2  ;;  %v1843_v54 = vrot.slane %v1827_v22, 1  ;;  %v1893_v45 = vmul.f32 %v5815_v39, %v1876_v37  ;;  %v2038_v16 = vmul.f32 %v5884_v43, %v7550_v36 }
 0x36b   : > { %v1939_v48 = vadd.f32 %v1915_v51, %v1869_v53  ;;  %v1813_v53 = vadd.f32 %v1804_v11, %v1778_v42  ;;  %v7562_v51 = vrot.slane %v5915_v12, 1  ;;  %v1946_v59 = vmul.f32 %v5847_v62, %v5272_v18 }
 0x36c   : > { %v1867_v27 = vadd.f32 %v1843_v54, %v5868_v5  ;;  %v1911_v2 = vrot.slane %v1893_v45, 2  ;;  %v1989_v22 = vmul.f32 %v5831_v13, %v5884_v43  ;;  %v7563_v37 = vrot.slane %v5878_v57, 1 }
 0x36d   : > { %v1974_v1 = vadd.f32 %v1965_v6, %v1939_v48  ;;  %v1849_v30 = vsel %vm728_vm2, %v1846_v21, %v7562_v51  ;;  %v7564_v6 = vrot.slane %v5792_v52, 1  ;;  %v1628_v21 = vmul.f32 %v5861_v29, %v5416_v56 }
 0x36e   : > { %v1870_v51 = vadd.f32 %v1849_v30, %v1813_v53  ;;  %v1779_v5 = vadd.f32 %v1757_v28, %v1709_v34  ;;  %v2074_v45 = vrot.slane %v5988_v0, 2  ;;  %v1949_v57 = vmul.f32 %v5861_v29, %v5360_v24 }
 0x36f   : > { %v1683_v48 = vsel %vm728_vm2, %v7564_v6, %v7563_v37  ;;  %v2031_v11 = vadd.f32 %v2009_v4, %v1974_v1  ;;  %v1937_v52 = vadd.f32 %v1911_v2, %v1867_v27  ;;  %v1805_v37 = vmul.f32 %v5820_v58, %v1788_v17 }
 0x370   : > { %v7565_v6 = vrot.slane %v5937_v63, 2  ;;  %v1706_v30 = vadd.f32 %v1683_v48, %v5859_v7  ;;  %v1785_v4 = vmul.f32 %v5847_v62, %v5301_v40  ;;  %v2077_v28 = vsel %vm936_vm4, %v2074_v45, %v7354_v25 }
 0x371   : > { %v4057_v3 = vpop.f32.mrf.mxu0  ;;  %v1963_v29 = vmul.f32 %v5829_v10, %v1946_v59  ;;  %v2005_v34 = vrot.slane %v1989_v22, 1  ;;  %v7566_v17 = vrot.slane %v5919_v20, 2  ;;  %v7567_v0 = vrot.slane %v5807_v35, 2 }
 0x372   : > { %1609 = vst.msk [vmem:[#allocation3 + $0x40] sm:$0xff] %vm636_vm1, %v4057_v3  ;;  %v6021_v3 = vmul.f32 %v5801_v60, %v2038_v16  ;;  %v1917_v1 = vsel %vm936_vm4, %v1914_v55, %v7565_v6  ;;  %v6045_v7 = vmul.f32 %v5794_v14, %v1628_v21  ;;  %v6047_v62 = vadd.f32 %v2077_v28, %v2031_v11 }
 0x373   : > { %v1588_v42 = vpop.f32.mrf.mxu0  ;;  %v1751_v55 = vsel %vm936_vm4, %v7567_v0, %v7566_v17  ;;  %v6051_v27 = vadd.f32 %v1805_v37, %v1779_v5  ;;  %v1966_v59 = vmul.f32 %v5829_v10, %v1949_v57  ;;  %v1972_v20 = vadd.f32 %v1963_v29, %v1937_v52 }
 0x374   : > { %1607 = vst.msk [vmem:[#allocation3 + $0x30] sm:$0xff] %vm636_vm1, %v1588_v42  ;;  %7568 = vst [vmem:[#allocation43_spill] sm:$0xff] %v6047_v62  ;;  %v7355_v53 = vrot.slane %v6021_v3, 2  ;;  %v7569_v35 = vrot.slane %v5928_v15, 1  ;;  %v6061_v42 = vadd.f32 %v1751_v55, %v1706_v30  ;;  %v6064_v21 = vmul.f32 %v5820_v58, %v1785_v4  ;;  %v6075_v15 = vpop.permute.xlu1 %2114 }
 0x375   : > { %v4058_v41 = vpop.f32.mrf.mxu0  ;;  %v7570_v11 = vrot.slane %v5957_v26, 2  ;;  %v6073_v5 = vmul.f32 %v5884_v43, %v5301_v40  ;;  %v6088_v26 = vsel %vm728_vm2, %v2005_v34, %v2006_v32  ;;  %v6096_v37 = vadd.f32 %v6075_v15, %v6047_v62 }
 0x376   : > { %1610 = vst.msk [vmem:[#allocation3 + $0x48] sm:$0xff] %vm636_vm1, %v4058_v41  ;;  %v1940_v41 = vadd.f32 %v1917_v1, %v1870_v51  ;;  %v6057_v22 = vsel %vm728_vm2, %v1843_v54, %v7569_v35  ;;  %7571 = vst [vmem:[#allocation33_spill] sm:$0xff] %v6088_v26  ;;  %v6103_v1 = vsel %vm936_vm4, %v7355_v53, %v2074_v45  ;;  %v7578_v26 = vld [vmem:[#allocation53_spill] sm:$0xff] }
 0x377   : > { %v1591_v16 = vpop.f32.mrf.mxu0  ;;  %v6069_v51 = vsel %vm936_vm4, %v1911_v2, %v7570_v11  ;;  %7572 = vst [vmem:[#allocation34_spill] sm:$0xff] %v6103_v1  ;;  %v6110_v4 = vadd.f32 %v2005_v34, %v1972_v20 }
 0x378   : > { %1608 = vst.msk [vmem:[#allocation3 + $0x38] sm:$0xff] %vm636_vm1, %v1591_v16  ;;  %v6098_v6 = vadd.f32 %v1966_v59, %v1940_v41 }
 0x379   : > { %v6059_v48 = vld [vmem:[#allocation3 + $0x40] sm:$0xff] }
 0x37a   : > { %v1631_v54 = vmul.f32 %v6059_v48, %v5536_v8  ;;  %v6081_v57 = vmul.f32 %v5788_v46, %v6059_v48  ;;  %v1721_v52 = vmul.f32 %v6059_v48, %v5598_v23  ;;  %v1882_v43 = vmul.f32 %v6059_v48, %v5393_v47 }
 0x37b   : > { %v6090_v2 = vld [vmem:[#allocation3 + $0x30] sm:$0xff]  ;;  %v6124_v0 = vmul.f32 %v5842_v9, %v6059_v48  ;;  %v1952_v16 = vmul.f32 %v6059_v48, %v5421_v33  ;;  %v6135_v41 = vmul.f32 %v5831_v13, %v6059_v48 }
 0x37c   : > { %v1647_v49 = vmul.f32 %v5794_v14, %v1631_v54  ;;  %v1694_v32 = vrot.slane %v6081_v57, 1  ;;  %v6108_v30 = vmul.f32 %v5797_v61, %v1721_v52  ;;  %v1629_v29 = vmul.f32 %v6090_v2, %v5421_v33 }
 0x37d   : > { %v6112_v28 = vld [vmem:[#allocation3 + $0x48] sm:$0xff]  ;;  %v6118_v17 = vmul.f32 %v5788_v46, %v6090_v2  ;;  %v1719_v45 = vmul.f32 %v6090_v2, %v5384_v38  ;;  %v6129_v55 = vmul.f32 %v5815_v39, %v1882_v43  ;;  %v1854_v18 = vrot.slane %v6124_v0, 1 }
 0x37e   : > { %v1722_v34 = vmul.f32 %v6112_v28, %v5534_v31  ;;  %v1713_v20 = vadd.f32 %v1694_v32, %v1647_v49  ;;  %v1762_v35 = vrot.slane %v6108_v30, 2  ;;  %v1792_v11 = vmul.f32 %v6112_v28, %v5536_v8 }
 0x37f   : > { %v6137_v59 = vld [vmem:[#allocation3 + $0x38] sm:$0xff]  ;;  %v1883_v54 = vmul.f32 %v6112_v28, %v5598_v23  ;;  %v6147_v52 = vmul.f32 %v5842_v9, %v6112_v28  ;;  %v1645_v25 = vmul.f32 %v5794_v14, %v1629_v29  ;;  %v6159_v24 = vmul.f32 %v5797_v61, %v1719_v45 }
 0x380   : > { %v1739_v57 = vmul.f32 %v5797_v61, %v1722_v34  ;;  %v1671_v43 = vmul.f32 %v5788_v46, %v6137_v59  ;;  %v1720_v49 = vmul.f32 %v6137_v59, %v5393_v47  ;;  %v6164_v46 = vmul.f32 %v5842_v9, %v6137_v59 }
 0x381   : > { %v6154_v30 = vmul.f32 %v5815_v39, %v1883_v54  ;;  %v1809_v40 = vmul.f32 %v5820_v58, %v1792_v11  ;;  %v1790_v29 = vmul.f32 %v6137_v59, %v5421_v33  ;;  %v1881_v53 = vmul.f32 %v6137_v59, %v5384_v38 }
 0x382   : > { %v1764_v34 = vrot.slane %v1739_v57, 2  ;;  %v1692_v23 = vrot.slane %v1671_v43, 1  ;;  %v1737_v8 = vmul.f32 %v5797_v61, %v1720_v49  ;;  %v7573_v57 = vrot.slane %v6118_v17, 1 }
 0x383   : > { %v7371_v43 = vrot.slane %v6159_v24, 2  ;;  %v7376_v11 = vrot.slane %v6164_v46, 1  ;;  %v6179_v54 = vmul.f32 %v5815_v39, %v1881_v53  ;;  %v1856_v33 = vrot.slane %v6147_v52, 1 }
 0x384   : > { %v1765_v45 = vsel %vm936_vm4, %v1762_v35, %v1764_v34  ;;  %v1693_v61 = vsel %vm728_vm2, %v7573_v57, %v1692_v23  ;;  %v1760_v49 = vrot.slane %v1737_v8, 2  ;;  %v2043_v57 = vmul.f32 %v6059_v48, %v5384_v38 }
 0x385   : > { %v1783_v31 = vadd.f32 %v1765_v45, %v1713_v20  ;;  %v1711_v36 = vadd.f32 %v1693_v61, %v1645_v25  ;;  %v1807_v25 = vmul.f32 %v5820_v58, %v1790_v29  ;;  %v1995_v20 = vmul.f32 %v5831_v13, %v6112_v28 }
 0x386   : > { %v1761_v34 = vsel %vm936_vm4, %v7371_v43, %v1760_v49  ;;  %v7574_v53 = vrot.slane %v5827_v50, 2  ;;  %v7575_v52 = vrot.slane %v6154_v30, 2  ;;  %v2044_v0 = vmul.f32 %v6112_v28, %v5393_v47  ;;  %v7576_v43 = vld [vmem:[#allocation52_spill] sm:$0xff] }
 0x387   : > { %v1818_v1 = vadd.f32 %v1809_v40, %v1783_v31  ;;  %v1781_v8 = vadd.f32 %v1761_v34, %v1711_v36  ;;  %v1630_v40 = vmul.f32 %v6137_v59, %v7576_v43  ;;  %v1855_v29 = vsel %vm728_vm2, %v7376_v11, %v1854_v18 }
 0x388   : > { %v1927_v45 = vsel %vm936_vm4, %v7575_v52, %v7574_v53  ;;  %v1922_v50 = vrot.slane %v6129_v55, 2  ;;  %v6206_v34 = vmul.f32 %v5801_v60, %v2043_v57  ;;  %v6209_v53 = vmul.f32 %v5801_v60, %v2044_v0 }
 0x389   : > { %v1875_v31 = vadd.f32 %v1856_v33, %v1818_v1  ;;  %v1816_v36 = vadd.f32 %v1807_v25, %v1781_v8  ;;  %v1646_v52 = vmul.f32 %v5794_v14, %v1630_v40  ;;  %v1695_v61 = vsel %vm728_vm2, %v1692_v23, %v1694_v32 }
 0x38a   : > { %v2016_v1 = vrot.slane %v1995_v20, 1  ;;  %v1763_v8 = vsel %vm936_vm4, %v1760_v49, %v1762_v35  ;;  %v7577_v25 = vrot.slane %v6179_v54, 2  ;;  %v1969_v55 = vmul.f32 %v5829_v10, %v1952_v16  ;;  %v7579_v16 = vld [vmem:[#allocation56_spill] sm:$0xff] }
 0x38b   : > { %v1945_v47 = vadd.f32 %v1927_v45, %v1875_v31  ;;  %v1873_v38 = vadd.f32 %v1855_v29, %v1816_v36  ;;  %v1712_v57 = vadd.f32 %v1695_v61, %v1646_v52  ;;  %v1791_v0 = vmul.f32 %v6059_v48, %v7576_v43  ;;  %v7581_v36 = vld [vmem:[#allocation66_spill] sm:$0xff] }
 0x38c   : > { %v1923_v11 = vsel %vm936_vm4, %v7577_v25, %v1922_v50  ;;  %v2014_v23 = vrot.slane %v6135_v41, 1  ;;  %v2084_v32 = vrot.slane %v6209_v53, 2  ;;  %v2082_v20 = vrot.slane %v6206_v34, 2 }
 0x38d   : > { %v1980_v62 = vadd.f32 %v7578_v26, %v1945_v47  ;;  %v1943_v14 = vadd.f32 %v1923_v11, %v1873_v38  ;;  %v1782_v35 = vadd.f32 %v1763_v8, %v1712_v57  ;;  %v1808_v49 = vmul.f32 %v5820_v58, %v1791_v0 }
 0x38e   : > { %v6227_v45 = vadd.f32 %v6064_v21, %v6061_v42  ;;  %v7580_v61 = vrot.slane %v7579_v16, 1  ;;  %v2017_v38 = vsel %vm728_vm2, %v2014_v23, %v2016_v1  ;;  %v1857_v47 = vsel %vm728_vm2, %v1854_v18, %v1856_v33  ;;  %v7582_v21 = vld [vmem:[#allocation44_spill] sm:$0xff] }
 0x38f   : > { %v1978_v48 = vadd.f32 %v1969_v55, %v1943_v14  ;;  %v1817_v26 = vadd.f32 %v1808_v49, %v1782_v35  ;;  %v1953_v11 = vmul.f32 %v6112_v28, %v7576_v43  ;;  %v1831_v31 = vmul.f32 %v5842_v9, %v6090_v2  ;;  %v7583_v9 = vld [vmem:[#allocation68_spill] sm:$0xff] }
 0x390   : > { %v2037_v40 = vadd.f32 %v7580_v61, %v1980_v62  ;;  %v1880_v42 = vmul.f32 %v6090_v2, %v7581_v36  ;;  %v2085_v53 = vsel %vm936_vm4, %v2082_v20, %v2084_v32  ;;  %v6247_v18 = vmul.f32 %v5831_v13, %v6137_v59 }
 0x391   : > { %v2035_v62 = vadd.f32 %v2017_v38, %v1978_v48  ;;  %v1874_v33 = vadd.f32 %v1857_v47, %v1817_v26  ;;  %v1850_v28 = vrot.slane %v1831_v31, 1  ;;  %v1950_v8 = vmul.f32 %v6090_v2, %v7583_v9 }
 0x392   : > { %v2107_v29 = vadd.f32 %v7582_v21, %v2037_v40  ;;  %v1897_v52 = vmul.f32 %v5815_v39, %v1880_v42  ;;  %v7584_v55 = vrot.slane %v6154_v30, 2  ;;  %v1992_v0 = vmul.f32 %v5831_v13, %v6090_v2  ;;  %v7590_v21 = vld [vmem:[#allocation32_spill] sm:$0xff] }
 0x393   : > { %v2105_v25 = vadd.f32 %v2085_v53, %v2035_v62  ;;  %v6260_v14 = vmul.f32 %v5829_v10, %v6073_v5  ;;  %v1970_v39 = vmul.f32 %v5829_v10, %v1953_v11  ;;  %v7585_v49 = vrot.slane %v5915_v12, 1  ;;  %v7587_v5 = vld [vmem:[#allocation65_spill] sm:$0xff] }
 0x394   : > { %2269 = vrot.lane.b32.xlu1 %v2107_v29, %s4654_s20  ;;  %v1925_v57 = vsel %vm936_vm4, %v1922_v50, %v7584_v55  ;;  %v1918_v40 = vrot.slane %v1897_v52, 2  ;;  %v7586_v30 = vrot.slane %v7579_v16, 1  ;;  %v2012_v48 = vrot.slane %v6247_v18, 1 }
 0x395   : > { %v1944_v35 = vadd.f32 %v1925_v57, %v1874_v33  ;;  %v1851_v61 = vsel %vm728_vm2, %v7585_v49, %v1850_v28  ;;  %2265 = vrot.lane.b32.xlu0 %v2105_v25, %s4654_s20  ;;  %v2041_v38 = vmul.f32 %v6090_v2, %v7587_v5  ;;  %v7588_v26 = vrot.slane %v5937_v63, 2  ;;  %v7594_v57 = vld [vmem:[#allocation61_spill] sm:$0xff] }
 0x396   : > { %v2019_v50 = vsel %vm728_vm2, %v2016_v1, %v7586_v30  ;;  %v1871_v13 = vadd.f32 %v1851_v61, %v6051_v27  ;;  %v1967_v11 = vmul.f32 %v5829_v10, %v1950_v8  ;;  %v2042_v31 = vmul.f32 %v6137_v59, %v7581_v36 }
 0x397   : > { %v1979_v47 = vadd.f32 %v1970_v39, %v1944_v35  ;;  %v1919_v12 = vsel %vm936_vm4, %v7588_v26, %v1918_v40  ;;  %v2010_v42 = vrot.slane %v1992_v0, 1  ;;  %v2058_v1 = vmul.f32 %v5801_v60, %v2041_v38 }
 0x398   : > { %v1941_v16 = vadd.f32 %v1919_v12, %v1871_v13  ;;  %v7589_v27 = vrot.slane %v6118_v17, 1  ;;  %v7591_v62 = vrot.slane %v7590_v21, 1  ;;  %v2059_v63 = vmul.f32 %v5801_v60, %v2042_v31 }
 0x399   : > { %v2036_v18 = vadd.f32 %v2019_v50, %v1979_v47  ;;  %v7592_v52 = vrot.slane %v6159_v24, 2  ;;  %v7593_v8 = vrot.slane %v5908_v44, 2  ;;  %v7595_v0 = vrot.slane %v7594_v57, 2  ;;  %v7602_v57 = vld [vmem:[#allocation43_spill] sm:$0xff] }
 0x39a   : > { %v1691_v53 = vsel %vm728_vm2, %v7591_v62, %v7589_v27  ;;  %v1976_v17 = vadd.f32 %v1967_v11, %v1941_v16  ;;  %v2013_v39 = vsel %vm728_vm2, %v2010_v42, %v2012_v48  ;;  %v1789_v49 = vmul.f32 %v6090_v2, %v5416_v56  ;;  %v7598_v27 = vld [vmem:[#allocation38_spill] sm:$0xff] }
 0x39b   : > { %v1710_v33 = vadd.f32 %v1691_v53, %v6045_v7  ;;  %v1759_v55 = vsel %vm936_vm4, %v7593_v8, %v7592_v52  ;;  %v2087_v35 = vsel %vm936_vm4, %v2084_v32, %v7595_v0  ;;  %v2078_v60 = vrot.slane %v2058_v1, 2 }
 0x39c   : > { %v2106_v61 = vadd.f32 %v2087_v35, %v2036_v18  ;;  %v2080_v30 = vrot.slane %v2059_v63, 2  ;;  %v2033_v50 = vadd.f32 %v2013_v39, %v1976_v17  ;;  %v1806_v24 = vmul.f32 %v5820_v58, %v1789_v49  ;;  %v7603_v49 = vld [vmem:[#allocation33_spill] sm:$0xff] }
 0x39d   : > { %v1780_v7 = vadd.f32 %v1759_v55, %v1710_v33  ;;  %v1951_v44 = vmul.f32 %v6137_v59, %v5416_v56  ;;  %v6304_v13 = vsel %vm2128_vm5, %v6096_v37, -inf  ;;  %v6307_v32 = vadd.f32 %v6075_v15, %v2107_v29 }
 0x39e   : > { %v2643_v38 = vpack.c.bf16 %v2107_v29, %v2107_v29  ;;  %2267 = vrot.lane.b32.xlu1 %v2106_v61, %s4654_s20  ;;  %v2642_v2 = vpack.c.bf16 %v2106_v61, %v2105_v25  ;;  %v2081_v47 = vsel %vm936_vm4, %v2078_v60, %v2080_v30  ;;  %v6312_v58 = vadd.f32 %v6075_v15, %v2105_v25 }
 0x39f   : > { %v2103_v26 = vadd.f32 %v2081_v47, %v2033_v50  ;;  %v1815_v59 = vadd.f32 %v1806_v24, %v1780_v7  ;;  %v7596_v12 = vrot.slane %v6164_v46, 1  ;;  %v6318_v31 = vadd.f32 %v6075_v15, %v2106_v61  ;;  %v7604_v47 = vld [vmem:[#allocation34_spill] sm:$0xff] }
 0x3a0   : > { %v7597_v29 = vrot.slane %v6179_v54, 2  ;;  %v1968_v1 = vmul.f32 %v5829_v10, %v1951_v44  ;;  %v7599_v21 = vrot.slane %v7598_v27, 1  ;;  %v1868_v54 = vadd.f32 %v6057_v22, %v6227_v45 }
 0x3a1   : > { %v1853_v11 = vsel %vm728_vm2, %v1850_v28, %v7596_v12  ;;  %2261 = vrot.lane.b32.xlu0 %v2103_v26, %s4654_s20  ;;  %v7600_v28 = vrot.slane %v6021_v3, 2  ;;  %v2673_v18 = vshrl.u32 %v2642_v2, 16  ;;  %v2676_v63 = vshll.u32 %v2642_v2, 16 }
 0x3a2   : > { %v1921_v16 = vsel %vm936_vm4, %v1918_v40, %v7597_v29  ;;  %v2011_v25 = vsel %vm728_vm2, %v7599_v21, %v2010_v42  ;;  %v1872_v62 = vadd.f32 %v1853_v11, %v1815_v59  ;;  %v7601_v40 = vrot.slane %v5977_v19, 2 }
 0x3a3   : > { %v2032_v46 = vadd.f32 %v2011_v25, %v6098_v6  ;;  %v2099_v53 = vadd.f32 %v7600_v28, %v6110_v4  ;;  %v2682_v33 = vshrl.u32 %v2643_v38, 16  ;;  %v6338_v42 = vadd.f32 %v6075_v15, %v2103_v26 }
 0x3a4   : > { %v2079_v10 = vsel %vm936_vm4, %v7601_v40, %v2078_v60  ;;  %v1942_v52 = vadd.f32 %v1921_v16, %v1872_v62  ;;  %v1938_v6 = vadd.f32 %v6069_v51, %v1868_v54  ;;  %v2136_v3 = vsel %vm2128_vm5, %v6312_v58, -inf }
 0x3a5   : > { %v2102_v8 = vadd.f32 %v2079_v10, %v2032_v46  ;;  %v2015_v19 = vsel %vm728_vm2, %v2012_v48, %v2014_v23  ;;  %v2675_v22 = vrot.slane %v2673_v18, 3  ;;  %v2678_v4 = vrot.slane %v2676_v63, 4  ;;  %2257 = vrot.lane.b32.xlu0 %v7602_v57, %s4654_s20 }
 0x3a6   : > { %v1977_v45 = vadd.f32 %v1968_v1, %v1942_v52  ;;  %v2083_v55 = vsel %vm936_vm4, %v2080_v30, %v2082_v20  ;;  %v6353_v0 = vadd.f32 %v6075_v15, %v2099_v53  ;;  %v1973_v41 = vadd.f32 %v6260_v14, %v1938_v6 }
 0x3a7   : > { %v2640_v51 = vpack.c.bf16 %v2102_v8, %v7602_v57  ;;  %v6356_v35 = vadd.f32 %v6075_v15, %v2102_v8  ;;  %v2684_v23 = vrot.slane %v2682_v33, 3  ;;  %v2685_v48 = vshll.u32 %v2643_v38, 16 }
 0x3a8   : > { %v2138_v34 = vsel %vm2128_vm5, %v6318_v31, -inf  ;;  %v2132_v20 = vsel %vm2128_vm5, %v6338_v42, -inf  ;;  %v2034_v17 = vadd.f32 %v2015_v19, %v1977_v45  ;;  %v2030_v61 = vadd.f32 %v7603_v49, %v1973_v41 }
 0x3a9   : > { %v2655_v39 = vshrl.u32 %v2640_v51, 16  ;;  %v2658_v60 = vshll.u32 %v2640_v51, 16  ;;  %v2679_v30 = vor.u32 %v2678_v4, %v2675_v22  ;;  %v2687_v7 = vrot.slane %v2685_v48, 4  ;;  %2253 = vrot.lane.b32.xlu0 %v2099_v53, %s4654_s20 }
 0x3aa   : > { %v2141_v50 = vsel %vm2140_vm6, %v6307_v32, -inf  ;;  %v2104_v24 = vadd.f32 %v2083_v55, %v2034_v17  ;;  %v2137_v14 = vmax.f32 %v6304_v13, %v2136_v3  ;;  %v2127_v44 = vsel %vm2126_vm7, %v6353_v0, -inf }
 0x3ab   : > { %v2131_v38 = vsel %vm2128_vm5, %v6356_v35, -inf  ;;  %v2133_v2 = vmax.f32 %v2127_v44, %v2132_v20  ;;  %v2100_v59 = vadd.f32 %v7604_v47, %v2030_v61  ;;  %v2688_v12 = vor.u32 %v2687_v7, %v2684_v23 }
 0x3ac   : > { %v2122_v11 = vadd.f32 %v6075_v15, %v2104_v24  ;;  %v2641_v29 = vpack.c.bf16 %v2104_v24, %v2103_v26  ;;  %2263 = vrot.lane.b32.xlu1 %v2104_v24, %s4654_s20  ;;  %v2139_v16 = vmax.f32 %v2131_v38, %v2138_v34  ;;  %v2657_v1 = vrot.slane %v2655_v39, 3 }
 0x3ad   : > { %v2118_v13 = vadd.f32 %v6075_v15, %v2100_v59  ;;  %v2639_v27 = vpack.c.bf16 %v2100_v59, %v2099_v53  ;;  %v2660_v21 = vrot.slane %v2658_v60, 4  ;;  %v6377_v25 = vsel %vm2310_vm8, %v2679_v30, %v2688_v12 }
 0x3ae   : > { %v2134_v62 = vsel %vm2128_vm5, %v2122_v11, -inf  ;;  %v2142_v46 = vmax.f32 %v2133_v2, %v2141_v50  ;;  %v2664_v28 = vshrl.u32 %v2641_v29, 16  ;;  %v2667_v54 = vshll.u32 %v2641_v29, 16 }
 0x3af   : > { %v2129_v40 = vsel %vm2128_vm5, %v2118_v13, -inf  ;;  %v2647_v10 = vshrl.u32 %v2639_v27, 16  ;;  %v2650_v26 = vshll.u32 %v2639_v27, 16  ;;  %v2144_v18 = vmax.f32 %v2137_v14, %v2139_v16 }
 0x3b0   : > { %2259 = vrot.lane.b32.xlu1 %v2102_v8, %s4654_s20  ;;  %v2135_v63 = vmax.f32 %v2129_v40, %v2134_v62  ;;  %v2666_v33 = vrot.slane %v2664_v28, 3  ;;  %v2669_v15 = vrot.slane %v2667_v54, 4  ;;  %v2661_v6 = vor.u32 %v2660_v21, %v2657_v1 }
 0x3b1   : > { %v2649_v53 = vrot.slane %v2647_v10, 3  ;;  %v2652_v52 = vrot.slane %v2650_v26, 4 }
 0x3b2   : > { %v2143_v3 = vmax.f32 %v2142_v46, %v2135_v63  ;;  %v2670_v19 = vor.u32 %v2669_v15, %v2666_v33 }
 0x3b3   : > { %v2653_v22 = vor.u32 %v2652_v52, %v2649_v53 }
 0x3b4   : > { %2255 = vrot.lane.b32.xlu1 %v2100_v59, %s4654_s20  ;;  %v2145_v4 = vmax.f32 %v2143_v3, %v2144_v18  ;;  %v6384_v45 = vsel %vm2310_vm8, %v2661_v6, %v2670_v19  ;;  %v6387_v55 = vsel %vm2310_vm8, %v2670_v19, %v2679_v30 }
 0x3b5   : > { %v6390_v8 = vsel %vm2310_vm8, %v2653_v22, %v2661_v6 }
 0x3b6   : > { %v2146_v57 = vrot.slane %v2145_v4, 4 }
 0x3b8   : > { %v2147_v51 = vmax.f32 %v2145_v4, %v2146_v57 }
 0x3ba   : > { %v2148_v41 = vrot.slane %v2147_v51, 2 }
 0x3bc   : > { %v2149_v23 = vmax.f32 %v2147_v51, %v2148_v41 }
 0x3be   : > { %v2150_v48 = vrot.slane %v2149_v23, 1 }
 0x3c0   : > { %v2151_v34 = vmax.f32 %v2149_v23, %v2150_v48 }
 0x3c2   : > { %v2152_v20 = vsub.f32 %v6353_v0, %v2151_v34  ;;  %v2153_v17 = vsub.f32 %v2118_v13, %v2151_v34  ;;  %v2154_v39 = vsub.f32 %v6096_v37, %v2151_v34  ;;  %v2155_v49 = vsub.f32 %v6356_v35, %v2151_v34 }
 0x3c3   : > { %v2156_v61 = vsub.f32 %v6338_v42, %v2151_v34  ;;  %v2157_v60 = vsub.f32 %v2122_v11, %v2151_v34  ;;  %v2158_v30 = vsub.f32 %v6312_v58, %v2151_v34  ;;  %v2159_v14 = vsub.f32 %v6318_v31, %v2151_v34 }
 0x3c4   : > { %v2161_v7 = vmul.f32 1.442695, %v2152_v20  ;;  %v2163_v50 = vmul.f32 1.442695, %v2153_v17  ;;  %v2165_v24 = vmul.f32 1.442695, %v2154_v39  ;;  %v2160_v0 = vsub.f32 %v6307_v32, %v2151_v34 }
 0x3c5   : > { %v2167_v44 = vmul.f32 1.442695, %v2155_v49  ;;  %v2169_v38 = vmul.f32 1.442695, %v2156_v61  ;;  %v2171_v2 = vmul.f32 1.442695, %v2157_v60 }
 0x3c6   : > { %4310 = vpow2.f32 %v2161_v7  ;;  %v2173_v37 = vmul.f32 1.442695, %v2158_v30  ;;  %v2175_v35 = vmul.f32 1.442695, %v2159_v14  ;;  %v2177_v42 = vmul.f32 1.442695, %v2160_v0 }
 0x3c7   : > { %4312 = vpow2.f32 %v2163_v50 }
 0x3c8   : > { %4314 = vpow2.f32 %v2165_v24 }
 0x3c9   : > { %4316 = vpow2.f32 %v2167_v44 }
 0x3ca   : > { %4318 = vpow2.f32 %v2169_v38 }
 0x3cb   : > { %4320 = vpow2.f32 %v2171_v2 }
 0x3cc   : > { %4322 = vpow2.f32 %v2173_v37 }
 0x3cd   : > { %4324 = vpow2.f32 %v2175_v35 }
 0x3ce   : > { %4326 = vpow2.f32 %v2177_v42 }
 0x3d3   : > { %v6399_v58 = vpop.eup %4310 }
 0x3d4   : > { %v6401_v31 = vpop.eup %4312  ;;  %v2188_v47 = vrot.slane %v6399_v58, 7 }
 0x3d5   : > { %v6404_v59 = vpop.eup %4314  ;;  %v2189_v32 = vrot.slane %v6401_v31, 7 }
 0x3d6   : > { %v6407_v12 = vpop.eup %4316  ;;  %v2191_v11 = vrot.slane %v6404_v59, 7 }
 0x3d7   : > { %v6410_v29 = vpop.eup %4318  ;;  %v2190_v16 = vsel %vm876_vm3, %v2188_v47, %v2189_v32  ;;  %v2193_v1 = vrot.slane %v6407_v12, 7 }
 0x3d8   : > { %v6414_v13 = vpop.eup %4320  ;;  %v2192_v27 = vsel %vm876_vm3, %v2189_v32, %v2191_v11  ;;  %v2195_v21 = vrot.slane %v6410_v29, 7  ;;  %v2213_v62 = vsel %vm2128_vm5, %v2190_v16, 0.0 }
 0x3d9   : > { %v4323_v46 = vpop.eup %4322  ;;  %v2194_v28 = vsel %vm876_vm3, %v2191_v11, %v2193_v1  ;;  %v2197_v54 = vrot.slane %v6414_v13, 7  ;;  %v2214_v40 = vsel %vm2128_vm5, %v2192_v27, 0.0 }
 0x3da   : > { %v4325_v10 = vpop.eup %4324  ;;  %v2196_v26 = vsel %vm876_vm3, %v2193_v1, %v2195_v21  ;;  %v2199_v18 = vrot.slane %v4323_v46, 7  ;;  %v2215_v63 = vadd.f32 %v2214_v40, %v2213_v62  ;;  %v2216_v15 = vsel %vm2128_vm5, %v2194_v28, 0.0 }
 0x3db   : > { %v4327_v33 = vpop.eup %4326  ;;  %v2198_v53 = vsel %vm876_vm3, %v2195_v21, %v2197_v54  ;;  %v2201_v52 = vrot.slane %v4325_v10, 7  ;;  %v2218_v3 = vsel %vm2128_vm5, %v2196_v26, 0.0 }
 0x3dc   : > { %v2217_v6 = vadd.f32 %v2216_v15, %v2215_v63  ;;  %v2200_v19 = vsel %vm876_vm3, %v2197_v54, %v2199_v18  ;;  %v2203_v4 = vrot.slane %v4327_v33, 7  ;;  %v2220_v57 = vsel %vm2128_vm5, %v2198_v53, 0.0 }
 0x3dd   : > { %v2202_v51 = vsel %vm876_vm3, %v2199_v18, %v2201_v52  ;;  %v2222_v23 = vsel %vm2128_vm5, %v2200_v19, 0.0 }
 0x3de   : > { %v2219_v22 = vadd.f32 %v2218_v3, %v2217_v6  ;;  %v2204_v34 = vsel %vm876_vm3, %v2201_v52, %v2203_v4  ;;  %v2224_v20 = vsel %vm2128_vm5, %v2202_v51, 0.0 }
 0x3df   : > { %v2226_v39 = vsel %vm2128_vm5, %v2204_v34, 0.0 }
 0x3e0   : > { %v2221_v41 = vadd.f32 %v2220_v57, %v2219_v22 }
 0x3e2   : > { %v2223_v48 = vadd.f32 %v2222_v23, %v2221_v41 }
 0x3e4   : > { %v2225_v17 = vadd.f32 %v2224_v20, %v2223_v48 }
 0x3e6   : > { %v2227_v49 = vadd.f32 %v2226_v39, %v2225_v17 }
 0x3e8   : > { %v2228_v61 = vrot.slane %v2227_v49, 4 }
 0x3ea   : > { %v2229_v60 = vadd.f32 %v2228_v61, %v2227_v49 }
 0x3ec   : > { %v2230_v30 = vrot.slane %v2229_v60, 2 }
 0x3ee   : > { %v2231_v7 = vadd.f32 %v2230_v30, %v2229_v60 }
 0x3f0   : > { %v2232_v50 = vrot.slane %v2231_v7, 1 }
 0x3f2   : > { %v2233_v24 = vadd.f32 %v2232_v50, %v2231_v7 }
 0x3f4   : > { %4328 = vrcp.f32 %v2233_v24 }
 0x401   : > { %v4329_v14 = vpop.eup %4328 }
 0x402   : > { %v2243_v38 = vmul.f32 %v4329_v14, %v4327_v33  ;;  %v2241_v35 = vmul.f32 %v4329_v14, %v4323_v46  ;;  %v2242_v42 = vmul.f32 %v4329_v14, %v4325_v10  ;;  %v2239_v46 = vmul.f32 %v4329_v14, %v6410_v29 }
 0x403   : > { %v2240_v10 = vmul.f32 %v4329_v14, %v6414_v13  ;;  %v2237_v22 = vmul.f32 %v4329_v14, %v6404_v59  ;;  %v2238_v4 = vmul.f32 %v4329_v14, %v6407_v12  ;;  %v2235_v13 = vmul.f32 %v4329_v14, %v6399_v58 }
 0x404   : > { %v2236_v39 = vmul.f32 %v4329_v14, %v6401_v31 }
 0x406   : > { %v2270_v44 = vpop.permute.xlu1 %2269 }
 0x407   : > { %v2288_v0 = vmul.f32 %v2270_v44, %v2243_v38  ;;  %v2266_v37 = vpop.permute.xlu0 %2265 }
 0x408   : > { %v2286_v16 = vmul.f32 %v2266_v37, %v2241_v35 }
 0x409   : > { %v2293_v2 = vpack.c.bf16 %v2288_v0, %v2288_v0 }
 0x40b   : > { %v2347_v32 = vshrl.u32 %v2293_v2, 16  ;;  %v2350_v11 = vshll.u32 %v2293_v2, 16 }
 0x40d   : > { %v2349_v21 = vrot.slane %v2347_v32, 3  ;;  %v2352_v62 = vrot.slane %v2350_v11, 4  ;;  %v7607_v32 = vld [vmem:[#allocation54_spill] sm:$0xff]  ;;  %v7608_v11 = vld [vmem:[#allocation57_spill] sm:$0xff] }
 0x40f   : > { %v2353_v63 = vor.u32 %v2352_v62, %v2349_v21 }
 0x410   : > { %v2268_v47 = vpop.permute.xlu1 %2267 }
 0x411   : > { %v2287_v1 = vmul.f32 %v2268_v47, %v2242_v42  ;;  %v7605_v42 = vld [vmem:[#allocation51_spill] sm:$0xff]  ;;  %v7606_v47 = vld [vmem:[#allocation62_spill] sm:$0xff] }
 0x413   : > { %v2292_v27 = vpack.c.bf16 %v2287_v1, %v2286_v16  ;;  %v2262_v40 = vpop.permute.xlu0 %2261 }
 0x414   : > { %v2284_v6 = vmul.f32 %v2262_v40, %v2239_v46  ;;  %v4282_v46 = vld [vmem:[#allocation16] sm:$0xff]  }
 0x415   : > { %v2338_v28 = vshrl.u32 %v2292_v27, 16  ;;  %v2341_v54 = vshll.u32 %v2292_v27, 16  ;;  %v4278_v27 = vld [vmem:[#allocation14] sm:$0xff]   ;;  %4087 = vmatprep.mubr.msk.bf16.mxu1 %vm623_vm0, %v4282_v46  ;;  %v4346_v46 = vld [vmem:[#allocation2 + $0x8] sm:$0xff] }
 0x417   : > { %v2340_v26 = vrot.slane %v2338_v28, 3  ;;  %v2343_v18 = vrot.slane %v2341_v54, 4  ;;  %v2258_v53 = vpop.permute.xlu0 %2257 }
 0x418   : > { %v2282_v23 = vmul.f32 %v2258_v53, %v2237_v22 }
 0x419   : > { %v2344_v33 = vor.u32 %v2343_v18, %v2340_v26  ;;  %v4279_v18 = vld [vmem:[#allocation14 + $0x8] sm:$0xff]  }
 0x41b   : > { %v2354_v15 = vsel %vm2310_vm8, %v2344_v33, %v2353_v63  ;;  %v2254_v29 = vpop.permute.xlu0 %2253  ;;  %v4280_v63 = vld [vmem:[#allocation14 + $0x10] sm:$0xff]  }
 0x41c   : > { %2361 = vrot.lane.b32.xlu0 %v2354_v15, %s4655_s19  ;;  %v2280_v49 = vmul.f32 %v2254_v29, %v2235_v13 }
 0x41e   : > { %v2264_v52 = vpop.permute.xlu1 %2263 }
 0x41f   : > { %v2285_v3 = vmul.f32 %v2264_v52, %v2240_v10 }
 0x421   : > { %v2291_v19 = vpack.c.bf16 %v2285_v3, %v2284_v6 }
 0x422   : > { %v2260_v57 = vpop.permute.xlu1 %2259 }
 0x423   : > { %v2329_v51 = vshrl.u32 %v2291_v19, 16  ;;  %v2332_v41 = vshll.u32 %v2291_v19, 16  ;;  %v2283_v48 = vmul.f32 %v2260_v57, %v2238_v4 }
 0x425   : > { %v2331_v34 = vrot.slane %v2329_v51, 3  ;;  %v2334_v20 = vrot.slane %v2332_v41, 4  ;;  %v2290_v17 = vpack.c.bf16 %v2283_v48, %v2282_v23 }
 0x426   : > { %v2256_v61 = vpop.permute.xlu1 %2255 }
 0x427   : > { %v2320_v60 = vshrl.u32 %v2290_v17, 16  ;;  %v2323_v30 = vshll.u32 %v2290_v17, 16  ;;  %v2281_v59 = vmul.f32 %v2256_v61, %v2236_v39  ;;  %v2335_v7 = vor.u32 %v2334_v20, %v2331_v34 }
 0x429   : > { %v2322_v12 = vrot.slane %v2320_v60, 3  ;;  %v2325_v50 = vrot.slane %v2323_v30, 4  ;;  %v2289_v24 = vpack.c.bf16 %v2281_v59, %v2280_v49  ;;  %v2345_v44 = vsel %vm2310_vm8, %v2335_v7, %v2344_v33  ;;  %v4281_v33 = vld [vmem:[#allocation14 + $0x18] sm:$0xff]  }
 0x42a   : > { %2359 = vrot.lane.b32.xlu1 %v2345_v44, %s4655_s19  ;;  %v2559_v59 = vstv %s2530_s26 }
 0x42b   : > { %v2312_v38 = vshrl.u32 %v2289_v24, 16  ;;  %v2315_v58 = vshll.u32 %v2289_v24, 16  ;;  %v2326_v0 = vor.u32 %v2325_v50, %v2322_v12 }
 0x42d   : > { %v2314_v2 = vrot.slane %v2312_v38, 3  ;;  %v2317_v37 = vrot.slane %v2315_v58, 4  ;;  %v2336_v31 = vsel %vm2310_vm8, %v2326_v0, %v2335_v7 }
 0x42e   : > { %2357 = vrot.lane.b32.xlu0 %v2336_v31, %s4655_s19 }
 0x42f   : > { %v2318_v14 = vor.u32 %v2317_v37, %v2314_v2 }
 0x431   : > { %v2327_v35 = vsel %vm2310_vm8, %v2318_v14, %v2326_v0 }
 0x432   : > { %2355 = vrot.lane.b32.xlu1 %v2327_v35, %s4655_s19 }
 0x436   : > { %2690 = vrot.lane.b32.xlu1 %v6390_v8, %s4656_s27 }
 0x43a   : > { %2692 = vrot.lane.b32.xlu1 %v6384_v45, %s4656_s27 }
 0x43e   : > { %2694 = vrot.lane.b32.xlu1 %v6387_v55, %s4656_s27 }
 0x442   : > { %2696 = vrot.lane.b32.xlu1 %v6377_v25, %s4656_s27  ;;  %s602_s27 = sand.u32 1, %s4628_s21  }
 0x443   : > { %s3900_s26 = sshll.u32 %s602_s27, 6  ;;  %s7212_s13 = scalar_lea.sflag [#allocation7], %s602_s27 }
 0x444   : > { %s7177_s3 = scalar_lea.vmem [#allocation19], %s3900_s26 }
 0x445   : > { %s3711_s28 = sshll.u32 %s7177_s3, 4  ;;  %s7204_s28 = int_to_ptr.vmem [resolvable:$true] %s3711_s28 }
 0x446   : > { %s4556_s30 = scalar_lea.vmem %s7204_s28, 1024  ;;  %p4563_p7 = scmp.lt.s32.totalorder %s7204_s28, %s4561_s22 }
 0x447   : > { %p4557_p2 = scmp.ne.s32.totalorder %s7204_s28, %s4556_s30  ;;  %p4564_p8 = scmp.lt.s32.totalorder %s4562_s18, %s4556_s30 }
 0x449   : > { %p4558_p4 = pnand %p4557_p2, %p7710_p3  ;;  %p4565_p11 = por %p4564_p8, %p4563_p7 }
 0x44b   : > { %p4559_p13 = pneg %p4558_p4 }
 0x44c   : > { %2294 = vxpose.xlu0.c.b16.start [1/4] (short) (narrow) %v7605_v42, 32 }
 0x44d   : > { %p4566_p0 = pnand %p4565_p11, %p4559_p13 }
 0x450   : > { %2295 = vxpose.xlu0.c.b16.cont [2/4] (short) (narrow) %v7606_v47, 32 }
 0x454   : > { %2296 = vxpose.xlu0.c.b16.cont [3/4] (short) (narrow) %v7607_v32, 32  ;;  %v4283_v32 = vld [vmem:[#allocation16 + $0x8] sm:$0xff]  }
 0x458   : > { %2297 = vxpose.xlu0.c.b16.end [4/4] (short) (narrow) %v7608_v11, 32 }
 0x48e   : > { %v2362_v16 = vpop.permute.xlu0 %2361 }
 0x48f   : > { %4059 = vmatprep.subr.bf16.mxu0 %v2362_v16 }
 0x490   : > { %4060 = vmatpush3.bf16.msra.mxu0 %v2362_v16 }
 0x49c   : > { %v2360_v1 = vpop.permute.xlu1 %2359 }
 0x49d   : > { %4061 = vmatprep.subr.bf16.mxu0 %v2360_v1 }
 0x49e   : > { %4062 = vmatpush3.bf16.msra.mxu0 %v2360_v1 }
 0x4a0   : > { %v2358_v8 = vpop.permute.xlu0 %2357 }
 0x4a1   : > { %4063 = vmatprep.subr.bf16.mxu0 %v2358_v8 }
 0x4a2   : > { %4064 = vmatpush3.bf16.msra.mxu0 %v2358_v8 }
 0x4a4   : > { %v2356_v45 = vpop.permute.xlu1 %2355 }
 0x4a5   : > { %4065 = vmatprep.subr.bf16.mxu0 %v2356_v45 }
 0x4a6   : > { %4066 = vmatpush3.bf16.msra.mxu0 %v2356_v45 }
 0x4a8   : > { %v2691_v15 = vpop.permute.xlu1 %2690 }
 0x4ae   : > { %v2302_v25 = vpop.trf.xlu0 }
 0x4af   : > { %4067 = vmatprep.mubr.msk.bf16.mxu0 %vm2367_vm9, %v2302_v25 }
 0x4b2   : > { %v2303_v55 = vpop.trf.xlu0 }
 0x4b3   : > { %4068 = vmatmul.mubr.msk.bf16.vlgmr.msra.gmra.mxu0 %vm2367_vm9, %v2303_v55 }
 0x4b4   : > { %4075 = vmatprep.mubr.msk.bf16.mxu0 %vm623_vm0, %v4278_v27 }
 0x573   : > { %v4069_v21 = vpop.f32.mrf.mxu0 }
 0x575   : > { %v2408_v62 = vpop.f32.mrf.mxu0 }
 0x577   : > { %v4070_v28 = vpop.f32.mrf.mxu0 }
 0x578   : > { %v2432_v54 = vpack.c.bf16 %v4070_v28, %v4069_v21  ;;  %v2693_v21 = vpop.permute.xlu1 %2692 }
 0x579   : > { %v2411_v40 = vpop.f32.mrf.mxu0 }
 0x57a   : > { %v2431_v26 = vpack.c.bf16 %v2411_v40, %v2408_v62  ;;  %4071 = vmatprep.subr.bf16.mxu0 %v2432_v54  ;;  %v4285_v40 = vld [vmem:[%s7262_s10] sm:$0xff]  }
 0x57b   : > { %4072 = vmatpush3.bf16.msra.mxu0 %v2432_v54  ;;  %v4284_v54 = vld [vmem:[%s7262_s10 + $0x8] sm:$0xff]  }
 0x57c   : > { %4073 = vmatprep.subr.bf16.mxu0 %v2431_v26  ;;  %v2695_v62 = vpop.permute.xlu1 %2694 }
 0x57f   : > { %4074 = vmatpush3.bf16.msra.mxu0 %v2431_v26  ;;  %v6483_v26 = vld [vmem:[#allocation17 + $0x38] sm:$0xff]  }
 0x580   : > { %v2697_v28 = vpop.permute.xlu1 %2696  ;;  %7609 = vst [vmem:[#allocation36_spill] sm:$0xff] %v6483_v26 }
 0x582   : > { %4076 = vmatmul.mubr.msk.bf16.vlgmr.msra.gmra.mxu0 %vm623_vm0, %v4279_v18  ;;  %v6489_v18 = vld [vmem:[%s7258_s6 + $0x1] ss:$0 sm:$0xff] }
 0x583   : > { %4079 = vmatprep.mubr.msk.bf16.mxu0 %vm623_vm0, %v4280_v63  ;;  %v2822_v63 = vld [vmem:[#allocation2] sm:$0xff] }
 0x58a   : > { %4080 = vmatmul.mubr.msk.bf16.gmra.mxu0 %vm623_vm0, %v4281_v33  ;;  %v7610_v33 = vld [vmem:[#allocation35_spill] sm:$0xff] }
 0x58b   : > { %4095 = vmatprep.mubr.msk.bf16.mxu0 %vm2698_vm10, %v2691_v15  ;;  %v2784_v15 = vsub.s32 1, %v7610_v33 }
 0x642   : > { %v4077_v10 = vpop.f32.mrf.mxu0 }
 0x644   : > { %v2499_v53 = vpop.f32.mrf.mxu0 }
 0x646   : > { %v4078_v52 = vpop.f32.mrf.mxu0 }
 0x648   : > { %v2502_v6 = vpop.f32.mrf.mxu0 }
 0x64a   : > { %v4081_v3 = vpop.f32.mrf.mxu0 }
 0x64b   : > { %v3950_v19 = vmul.f32 -1.442695, %v4081_v3 }
 0x64c   : > { %v2515_v22 = vpop.f32.mrf.mxu0 }
 0x64d   : > { %4330 = vpow2.f32 %v3950_v19  ;;  %v3948_v4 = vmul.f32 -1.442695, %v2515_v22 }
 0x64e   : > { %v4082_v57 = vpop.f32.mrf.mxu0 }
 0x64f   : > { %4332 = vpow2.f32 %v3948_v4  ;;  %v3951_v51 = vmul.f32 -1.442695, %v4082_v57 }
 0x650   : > { %v2518_v41 = vpop.f32.mrf.mxu0 }
 0x651   : > { %4334 = vpow2.f32 %v3951_v51  ;;  %v3949_v23 = vmul.f32 -1.442695, %v2518_v41 }
 0x653   : > { %4336 = vpow2.f32 %v3949_v23 }
 0x65a   : > { %v4331_v48 = vpop.eup %4330 }
 0x65b   : > { %v2545_v29 = vadd.f32 1.0, %v4331_v48 }
 0x65c   : > { %v4333_v13 = vpop.eup %4332 }
 0x65d   : > { %4338 = vrcp.f32 %v2545_v29  ;;  %v2543_v34 = vadd.f32 1.0, %v4333_v13  ;;  %v7615_v13 = vld [vmem:[#allocation50_spill] sm:$0xff] }
 0x65e   : > { %v4335_v20 = vpop.eup %4334 }
 0x65f   : > { %4340 = vrcp.f32 %v2543_v34  ;;  %v2546_v17 = vadd.f32 1.0, %v4335_v20 }
 0x660   : > { %v4337_v39 = vpop.eup %4336 }
 0x661   : > { %4342 = vrcp.f32 %v2546_v17  ;;  %v2544_v49 = vadd.f32 1.0, %v4337_v39  ;;  %v2832_v17 = vld [vmem:[#allocation2 + $0x50] sm:$0xff] }
 0x663   : > { %4344 = vrcp.f32 %v2544_v49 }
 0x66a   : > { %v4339_v61 = vpop.eup %4338 }
 0x66b   : > { %v2557_v60 = vmul.f32 %v4339_v61, %v4081_v3  ;;  %v6501_v3 = vld [vmem:[#allocation5] sm:$0xff] }
 0x66c   : > { %v4341_v30 = vpop.eup %4340  ;;  %7612 = vst [vmem:[#allocation53_spill] sm:$0xff] %v6501_v3  ;;  %v6504_v19 = vrot.slane %v6501_v3, %v2784_v15 }
 0x66d   : > { %v2555_v7 = vmul.f32 %v4341_v30, %v2515_v22  ;;  %v2562_v50 = vadd.f32 %v2559_v59, %v2557_v60  ;;  %v7613_v22 = vld [vmem:[#allocation45_spill] sm:$0xff]  ;;  %v7616_v60 = vld [vmem:[#allocation48_spill] sm:$0xff] }
 0x66e   : > { %v4343_v12 = vpop.eup %4342  ;;  %v2925_v4 = vmul.f32 %v4346_v46, %v7613_v22 }
 0x66f   : > { %v2558_v24 = vmul.f32 %v4343_v12, %v4082_v57  ;;  %v2560_v38 = vadd.f32 %v2559_v59, %v2555_v7  ;;  %v2566_v37 = vmul.f32 %v4077_v10, %v2562_v50  ;;  %v6493_v10 = vmul.f32 %v4346_v46, %v6489_v18  ;;  %v7614_v57 = vld [vmem:[#allocation37_spill] sm:$0xff]  ;;  %v7617_v50 = vld [vmem:[#allocation39_spill] sm:$0xff] }
 0x670   : > { %v4345_v44 = vpop.eup %4344  ;;  %v6508_v51 = vrot.slane %v7614_v57, %v2784_v15 }
 0x671   : > { %v2563_v58 = vadd.f32 %v2559_v59, %v2558_v24  ;;  %v2556_v0 = vmul.f32 %v4345_v44, %v2518_v41  ;;  %v2564_v14 = vmul.f32 %v2560_v38, %v2499_v53  ;;  %v7611_v53 = vld [vmem:[#allocation60_spill] sm:$0xff]  ;;  %v6513_v41 = vld [vmem:[%s7258_s6 + $0x2] ss:$0 sm:$0xff]  ;;  %v7380_v23 = vrot.slane %v6493_v10, 1  ;;  %v7618_v38 = vld [vmem:[#allocation49_spill] sm:$0xff] }
 0x672   : > { %v2788_v34 = vmul.f32 %v6508_v51, %v7615_v13  ;;  %v6521_v49 = vmul.f32 %v6513_v41, %v2925_v4  ;;  %v2786_v30 = vmul.f32 %v6508_v51, %v7616_v60  ;;  %v3095_v24 = vmul.f32 %v2832_v17, %v7617_v50  ;;  %v7626_v4 = vld [vmem:[#allocation47_spill] sm:$0xff] }
 0x673   : > { %v2561_v2 = vadd.f32 %v2559_v59, %v2556_v0  ;;  %v2567_v31 = vmul.f32 %v4078_v52, %v2563_v58  ;;  %v2834_v52 = vmul.f32 %v2822_v63, %v7611_v53  ;;  %v2789_v58 = vmul.f32 %v6508_v51, %v7618_v38 }
 0x675   : > { %v2565_v35 = vmul.f32 %v2561_v2, %v2502_v6  ;;  %v2573_v42 = vpack.c.bf16 %v2567_v31, %v2566_v37  ;;  %v6499_v6 = vld [vmem:[%s7258_s6] ss:$0 sm:$0xff]  ;;  %v6538_v2 = vld [vmem:[%s7258_s6 + $0x5] ss:$0 sm:$0xff]  ;;  %v2833_v37 = vld [vmem:[#allocation2 + $0x58] sm:$0xff] }
 0x676   : > { %v2850_v29 = vmul.f32 %v6499_v6, %v2834_v52  ;;  %7619 = vst [vmem:[#allocation56_spill] sm:$0xff] %v6538_v2  ;;  %v7620_v31 = vld [vmem:[#allocation63_spill] sm:$0xff]  ;;  %v3257_v63 = vmul.f32 %v2833_v37, %v7617_v50  ;;  %v3333_v52 = vsub.s32 7, %v7610_v33  ;;  %v6611_v37 = vld [vmem:[%s7258_s6 + $0x7] ss:$0 sm:$0xff] }
 0x677   : > { %4083 = vmatprep.subr.bf16.mxu1 %v2573_v42  ;;  %v2572_v47 = vpack.c.bf16 %v2565_v35, %v2564_v14  ;;  %v2835_v14 = vmul.f32 %v4346_v46, %v7620_v31  ;;  %v2995_v35 = vmul.f32 %v4346_v46, %v7611_v53  ;;  %v6576_v46 = vld [vmem:[%s7258_s6 + $0x8] ss:$0 sm:$0xff] }
 0x678   : > { %4084 = vmatpush3.bf16.msra.mxu1 %v2573_v42  ;;  %v2916_v12 = vadd.f32 %v7380_v23, %v2850_v29  ;;  %v3321_v42 = vsub.s32 2, %v7610_v33 }
 0x679   : > { %4085 = vmatprep.subr.bf16.mxu1 %v2572_v47  ;;  %v2851_v13 = vmul.f32 %v6499_v6, %v2835_v14 }
 0x67c   : > { %4086 = vmatpush3.bf16.msra.mxu1 %v2572_v47 }
 0x67d   : > { %4103 = vmatprep.subr.bf16.mxu1 %v4284_v54 }
 0x67f   : > { %4088 = vmatmul.mubr.msk.bf16.vlgmr.msra.gmra.mxu1 %vm623_vm0, %v4283_v32  ;;  %v7379_v32 = vrot.slane %v6521_v49, 2 }
 0x680   : > { %4104 = vmatpush3.bf16.msra.mxu1 %v4284_v54  ;;  %v7625_v54 = vld [vmem:[#allocation46_spill] sm:$0xff] }
 0x681   : > { %4105 = vmatprep.subr.bf16.mxu1 %v4285_v40 }
 0x684   : > { %4106 = vmatpush3.bf16.msra.mxu1 %v4285_v40  ;;  %v3256_v40 = vmul.f32 %v2832_v17, %v7625_v54 }
 0x685   : > { %4115 = vmatprep.subr.bf16.mxu1 %v6483_v26 }
 0x73f   : > { %v4089_v11 = vpop.f32.mrf.mxu1 }
 0x740   : > { %3690 = vst.msk [vmem:[%s621_s17 + $0x10] sm:$0xff] %vm2698_vm10, %v4089_v11 }
 0x741   : > { %v2624_v16 = vpop.f32.mrf.mxu1 }
 0x742   : > { %3688 = vst.msk [vmem:[%s621_s17] sm:$0xff] %vm2698_vm10, %v2624_v16 }
 0x743   : > { %v4090_v1 = vpop.f32.mrf.mxu1 }
 0x744   : > { %v2645_v8 = vpack.c.bf16 %v4090_v1, %v4089_v11  ;;  %3691 = vst.msk [vmem:[%s621_s17 + $0x18] sm:$0xff] %vm2698_vm10, %v4090_v1 }
 0x745   : > { %v2627_v45 = vpop.f32.mrf.mxu1 }
 0x746   : > { %v2644_v25 = vpack.c.bf16 %v2627_v45, %v2624_v16  ;;  %3689 = vst.msk [vmem:[%s621_s17 + $0x8] sm:$0xff] %vm2698_vm10, %v2627_v45  ;;  %4139 = vmatprep.subr.msk.bf16.mxu0 %vm2698_vm10, %v2645_v8  ;;  %v2715_v55 = vsel %vm2698_vm10, %v2645_v8, 0  ;;  %v7622_v16 = vld [vmem:[#allocation72_spill] sm:$0xff]  ;;  %v6554_v45 = vld [vmem:[%s7258_s6 + $0x3] ss:$0 sm:$0xff] }
 0x747   : > { %4092 = vmatpush3.bf16.xpose.msra.mxu0 %v2715_v55  ;;  %v2787_v1 = vmul.f32 %v6508_v51, %v7622_v16  ;;  %v6620_v16 = vmul.f32 %v6576_v46, %v3257_v63 }
 0x748   : > { %4140 = vmatprep.subr.msk.bf16.mxu0 %vm2698_vm10, %v2644_v25  ;;  %v2712_v27 = vsel %vm2698_vm10, %v2644_v25, 0  ;;  %v7623_v25 = vld [vmem:[#allocation42_spill] sm:$0xff] }
 0x749   : > { %v3165_v55 = vmul.f32 %v2832_v17, %v7623_v25  ;;  %7632 = vst [vmem:[#allocation61_spill] sm:$0xff] %v6620_v16 }
 0x74f   : > { %4094 = vmatpush3.bf16.xpose.msra.mxu0 %v2712_v27  ;;  %v6560_v27 = vld [vmem:[%s7258_s6 + $0x6] ss:$0 sm:$0xff] }
 0x756   : > { %4096 = vmatmul.mubr.msk.bf16.vlgmr.msra.gmra.mxu0 %vm2698_vm10, %v2693_v21 }
 0x757   : > { %4099 = vmatprep.mubr.msk.bf16.mxu0 %vm2698_vm10, %v2695_v62  ;;  %v2986_v62 = vadd.f32 %v7379_v32, %v2916_v12 }
 0x75e   : > { %4100 = vmatmul.mubr.msk.bf16.gmra.mxu0 %vm2698_vm10, %v2697_v28  ;;  %v6565_v28 = vmul.f32 %v6538_v2, %v3095_v24  ;;  %v7629_v24 = vld [vmem:[#allocation55_spill] sm:$0xff] }
 0x75f   : > { %v6601_v38 = vmul.f32 %v6508_v51, %v7629_v24 }
 0x760   : > { %7624 = vst [vmem:[#allocation44_spill] sm:$0xff] %v6565_v28 }
 0x816   : > { %v4097_v48 = vpop.f32.mrf.mxu0 }
 0x817   : > { %v2800_v20 = vmul.f32 %v4097_v48, %v6504_v19  ;;  %v2792_v48 = vmul.f32 %v6508_v51, %v7626_v4 }
 0x818   : > { %v2751_v39 = vpop.f32.mrf.mxu0 }
 0x819   : > { %v2808_v61 = vadd.f32 %v2800_v20, %v2788_v34  ;;  %v2798_v59 = vmul.f32 %v6504_v19, %v2751_v39  ;;  %v6584_v34 = vrot.slane %v7614_v57, %v3321_v42  ;;  %v7627_v39 = vld [vmem:[#allocation40_spill] sm:$0xff] }
 0x81a   : > { %v4098_v7 = vpop.f32.mrf.mxu0  ;;  %v2790_v60 = vmul.f32 %v6508_v51, %v7627_v39 }
 0x81b   : > { %2816 = vst.msk [vmem:[#allocation2 + $0x20] sm:$0xff] %vm623_vm0, %v2808_v61  ;;  %v6530_v44 = vadd.f32 %v2798_v59, %v2786_v30  ;;  %v2801_v0 = vmul.f32 %v4098_v7, %v6504_v19  ;;  %v3012_v30 = vmul.f32 %v6554_v45, %v2995_v35  ;;  %v6594_v59 = vld [vmem:[%s7258_s6 + $0x4] ss:$0 sm:$0xff] }
 0x81c   : > { %v2754_v47 = vpop.f32.mrf.mxu0 }
 0x81d   : > { %2814 = vst.msk [vmem:[#allocation2 + $0x10] sm:$0xff] %vm623_vm0, %v6530_v44  ;;  %v6546_v11 = vadd.f32 %v2801_v0, %v2789_v58  ;;  %v2799_v8 = vmul.f32 %v6504_v19, %v2754_v47  ;;  %v6604_v58 = vmul.f32 %v6560_v27, %v3165_v55  ;;  %v6613_v14 = vadd.f32 %v3012_v30, %v2986_v62  ;;  %v7633_v55 = vld [vmem:[#allocation41_spill] sm:$0xff] }
 0x81e   : > { %v4101_v21 = vpop.f32.mrf.mxu0  ;;  %v6617_v47 = vmul.f32 %v6576_v46, %v3256_v40  ;;  %v6635_v62 = vmul.f32 %v6611_v37, %v2832_v17  ;;  %v6638_v40 = vmul.f32 %v6584_v34, %v2808_v61  ;;  %v7640_v61 = vld [vmem:[#allocation58_spill] sm:$0xff] }
 0x81f   : > { %7621 = vst [vmem:[#allocation66_spill] sm:$0xff] %v6546_v11  ;;  %2817 = vst.msk [vmem:[#allocation2 + $0x28] sm:$0xff] %vm623_vm0, %v6546_v11  ;;  %v6571_v15 = vadd.f32 %v2799_v8, %v2787_v1  ;;  %v2804_v29 = vmul.f32 %v4101_v21, %v6504_v19  ;;  %v6623_v1 = vrot.slane %v6501_v3, %v3321_v42 }
 0x820   : > { %v2767_v20 = vpop.f32.mrf.mxu0  ;;  %7630 = vst [vmem:[#allocation65_spill] sm:$0xff] %v6604_v58  ;;  %7631 = vst [vmem:[#allocation32_spill] sm:$0xff] %v6617_v47  ;;  %v6626_v8 = vrot.slane %v6501_v3, %v3333_v52  ;;  %v6632_v21 = vmul.f32 %v6508_v51, %v7633_v55  ;;  %v7637_v52 = vld [vmem:[#allocation59_spill] sm:$0xff]  ;;  %v7639_v51 = vld [vmem:[#allocation64_spill] sm:$0xff] }
 0x821   : > { %2815 = vst.msk [vmem:[#allocation2 + $0x18] sm:$0xff] %vm623_vm0, %v6571_v15  ;;  %v6596_v7 = vadd.f32 %v2804_v29, %v2792_v48  ;;  %v2802_v12 = vmul.f32 %v6504_v19, %v2767_v20  ;;  %7634 = vst [vmem:[#allocation38_spill] sm:$0xff] %v6635_v62 }
 0x822   : > { %v6606_v0 = vld [vmem:[#allocation2 + $0x20] sm:$0xff]  ;;  %7635 = vst [vmem:[#allocation43_spill] sm:$0xff] %v6638_v40  ;;  %v4102_v29 = vpop.f32.mrf.mxu0 }
 0x823   : > { %7628 = vst [vmem:[#allocation68_spill] sm:$0xff] %v6596_v7  ;;  %2820 = vst.msk [vmem:[#allocation2 + $0x40] sm:$0xff] %vm623_vm0, %v6596_v7  ;;  %v6644_v42 = vmul.f32 %v6594_v59, %v6606_v0  ;;  %v3089_v4 = vmul.f32 %v6606_v0, %v7637_v52  ;;  %v6648_v48 = vadd.f32 %v2802_v12, %v2790_v60 }
 0x824   : > { %v6640_v63 = vld [vmem:[#allocation2 + $0x10] sm:$0xff]  ;;  %v6662_v60 = vmul.f32 %v6606_v0, %v7639_v51  ;;  %v6666_v12 = vmul.f32 %v6611_v37, %v6606_v0  ;;  %v3250_v55 = vmul.f32 %v6606_v0, %v7640_v61  ;;  %v2805_v57 = vmul.f32 %v4102_v29, %v6504_v19 }
 0x825   : > { %7636 = vst [vmem:[#allocation33_spill] sm:$0xff] %v6644_v42  ;;  %7638 = vst [vmem:[#allocation34_spill] sm:$0xff] %v6648_v48  ;;  %v2836_v20 = vmul.f32 %v6640_v63, %v7639_v51  ;;  %v2877_v17 = vmul.f32 %v6489_v18, %v6640_v63  ;;  %v2926_v39 = vmul.f32 %v6640_v63, %v7640_v61 }
 0x826   : > { %v2996_v30 = vmul.f32 %v6640_v63, %v7620_v31  ;;  %v3087_v24 = vmul.f32 %v6640_v63, %v7613_v22  ;;  %2818 = vst.msk [vmem:[#allocation2 + $0x30] sm:$0xff] %vm623_vm0, %v6648_v48  ;;  %v6675_v23 = vmul.f32 %v6594_v59, %v6640_v63  ;;  %v6684_v58 = vmul.f32 %v6538_v2, %v3089_v4 }
 0x827   : > { %v2893_v35 = vrot.slane %v2877_v17, 1  ;;  %v2943_v32 = vmul.f32 %v6513_v41, %v2926_v39  ;;  %v2852_v33 = vmul.f32 %v6499_v6, %v2836_v20  ;;  %v7642_v39 = vrot.slane %v6493_v10, 1 }
 0x828   : > { %v6678_v3 = vld [vmem:[#allocation2 + $0x18] sm:$0xff]  ;;  %v3013_v7 = vmul.f32 %v6554_v45, %v2996_v30  ;;  %7641 = vst [vmem:[#allocation51_spill] sm:$0xff] %v6684_v58  ;;  %v6700_v26 = vmul.f32 %v6538_v2, %v3087_v24 }
 0x829   : > { %v6688_v17 = vmul.f32 %v6489_v18, %v6678_v3  ;;  %v2894_v16 = vsel %vm728_vm2, %v7642_v39, %v2893_v35  ;;  %v2927_v29 = vmul.f32 %v6678_v3, %v7637_v52  ;;  %v2961_v47 = vrot.slane %v2943_v32, 2 }
 0x82a   : > { %v2917_v20 = vadd.f32 %v2894_v16, %v2851_v13  ;;  %v3039_v30 = vmul.f32 %v6594_v59, %v6678_v3  ;;  %v3088_v4 = vmul.f32 %v6678_v3, %v7640_v61  ;;  %v7644_v39 = vrot.slane %v6521_v49, 2  ;;  %v6710_v13 = vld [vmem:[#allocation2 + $0x28] sm:$0xff] }
 0x82b   : > { %v7388_v62 = vrot.slane %v6688_v17, 1  ;;  %v6704_v10 = vmul.f32 %v6513_v41, %v2927_v29  ;;  %v7391_v32 = vrot.slane %v6675_v23, 1  ;;  %v2997_v61 = vmul.f32 %v6678_v3, %v7639_v51 }
 0x82c   : > { %v2962_v28 = vsel %vm936_vm4, %v7644_v39, %v2961_v47  ;;  %v3055_v40 = vrot.slane %v3039_v30, 1  ;;  %v3105_v24 = vmul.f32 %v6538_v2, %v3088_v4  ;;  %v3158_v49 = vmul.f32 %v6678_v3, %v7620_v31 }
 0x82d   : > { %7643 = vst [vmem:[#allocation62_spill] sm:$0xff] %v6704_v10  ;;  %v2987_v16 = vadd.f32 %v2962_v28, %v2917_v20  ;;  %v2896_v29 = vsel %vm728_vm2, %v2893_v35, %v7388_v62  ;;  %v7390_v48 = vrot.slane %v6704_v10, 2  ;;  %v6723_v39 = vmul.f32 %v6611_v37, %v6678_v3 }
 0x82e   : > { %v2918_v28 = vadd.f32 %v2896_v29, %v2852_v33  ;;  %v7392_v51 = vrot.slane %v6700_v26, 2  ;;  %v3056_v35 = vsel %vm728_vm2, %v7391_v32, %v3055_v40  ;;  %v3123_v62 = vrot.slane %v3105_v24, 2 }
 0x82f   : > { %v3022_v20 = vadd.f32 %v3013_v7, %v2987_v16  ;;  %v2964_v4 = vsel %vm936_vm4, %v2961_v47, %v7390_v48  ;;  %v6735_v31 = vmul.f32 %v6611_v37, %v6710_v13  ;;  %v3014_v33 = vmul.f32 %v6554_v45, %v2997_v61 }
 0x830   : > { %v2988_v11 = vadd.f32 %v2964_v4, %v2918_v28  ;;  %v7646_v7 = vrot.slane %v6644_v42, 1  ;;  %v3124_v47 = vsel %vm936_vm4, %v7392_v51, %v3123_v62  ;;  %v3175_v48 = vmul.f32 %v6560_v27, %v3158_v49 }
 0x831   : > { %7645 = vst [vmem:[#allocation54_spill] sm:$0xff] %v6735_v31  ;;  %v3079_v29 = vadd.f32 %v3056_v35, %v3022_v20  ;;  %v7396_v24 = vrot.slane %v6723_v39, 1  ;;  %v3249_v32 = vmul.f32 %v6678_v3, %v7613_v22  ;;  %v3217_v61 = vrot.slane %v6666_v12, 1 }
 0x832   : > { %v3058_v16 = vsel %vm728_vm2, %v3055_v40, %v7646_v7  ;;  %v3023_v30 = vadd.f32 %v3014_v33, %v2988_v11  ;;  %v3251_v4 = vmul.f32 %v6710_v13, %v7637_v52  ;;  %v2770_v40 = vpop.f32.mrf.mxu0  ;;  %v7647_v20 = vrot.slane %v6684_v58, 2 }
 0x833   : > { %v3149_v28 = vadd.f32 %v3124_v47, %v3079_v29  ;;  %v7394_v7 = vrot.slane %v6735_v31, 1  ;;  %v6756_v49 = vmul.f32 %v6576_v46, %v3249_v32  ;;  %v3267_v51 = vmul.f32 %v6576_v46, %v3250_v55  ;;  %v6769_v47 = vld [vmem:[#allocation2 + $0x30] sm:$0xff] }
 0x834   : > { %v3126_v35 = vsel %vm936_vm4, %v3123_v62, %v7647_v20  ;;  %v3080_v22 = vadd.f32 %v3058_v16, %v3023_v30  ;;  %v6760_v33 = vmul.f32 %v6576_v46, %v3251_v4  ;;  %v6763_v12 = vadd.f32 %v2805_v57, %v6632_v21  ;;  %7650 = vst [vmem:[#allocation45_spill] sm:$0xff] %v6769_v47  ;;  %v7652_v4 = vld [vmem:[#allocation71_spill] sm:$0xff] }
 0x835   : > { %v3184_v11 = vadd.f32 %v3175_v48, %v3149_v28  ;;  %v3218_v52 = vsel %vm728_vm2, %v7396_v24, %v3217_v61  ;;  %v7395_v62 = vrot.slane %v6756_v49, 2  ;;  %v3285_v29 = vrot.slane %v3267_v51, 2 }
 0x836   : > { %7648 = vst [vmem:[#allocation57_spill] sm:$0xff] %v6760_v33  ;;  %7649 = vst [vmem:[#allocation60_spill] sm:$0xff] %v6763_v12  ;;  %v2803_v32 = vmul.f32 %v6504_v19, %v2770_v40  ;;  %v3150_v55 = vadd.f32 %v3126_v35, %v3080_v22  ;;  %v3176_v48 = vmul.f32 %v6560_v27, %v6662_v60  ;;  %v7393_v16 = vrot.slane %v6760_v33, 2 }
 0x837   : > { %v3241_v30 = vadd.f32 %v3218_v52, %v3184_v11  ;;  %2821 = vst.msk [vmem:[#allocation2 + $0x48] sm:$0xff] %vm623_vm0, %v6763_v12  ;;  %v3220_v57 = vsel %vm728_vm2, %v3217_v61, %v7394_v7  ;;  %v3286_v21 = vsel %vm936_vm4, %v7395_v62, %v3285_v29  ;;  %v2839_v60 = vmul.f32 %v6710_v13, %v5416_v56  ;;  %v7653_v11 = vld [vmem:[#allocation69_spill] sm:$0xff] }
 0x838   : > { %v6784_v19 = vadd.f32 %v2803_v32, %v6601_v38  ;;  %v3185_v51 = vadd.f32 %v3176_v48, %v3150_v55  ;;  %v2840_v40 = vmul.f32 %v6769_v47, %v7652_v4  ;;  %v6792_v20 = vmul.f32 %v6489_v18, %v6710_v13  ;;  %v6799_v38 = vld [vmem:[#allocation2 + $0x40] sm:$0xff] }
 0x839   : > { %v3311_v28 = vadd.f32 %v3286_v21, %v3241_v30  ;;  %v3288_v61 = vsel %vm936_vm4, %v3285_v29, %v7393_v16  ;;  %v2881_v35 = vmul.f32 %v6489_v18, %v6769_v47  ;;  %v2929_v22 = vmul.f32 %v6710_v13, %v7581_v36 }
 0x83a   : > { %7651 = vst [vmem:[#allocation50_spill] sm:$0xff] %v6784_v19  ;;  %2819 = vst.msk [vmem:[#allocation2 + $0x38] sm:$0xff] %vm623_vm0, %v6784_v19  ;;  %v2930_v52 = vmul.f32 %v6769_v47, %v7653_v11  ;;  %v3242_v32 = vadd.f32 %v3220_v57, %v3185_v51  ;;  %v7399_v48 = vrot.slane %v6792_v20, 1  ;;  %v3000_v29 = vmul.f32 %v6769_v47, %v5416_v56 }
 0x83b   : > { %v3336_v55 = vadd.f32 %v6626_v8, %v3311_v28  ;;  %v2901_v30 = vrot.slane %v2881_v35, 1  ;;  %v6812_v21 = vmul.f32 %v6513_v41, %v2929_v22  ;;  %v6817_v7 = vmul.f32 %v6594_v59, %v6769_v47 }
 0x83c   : > { %v2947_v16 = vmul.f32 %v6513_v41, %v2930_v52  ;;  %v3312_v62 = vadd.f32 %v3288_v61, %v3242_v32  ;;  %v2855_v51 = vmul.f32 %v6499_v6, %v2839_v60  ;;  %v6825_v28 = vmul.f32 %v6594_v59, %v6799_v38 }
 0x83d   : > { %7654 = vst [vmem:[#allocation48_spill] sm:$0xff] %v6812_v21  ;;  %v6820_v57 = vmul.f32 %v6623_v1, %v3336_v55  ;;  %v6829_v35 = vmul.f32 %v6584_v34, %v6571_v15  ;;  %v2902_v22 = vsel %vm728_vm2, %v7399_v48, %v2901_v30  ;;  %v7400_v52 = vrot.slane %v6812_v21, 2 }
 0x83e   : > { %v2969_v61 = vrot.slane %v2947_v16, 2  ;;  %v3337_v32 = vadd.f32 %v6626_v8, %v3312_v62  ;;  %v2856_v55 = vmul.f32 %v6499_v6, %v2840_v40  ;;  %v2921_v60 = vadd.f32 %v2902_v22, %v2855_v51  ;;  %v6853_v12 = vld [vmem:[#allocation2 + $0x48] sm:$0xff] }
 0x83f   : > { %v3017_v24 = vmul.f32 %v6554_v45, %v3000_v29  ;;  %v3091_v48 = vmul.f32 %v6769_v47, %v7581_v36  ;;  %v7655_v29 = vld [vmem:[#allocation70_spill] sm:$0xff]  ;;  %v3163_v50 = vmul.f32 %v6799_v38, %v7652_v4  ;;  %v7659_v10 = vrot.slane %v6820_v57, 7 }
 0x840   : > { %v2970_v15 = vsel %vm936_vm4, %v7400_v52, %v2969_v61  ;;  %v6846_v16 = vmul.f32 %v6623_v1, %v3337_v32  ;;  %v3093_v22 = vmul.f32 %v6799_v38, %v7655_v29 }
 0x841   : > { %v6848_v62 = vld [vmem:[#allocation2 + $0x38] sm:$0xff]  ;;  %v2991_v40 = vadd.f32 %v2970_v15, %v2921_v60  ;;  %v6868_v33 = vmul.f32 %v6538_v2, %v3091_v48  ;;  %v3205_v48 = vmul.f32 %v6611_v37, %v6799_v38 }
 0x842   : > { %v6857_v52 = vmul.f32 %v6489_v18, %v6848_v62  ;;  %v2931_v19 = vmul.f32 %v6848_v62, %v7655_v29  ;;  %v3001_v32 = vmul.f32 %v6848_v62, %v7652_v4  ;;  %v3043_v60 = vmul.f32 %v6594_v59, %v6848_v62 }
 0x843   : > { %v3026_v15 = vadd.f32 %v3017_v24, %v2991_v40  ;;  %v3092_v51 = vmul.f32 %v6848_v62, %v7653_v11  ;;  %v6879_v24 = vmul.f32 %v6538_v2, %v3093_v22  ;;  %v6885_v40 = vmul.f32 %v6611_v37, %v6853_v12 }
 0x844   : > { %7656 = vst [vmem:[#allocation49_spill] sm:$0xff] %v6857_v52  ;;  %v7414_v25 = vrot.slane %v6857_v52, 1  ;;  %v6875_v31 = vmul.f32 %v6513_v41, %v2931_v19  ;;  %v3063_v43 = vrot.slane %v3043_v60, 1  ;;  %v3018_v60 = vmul.f32 %v6554_v45, %v3001_v32 }
 0x845   : > { %v3109_v58 = vmul.f32 %v6538_v2, %v3092_v51  ;;  %v7657_v51 = vrot.slane %v6817_v7, 1  ;;  %v3129_v47 = vrot.slane %v6868_v33, 2  ;;  %v7658_v21 = vrot.slane %v6846_v16, 7 }
 0x846   : > { %v2904_v4 = vsel %vm728_vm2, %v2901_v30, %v7414_v25  ;;  %v7415_v19 = vrot.slane %v6875_v31, 2  ;;  %v7660_v32 = vrot.slane %v6825_v28, 1 }
 0x847   : > { %v3064_v22 = vsel %vm728_vm2, %v7657_v51, %v3063_v43  ;;  %v2922_v54 = vadd.f32 %v2904_v4, %v2856_v55  ;;  %v3131_v2 = vrot.slane %v3109_v58, 2  ;;  %v3370_v52 = vsel %vm876_vm3, %v7659_v10, %v7658_v21 }
 0x848   : > { %v3083_v42 = vadd.f32 %v3064_v22, %v3026_v15  ;;  %v2972_v30 = vsel %vm936_vm4, %v2969_v61, %v7415_v19  ;;  %v3066_v25 = vsel %vm728_vm2, %v3063_v43, %v7660_v32  ;;  %v3162_v55 = vmul.f32 %v6848_v62, %v5416_v56 }
 0x849   : > { %v2992_v15 = vadd.f32 %v2972_v30, %v2922_v54  ;;  %v3132_v58 = vsel %vm936_vm4, %v3129_v47, %v3131_v2  ;;  %v3133_v4 = vrot.slane %v6879_v24, 2  ;;  %v6915_v10 = vmul.f32 %v6611_v37, %v6848_v62  ;;  %v7700_v24 = vld [vmem:[#allocation32_spill] sm:$0xff] }
 0x84a   : > { %v3153_v21 = vadd.f32 %v3132_v58, %v3083_v42  ;;  %v3179_v61 = vmul.f32 %v6560_v27, %v3162_v55  ;;  %v3180_v51 = vmul.f32 %v6560_v27, %v3163_v50  ;;  %v3225_v43 = vrot.slane %v3205_v48, 1 }
 0x84b   : > { %v3027_v22 = vadd.f32 %v3018_v60, %v2992_v15  ;;  %v3223_v56 = vrot.slane %v6915_v10, 1  ;;  %v3253_v54 = vmul.f32 %v6848_v62, %v7581_v36  ;;  %v3254_v30 = vmul.f32 %v6799_v38, %v7653_v11 }
 0x84c   : > { %v3134_v32 = vsel %vm936_vm4, %v3131_v2, %v3133_v4  ;;  %v3188_v19 = vadd.f32 %v3179_v61, %v3153_v21  ;;  %v7416_v42 = vrot.slane %v6885_v40, 1  ;;  %v3255_v50 = vmul.f32 %v6853_v12, %v7655_v29 }
 0x84d   : > { %v3084_v48 = vadd.f32 %v3066_v25, %v3027_v22  ;;  %v3226_v60 = vsel %vm728_vm2, %v3223_v56, %v3225_v43  ;;  %v6934_v36 = vmul.f32 %v6576_v46, %v3253_v54  ;;  %v3271_v11 = vmul.f32 %v6576_v46, %v3254_v30  ;;  %v7662_v22 = vld [vmem:[#allocation67_spill] sm:$0xff] }
 0x84e   : > { %v3245_v55 = vadd.f32 %v3226_v60, %v3188_v19  ;;  %v6938_v15 = vmul.f32 %v6576_v46, %v3255_v50  ;;  %v7661_v2 = vrot.slane %v6675_v23, 1  ;;  %v3157_v25 = vmul.f32 %v6640_v63, %v7611_v53 }
 0x84f   : > { %v3154_v29 = vadd.f32 %v3134_v32, %v3084_v48  ;;  %v3291_v21 = vrot.slane %v6934_v36, 2  ;;  %v3293_v61 = vrot.slane %v3271_v11, 2  ;;  %v2837_v54 = vmul.f32 %v6678_v3, %v7662_v22 }
 0x850   : > { %v3078_v58 = vadd.f32 %v7661_v2, %v6613_v14  ;;  %v3295_v30 = vrot.slane %v6938_v15, 2  ;;  %v7663_v19 = vrot.slane %v6700_v26, 2  ;;  %v3174_v60 = vmul.f32 %v6560_v27, %v3157_v25 }
 0x851   : > { %v2838_v23 = vmul.f32 %v6606_v0, %v7583_v9  ;;  %v3189_v14 = vadd.f32 %v3180_v51, %v3154_v29  ;;  %v3228_v53 = vsel %vm728_vm2, %v3225_v43, %v7416_v42  ;;  %v3294_v63 = vsel %vm936_vm4, %v3291_v21, %v3293_v61 }
 0x852   : > { %v3148_v50 = vadd.f32 %v7663_v19, %v3078_v58  ;;  %v2879_v3 = vmul.f32 %v6489_v18, %v6606_v0  ;;  %v3296_v26 = vsel %vm936_vm4, %v3293_v61, %v3295_v30  ;;  %v3315_v32 = vadd.f32 %v3294_v63, %v3245_v55 }
 0x853   : > { %v2853_v11 = vmul.f32 %v6499_v6, %v2837_v54  ;;  %v3246_v51 = vadd.f32 %v3228_v53, %v3189_v14  ;;  %v2854_v2 = vmul.f32 %v6499_v6, %v2838_v23  ;;  %v2928_v43 = vmul.f32 %v6606_v0, %v7587_v5 }
 0x854   : > { %v3183_v48 = vadd.f32 %v3174_v60, %v3148_v50  ;;  %v2897_v58 = vrot.slane %v2879_v3, 1  ;;  %v3340_v25 = vadd.f32 %v6626_v8, %v3315_v32  ;;  %v7664_v29 = vrot.slane %v6723_v39, 1 }
 0x855   : > { %v2998_v42 = vmul.f32 %v6606_v0, %v7662_v22  ;;  %v3041_v55 = vmul.f32 %v6594_v59, %v6710_v13  ;;  %v3316_v61 = vadd.f32 %v3296_v26, %v3246_v51  ;;  %v7665_v54 = vrot.slane %v6688_v17, 1 }
 0x856   : > { %v3240_v19 = vadd.f32 %v7664_v29, %v3183_v48  ;;  %v7666_v60 = vrot.slane %v6792_v20, 1  ;;  %v2945_v14 = vmul.f32 %v6513_v41, %v2928_v43  ;;  %v7667_v39 = vrot.slane %v6756_v49, 2  ;;  %v7670_v43 = vld [vmem:[#allocation48_spill] sm:$0xff] }
 0x857   : > { %v2898_v50 = vsel %vm728_vm2, %v7665_v54, %v2897_v58  ;;  %v2999_v0 = vmul.f32 %v6710_v13, %v7583_v9  ;;  %v3323_v26 = vmul.f32 %v6584_v34, %v6530_v44  ;;  %v6990_v17 = vadd.f32 %v3370_v52, %v6829_v35 }
 0x858   : > { %v2900_v23 = vsel %vm728_vm2, %v2897_v58, %v7666_v60  ;;  %v3310_v53 = vadd.f32 %v7667_v39, %v3240_v19  ;;  %v2919_v63 = vadd.f32 %v2898_v50, %v2853_v11  ;;  %v6993_v20 = vmul.f32 %v6623_v1, %v3340_v25 }
 0x859   : > { %v2920_v3 = vadd.f32 %v2900_v23, %v2854_v2  ;;  %v2965_v32 = vrot.slane %v2945_v14, 2  ;;  %v3341_v48 = vadd.f32 %v6626_v8, %v3316_v61  ;;  %v3015_v11 = vmul.f32 %v6554_v45, %v2998_v42  ;;  %v7668_v2 = vld [vmem:[#allocation62_spill] sm:$0xff]  ;;  %v7673_v14 = vld [vmem:[#allocation56_spill] sm:$0xff] }
 0x85a   : > { %v3335_v49 = vadd.f32 %v6626_v8, %v3310_v53  ;;  %v3090_v51 = vmul.f32 %v6710_v13, %v7587_v5  ;;  %v7669_v58 = vrot.slane %v7668_v2, 2  ;;  %v7671_v35 = vrot.slane %v7670_v43, 2  ;;  %v7674_v53 = vld [vmem:[#allocation45_spill] sm:$0xff] }
 0x85b   : > { %v3059_v25 = vrot.slane %v3041_v55, 1  ;;  %v3160_v29 = vmul.f32 %v6710_v13, %v7662_v22  ;;  %v3016_v42 = vmul.f32 %v6554_v45, %v2999_v0  ;;  %v3375_v50 = vrot.slane %v6993_v20, 7 }
 0x85c   : > { %v2966_v44 = vsel %vm936_vm4, %v7669_v58, %v2965_v32  ;;  %v2968_v52 = vsel %vm936_vm4, %v2965_v32, %v7671_v35  ;;  %v3348_v19 = vmul.f32 %v6623_v1, %v3335_v49  ;;  %v7672_v60 = vrot.slane %v6817_v7, 1  ;;  %v7678_v35 = vld [vmem:[#allocation51_spill] sm:$0xff] }
 0x85d   : > { %v2989_v61 = vadd.f32 %v2966_v44, %v2919_v63  ;;  %v2990_v54 = vadd.f32 %v2968_v52, %v2920_v3  ;;  %v3107_v39 = vmul.f32 %v7673_v14, %v3090_v51  ;;  %v3161_v55 = vmul.f32 %v7674_v53, %v7583_v9  ;;  %v7675_v3 = vld [vmem:[#allocation33_spill] sm:$0xff] }
 0x85e   : > { %v3062_v23 = vsel %vm728_vm2, %v3059_v25, %v7672_v60  ;;  %v7018_v32 = vmul.f32 %v6623_v1, %v3341_v48  ;;  %v3366_v13 = vrot.slane %v3348_v19, 7  ;;  %v7676_v49 = vrot.slane %v7675_v3, 1  ;;  %v7684_v3 = vld [vmem:[#allocation46_spill] sm:$0xff] }
 0x85f   : > { %v3024_v22 = vadd.f32 %v3015_v11, %v2989_v61  ;;  %v3025_v63 = vadd.f32 %v3016_v42, %v2990_v54  ;;  %v3127_v2 = vrot.slane %v3107_v39, 2  ;;  %v3177_v7 = vmul.f32 %v6560_v27, %v3160_v29  ;;  %v7680_v54 = vld [vmem:[#allocation52_spill] sm:$0xff] }
 0x860   : > { %v3060_v0 = vsel %vm728_vm2, %v7676_v49, %v3059_v25  ;;  %v3203_v58 = vmul.f32 %v6611_v37, %v7674_v53  ;;  %v7677_v51 = vrot.slane %v6820_v57, 7  ;;  %v3178_v43 = vmul.f32 %v6560_v27, %v3161_v55  ;;  %v7683_v55 = vld [vmem:[#allocation42_spill] sm:$0xff] }
 0x861   : > { %v3081_v44 = vadd.f32 %v3060_v0, %v3024_v22  ;;  %v3082_v48 = vadd.f32 %v3062_v23, %v3025_v63  ;;  %v7679_v52 = vrot.slane %v7678_v35, 2  ;;  %v3130_v29 = vsel %vm936_vm4, %v3127_v2, %v3129_v47  ;;  %v7681_v23 = vld [vmem:[#allocation54_spill] sm:$0xff]  ;;  %v7685_v0 = vld [vmem:[#allocation39_spill] sm:$0xff] }
 0x862   : > { %v3368_v9 = vsel %vm876_vm3, %v3366_v13, %v7677_v51  ;;  %v3221_v19 = vrot.slane %v3203_v58, 1  ;;  %v3252_v57 = vmul.f32 %v7674_v53, %v7587_v5  ;;  %v2841_v42 = vmul.f32 %v6848_v62, %v7680_v54 }
 0x863   : > { %v7030_v11 = vadd.f32 %v3368_v9, %v3323_v26  ;;  %v3128_v25 = vsel %vm936_vm4, %v7679_v52, %v3127_v2  ;;  %v3152_v61 = vadd.f32 %v3130_v29, %v3082_v48  ;;  %v3377_v26 = vrot.slane %v7018_v32, 7  ;;  %v7688_v29 = vld [vmem:[#allocation49_spill] sm:$0xff]  ;;  %v4293_v32 = vld [vmem:[#allocation17] sm:$0xff]  }
 0x864   : > { %v3151_v37 = vadd.f32 %v3128_v25, %v3081_v44  ;;  %v7682_v39 = vrot.slane %v7681_v23, 1  ;;  %v2842_v47 = vmul.f32 %v6799_v38, %v7683_v55  ;;  %v3224_v5 = vsel %vm728_vm2, %v3221_v19, %v3223_v56 }
 0x865   : > { %v3399_v60 = vpack.c.bf16 %v6990_v17, %v7030_v11  ;;  %v3187_v22 = vadd.f32 %v3178_v43, %v3152_v61  ;;  %v3269_v62 = vmul.f32 %v6576_v46, %v3252_v57  ;;  %v2857_v53 = vmul.f32 %v6499_v6, %v2841_v42 }
 0x866   : > { %v3222_v33 = vsel %vm728_vm2, %v7682_v39, %v3221_v19  ;;  %v3186_v13 = vadd.f32 %v3177_v7, %v3151_v37  ;;  %v2883_v63 = vmul.f32 %v6489_v18, %v6799_v38  ;;  %v2932_v49 = vmul.f32 %v6799_v38, %v7684_v3  ;;  %v7686_v18 = vld [vmem:[#allocation57_spill] sm:$0xff] }
 0x867   : > { %4107 = vmatprep.mubr.msk.bf16.mxu1 %vm623_vm0, %v3399_v60  ;;  %v2933_v2 = vmul.f32 %v6853_v12, %v7685_v0  ;;  %v3244_v58 = vadd.f32 %v3224_v5, %v3187_v22  ;;  %v3289_v10 = vrot.slane %v3269_v62, 2  ;;  %v3002_v56 = vmul.f32 %v6799_v38, %v7680_v54  ;;  %v7692_v0 = vld [vmem:[#allocation50_spill] sm:$0xff] }
 0x868   : > { %v3243_v7 = vadd.f32 %v3222_v33, %v3186_v13  ;;  %v2858_v46 = vmul.f32 %v6499_v6, %v2842_v47  ;;  %v2905_v51 = vrot.slane %v2883_v63, 1  ;;  %v2949_v9 = vmul.f32 %v6513_v41, %v2932_v49  ;;  %v7691_v63 = vld [vmem:[#allocation66_spill] sm:$0xff] }
 0x869   : > { %v2950_v44 = vmul.f32 %v6513_v41, %v2933_v2  ;;  %v7687_v48 = vrot.slane %v7686_v18, 2  ;;  %v3292_v35 = vsel %vm936_vm4, %v3289_v10, %v3291_v21  ;;  %v3003_v52 = vmul.f32 %v6853_v12, %v7683_v55 }
 0x86a   : > { %v3045_v38 = vmul.f32 %v6594_v59, %v6853_v12  ;;  %v3378_v6 = vsel %vm876_vm3, %v3375_v50, %v3377_v26  ;;  %v3314_v25 = vadd.f32 %v3292_v35, %v3244_v58  ;;  %v7689_v19 = vrot.slane %v7688_v29, 1  ;;  %v7696_v35 = vld [vmem:[#allocation43_spill] sm:$0xff] }
 0x86b   : > { %v3290_v43 = vsel %vm936_vm4, %v7687_v48, %v3289_v10  ;;  %v2973_v21 = vrot.slane %v2949_v9, 2  ;;  %v2975_v61 = vrot.slane %v2950_v44, 2  ;;  %v3019_v57 = vmul.f32 %v6554_v45, %v3002_v56  ;;  %v7693_v56 = vld [vmem:[#allocation34_spill] sm:$0xff] }
 0x86c   : > { %v3313_v41 = vadd.f32 %v3290_v43, %v3243_v7  ;;  %v2906_v36 = vsel %vm728_vm2, %v7689_v19, %v2905_v51  ;;  %v3339_v59 = vadd.f32 %v6626_v8, %v3314_v25  ;;  %v2924_v60 = vadd.f32 %v2905_v51, %v2858_v46 }
 0x86d   : > { %v2923_v37 = vadd.f32 %v2906_v36, %v2857_v53  ;;  %v3094_v23 = vmul.f32 %v6853_v12, %v7684_v3  ;;  %v7690_v39 = vrot.slane %v6875_v31, 2  ;;  %v2976_v55 = vsel %vm936_vm4, %v2973_v21, %v2975_v61 }
 0x86e   : > { %v3338_v42 = vadd.f32 %v6626_v8, %v3313_v41  ;;  %v3020_v47 = vmul.f32 %v6554_v45, %v3003_v52  ;;  %v3067_v13 = vrot.slane %v3045_v38, 1  ;;  %v3352_v5 = vmul.f32 %v6623_v1, %v3339_v59  ;;  %v7697_v41 = vld [vmem:[#allocation44_spill] sm:$0xff] }
 0x86f   : > { %v2974_v33 = vsel %vm936_vm4, %v7690_v39, %v2973_v21  ;;  %v2994_v53 = vadd.f32 %v2976_v55, %v2924_v60  ;;  %v3326_v49 = vmul.f32 %v6584_v34, %v7691_v63  ;;  %v3328_v3 = vmul.f32 %v6584_v34, %v7692_v0  ;;  %v7704_v55 = vld [vmem:[#allocation36_spill] sm:$0xff] }
 0x870   : > { %v3351_v22 = vmul.f32 %v6623_v1, %v3338_v42  ;;  %v2993_v62 = vadd.f32 %v2974_v33, %v2923_v37  ;;  %v3111_v31 = vmul.f32 %v7673_v14, %v3094_v23  ;;  %v3164_v2 = vmul.f32 %v6853_v12, %v7680_v54  ;;  %v7702_v23 = vld [vmem:[#allocation65_spill] sm:$0xff]  ;;  %v4289_v0 = vld [vmem:[#allocation17 + $0x20] sm:$0xff]  }
 0x871   : > { %v3373_v45 = vrot.slane %v3352_v5, 7  ;;  %v3029_v10 = vadd.f32 %v3020_v47, %v2994_v53  ;;  %v3327_v46 = vmul.f32 %v6584_v34, %v7693_v56  ;;  %v7106_v51 = vadd.f32 %v3378_v6, %v3328_v3 }
 0x872   : > { %v3371_v7 = vrot.slane %v3351_v22, 7  ;;  %v3028_v58 = vadd.f32 %v3019_v57, %v2993_v62  ;;  %v7694_v9 = vrot.slane %v6825_v28, 1  ;;  %v3135_v18 = vrot.slane %v3111_v31, 2  ;;  %v4287_v57 = vld [vmem:[#allocation17 + $0x30] sm:$0xff]   ;;  %v4288_v22 = vld [vmem:[#allocation17 + $0x28] sm:$0xff]  }
 0x873   : > { %v7695_v48 = vrot.slane %v6846_v16, 7  ;;  %v3376_v54 = vsel %vm876_vm3, %v3373_v45, %v3375_v50  ;;  %v3086_v6 = vadd.f32 %v3067_v13, %v3029_v10  ;;  %v7698_v25 = vrot.slane %v7697_v41, 2  ;;  %v7699_v50 = vld [vmem:[#allocation38_spill] sm:$0xff] }
 0x874   : > { %v3068_v44 = vsel %vm728_vm2, %v7694_v9, %v3067_v13  ;;  %v3374_v12 = vsel %vm876_vm3, %v3371_v7, %v3373_v45  ;;  %v7123_v28 = vadd.f32 %v3376_v54, %v3327_v46  ;;  %v3136_v16 = vsel %vm936_vm4, %v3133_v4, %v3135_v18  ;;  %v7701_v4 = vld [vmem:[#allocation61_spill] sm:$0xff] }
 0x875   : > { %v3372_v14 = vsel %vm876_vm3, %v7695_v48, %v3371_v7  ;;  %v3085_v43 = vadd.f32 %v3068_v44, %v3028_v58  ;;  %v7121_v38 = vadd.f32 %v3374_v12, %v3326_v49  ;;  %v3138_v29 = vsel %vm936_vm4, %v3135_v18, %v7698_v25  ;;  %v7705_v7 = vld [vmem:[#allocation68_spill] sm:$0xff]  ;;  %v4291_v44 = vld [vmem:[#allocation17 + $0x10] sm:$0xff]   ;;  %v3977_v48 = vld [vmem:[#allocation8] ss:$0 sm:$0xff] }
 0x876   : > { %v7119_v52 = vadd.f32 %v3372_v14, %v7696_v35  ;;  %v3181_v20 = vmul.f32 %v6560_v27, %v3164_v2  ;;  %v3229_v19 = vrot.slane %v7699_v50, 1  ;;  %v3401_v37 = vpack.c.bf16 %v7106_v51, %v7123_v28  ;;  %v7706_v58 = vld [vmem:[#allocation60_spill] sm:$0xff] }
 0x877   : > { %v3155_v21 = vadd.f32 %v3136_v16, %v3085_v43  ;;  %v3156_v61 = vadd.f32 %v3138_v29, %v3086_v6  ;;  %v3297_v42 = vrot.slane %v7700_v24, 2  ;;  %v3299_v59 = vrot.slane %v7701_v4, 2 }
 0x878   : > { %v3400_v36 = vpack.c.bf16 %v7121_v38, %v7119_v52  ;;  %v7703_v39 = vrot.slane %v6885_v40, 1  ;;  %v3329_v45 = vmul.f32 %v6584_v34, %v7705_v7  ;;  %v3330_v10 = vmul.f32 %v6584_v34, %v7706_v58  ;;  %v4292_v34 = vld [vmem:[#allocation17 + $0x8] sm:$0xff]  }
 0x879   : > { %v3190_v60 = vadd.f32 %v3181_v20, %v3155_v21  ;;  %v3191_v27 = vadd.f32 %v7702_v23, %v3156_v61  ;;  %v3298_v5 = vsel %vm936_vm4, %v3295_v30, %v3297_v42  ;;  %v3300_v62 = vsel %vm936_vm4, %v3297_v42, %v3299_v59  ;;  %v4290_v30 = vld [vmem:[#allocation17 + $0x18] sm:$0xff]  }
 0x87a   : > { %4108 = vmatmul.mubr.msk.bf16.vlgmr.msra.gmra.mxu1 %vm623_vm0, %v3400_v36  ;;  %v3230_v33 = vsel %vm728_vm2, %v7703_v39, %v3229_v19 }
 0x87b   : > { %4111 = vmatprep.mubr.msk.bf16.mxu1 %vm623_vm0, %v3401_v37  ;;  %4116 = vmatpush3.bf16.msra.mxu1 %v7704_v55  ;;  %v3247_v47 = vadd.f32 %v3230_v33, %v3190_v60  ;;  %v3248_v13 = vadd.f32 %v3229_v19, %v3191_v27  ;;  %v7707_v33 = vld [vmem:[#allocation35_spill] sm:$0xff] }
 0x87c   : > { %4117 = vmatprep.subr.bf16.mxu1 %v4287_v57  ;;  %v3650_v55 = vsub.s32 3, %v7707_v33 }
 0x87d   : > { %v3317_v53 = vadd.f32 %v3298_v5, %v3247_v47  ;;  %v3318_v63 = vadd.f32 %v3300_v62, %v3248_v13  ;;  %v3984_v47 = vld [vmem:[#allocation5 + $0x8] ss:$0 sm:$0xff]  ;;  %v7708_v13 = vld [vmem:[#allocation53_spill] sm:$0xff] }
 0x87f   : > { %4118 = vmatpush3.bf16.msra.mxu1 %v4287_v57  ;;  %v3342_v49 = vadd.f32 %v6626_v8, %v3317_v53  ;;  %v3343_v40 = vadd.f32 %v6626_v8, %v3318_v63  ;;  %v7709_v53 = vld [vmem:[#allocation37_spill] sm:$0xff] }
 0x880   : > { %4119 = vmatprep.subr.bf16.mxu1 %v4288_v22  ;;  %v3651_v63 = vrot.slane %v7709_v53, %v3650_v55 }
 0x881   : > { %v3355_v3 = vmul.f32 %v6623_v1, %v3342_v49  ;;  %v3356_v31 = vmul.f32 %v6623_v1, %v3343_v40 }
 0x882   : > { %v3654_v40 = vmul.f32 %v3651_v63, %v7119_v52  ;;  %v3655_v52 = vmul.f32 %v3651_v63, %v7121_v38 }
 0x883   : > { %4120 = vmatpush3.bf16.msra.mxu1 %v4288_v22  ;;  %v3379_v2 = vrot.slane %v3355_v3, 7  ;;  %v3381_v15 = vrot.slane %v3356_v31, 7  ;;  %v3663_v22 = vrot.slane %v7708_v13, %v3650_v55 }
 0x884   : > { %4121 = vmatprep.subr.bf16.mxu1 %v4289_v0 }
 0x885   : > { %v3380_v8 = vsel %vm876_vm3, %v3377_v26, %v3379_v2  ;;  %v3382_v56 = vsel %vm876_vm3, %v3379_v2, %v3381_v15  ;;  %v3652_v15 = vmul.f32 %v3651_v63, %v7030_v11  ;;  %v3653_v11 = vmul.f32 %v3651_v63, %v6990_v17 }
 0x886   : > { %v7162_v46 = vadd.f32 %v3380_v8, %v3329_v45  ;;  %v7164_v1 = vadd.f32 %v3382_v56, %v3330_v10  ;;  %v3656_v17 = vmul.f32 %v3651_v63, %v7123_v28  ;;  %v3657_v28 = vmul.f32 %v3651_v63, %v7106_v51 }
 0x887   : > { %4122 = vmatpush3.bf16.msra.mxu1 %v4289_v0 }
 0x888   : > { %4123 = vmatprep.subr.bf16.mxu1 %v4290_v30  ;;  %v3402_v9 = vpack.c.bf16 %v7164_v1, %v7162_v46  ;;  %v3658_v38 = vmul.f32 %v3651_v63, %v7162_v46 }
 0x88a   : > { %4112 = vmatmul.mubr.msk.bf16.gmra.mxu1 %vm623_vm0, %v3402_v9 }
 0x88b   : > { %4124 = vmatpush3.bf16.msra.mxu1 %v4290_v30 }
 0x88c   : > { %4125 = vmatprep.subr.bf16.mxu1 %v4291_v44 }
 0x88f   : > { %4126 = vmatpush3.bf16.msra.mxu1 %v4291_v44 }
 0x890   : > { %4127 = vmatprep.subr.bf16.mxu1 %v4292_v34 }
 0x893   : > { %4128 = vmatpush3.bf16.msra.mxu1 %v4292_v34 }
 0x894   : > { %4129 = vmatprep.subr.bf16.mxu1 %v4293_v32 }
 0x897   : > { %4130 = vmatpush3.bf16.msra.mxu1 %v4293_v32 }
 0x93a   : > { %v4109_v26 = vpop.f32.mrf.mxu1 }
 0x93b   : > { %v3481_v43 = vadd.f32 %v4109_v26, %v3977_v48 }
 0x93c   : > { %v3472_v18 = vpop.f32.mrf.mxu1 }
 0x93d   : > { %v3473_v12 = vadd.f32 %v3977_v48, %v3472_v18  ;;  %v3505_v29 = vmax.f32 %v3481_v43, 0.0 }
 0x93e   : > { %v4110_v14 = vpop.f32.mrf.mxu1 }
 0x93f   : > { %v3484_v54 = vadd.f32 %v4110_v14, %v3977_v48  ;;  %v3503_v41 = vmax.f32 %v3473_v12, 0.0 }
 0x940   : > { %v3475_v35 = vpop.f32.mrf.mxu1 }
 0x941   : > { %v3476_v6 = vadd.f32 %v3977_v48, %v3475_v35  ;;  %v3506_v16 = vmax.f32 %v3484_v54, 0.0 }
 0x943   : > { %v3504_v25 = vmax.f32 %v3476_v6, 0.0  ;;  %v3512_v50 = vpack.c.bf16 %v3506_v16, %v3505_v29  ;;  %v3659_v16 = vmul.f32 %v3651_v63, %v7164_v1 }
 0x945   : > { %v3511_v20 = vpack.c.bf16 %v3504_v25, %v3503_v41 }
 0x947   : > { %4131 = vmatprep.mubr.bf16.mxu1 %v3511_v20 }
 0x948   : > { %4132 = vmatmul.mubr.bf16.vlgmr.msra.gmra.mxu1 %v3512_v50 }
 0x94a   : > { %v4113_v19 = vpop.f32.mrf.mxu1 }
 0x94b   : > { %v3497_v57 = vadd.f32 %v4113_v19, %v3977_v48 }
 0x94c   : > { %v3488_v36 = vpop.f32.mrf.mxu1 }
 0x94d   : > { %v3489_v21 = vadd.f32 %v3977_v48, %v3488_v36  ;;  %v3509_v23 = vmax.f32 %v3497_v57, 0.0 }
 0x94e   : > { %v4114_v37 = vpop.f32.mrf.mxu1 }
 0x94f   : > { %v3500_v61 = vadd.f32 %v4114_v37, %v3977_v48  ;;  %v3507_v59 = vmax.f32 %v3489_v21, 0.0 }
 0x950   : > { %v3491_v24 = vpop.f32.mrf.mxu1 }
 0x951   : > { %v3492_v42 = vadd.f32 %v3977_v48, %v3491_v24  ;;  %v3510_v4 = vmax.f32 %v3500_v61, 0.0 }
 0x953   : > { %v3508_v60 = vmax.f32 %v3492_v42, 0.0  ;;  %v3514_v39 = vpack.c.bf16 %v3510_v4, %v3509_v23 }
 0x955   : > { %v3513_v27 = vpack.c.bf16 %v3508_v60, %v3507_v59 }
 0x957   : > { %4135 = vmatprep.mubr.bf16.mxu1 %v3513_v27 }
 0x958   : > { %4136 = vmatmul.mubr.bf16.gmra.mxu1 %v3514_v39 }
 0xa08   : > { %v4133_v5 = vpop.f32.mrf.mxu1 }
 0xa09   : > { %v3626_v62 = vadd.f32 %v4133_v5, %v3984_v47 }
 0xa0a   : > { %v3617_v49 = vpop.f32.mrf.mxu1 }
 0xa0b   : > { %v3666_v0 = vmul.f32 %v3663_v22, %v3626_v62  ;;  %v3618_v3 = vadd.f32 %v3984_v47, %v3617_v49 }
 0xa0c   : > { %v4134_v31 = vpop.f32.mrf.mxu1 }
 0xa0d   : > { %v3674_v2 = vadd.f32 %v3666_v0, %v3654_v40  ;;  %v3664_v30 = vmul.f32 %v3663_v22, %v3618_v3  ;;  %v3629_v7 = vadd.f32 %v4134_v31, %v3984_v47 }
 0xa0e   : > { %v3620_v45 = vpop.f32.mrf.mxu1 }
 0xa0f   : > { %3682 = vst.msk [vmem:[%s7177_s3 + $0x10] sm:$0xff] %vm623_vm0, %v3674_v2  ;;  %v3672_v58 = vadd.f32 %v3664_v30, %v3652_v15  ;;  %v3667_v10 = vmul.f32 %v3663_v22, %v3629_v7  ;;  %v3621_v8 = vadd.f32 %v3984_v47, %v3620_v45 }
 0xa11   : > { %3680 = vst.msk [vmem:[%s7177_s3] sm:$0xff] %vm623_vm0, %v3672_v58  ;;  %v3675_v56 = vadd.f32 %v3667_v10, %v3655_v52  ;;  %v3665_v9 = vmul.f32 %v3663_v22, %v3621_v8 }
 0xa13   : > { %3683 = vst.msk [vmem:[%s7177_s3 + $0x18] sm:$0xff] %vm623_vm0, %v3675_v56  ;;  %v3673_v44 = vadd.f32 %v3665_v9, %v3653_v11 }
 0xa15   : > { %3681 = vst.msk [vmem:[%s7177_s3 + $0x8] sm:$0xff] %vm623_vm0, %v3673_v44 }
 0xa18   : > { %v4137_v34 = vpop.f32.mrf.mxu1 }
 0xa19   : > { %v3642_v32 = vadd.f32 %v4137_v34, %v3984_v47 }
 0xa1a   : > { %v3633_v26 = vpop.f32.mrf.mxu1 }
 0xa1b   : > { %v3670_v18 = vmul.f32 %v3663_v22, %v3642_v32  ;;  %v3634_v48 = vadd.f32 %v3984_v47, %v3633_v26 }
 0xa1c   : > { %v4138_v14 = vpop.f32.mrf.mxu1 }
 0xa1d   : > { %v3678_v12 = vadd.f32 %v3670_v18, %v3658_v38  ;;  %v3668_v54 = vmul.f32 %v3663_v22, %v3634_v48  ;;  %v3645_v43 = vadd.f32 %v4138_v14, %v3984_v47 }
 0xa1e   : > { %v3636_v35 = vpop.f32.mrf.mxu1 }
 0xa1f   : > { %3686 = vst.msk [vmem:[%s7177_s3 + $0x30] sm:$0xff] %vm623_vm0, %v3678_v12  ;;  %v3676_v6 = vadd.f32 %v3668_v54, %v3656_v17  ;;  %v3671_v41 = vmul.f32 %v3663_v22, %v3645_v43  ;;  %v3637_v46 = vadd.f32 %v3984_v47, %v3636_v35 }
 0xa21   : > { %3684 = vst.msk [vmem:[%s7177_s3 + $0x20] sm:$0xff] %vm623_vm0, %v3676_v6  ;;  %v3679_v25 = vadd.f32 %v3671_v41, %v3659_v16  ;;  %v3669_v29 = vmul.f32 %v3663_v22, %v3637_v46 }
 0xa23   : > { %3687 = vst.msk [vmem:[%s7177_s3 + $0x38] sm:$0xff] %vm623_vm0, %v3679_v25  ;;  %v3677_v1 = vadd.f32 %v3669_v29, %v3657_v28 }
 0xa25   : > { %3685 = vst.msk [vmem:[%s7177_s3 + $0x28] sm:$0xff] %vm623_vm0, %v3677_v1 }
 0xa26   : > { %4569 = shalt.err (!%p4566_p0)
}
 0xa27   : > { %s4570_s20 = scalar_lea.hbm %s7202_s24, 1024  ;;  %s4574_s26 = scalar_lea.hbm %s7266_s14, 2048 }
 0xa28   : > { %p4571_p12 = scmp.ne.s32.totalorder %s7202_s24, %s4570_s20  ;;  %p4575_p6 = scmp.lt.s32.totalorder %s7202_s24, %s7266_s14 }
 0xa29   : > { %p4576_p9 = scmp.lt.s32.totalorder %s4574_s26, %s4570_s20 }
 0xa2a   : > { %p4572_p1 = pnand %p4571_p12, %p7710_p3 }
 0xa2b   : > { %p4577_p10 = por %p4576_p9, %p4575_p6 }
 0xa2c   : > { %p4573_p5 = pneg %p4572_p1 }
 0xa2e   : > { %p4578_p2 = pnand %p4577_p10, %p4573_p5 }
 0xa30   : > { %4581 = shalt.err (!%p4578_p2)
}
 0xa31   : > { %s4658_s17 = smov 128   ;;  %s4659_s16 = smov 8  }
 0xa32   : > { %4173 = dma.vmem_to_hbm [thread:$0]  (%p7710_p3), %s7204_s28, 1024, %s7202_s24, %s7212_s13, %s4658_s17, %s4658_s17, %s4659_s16  }
 0xa33 PF: > { %s7711_s30 = sld [smem:[#allocation28_spill]] }
 0xa34   : > { %s7712_s25 = sld [smem:[#allocation26_spill]] }
 0xa35   : > { %s7713_s22 = sld [smem:[#allocation31_spill]] }
 0xa39   : > { %p4220_p4 = scmp.ge.s32.totalorder %s7711_s30, 2 }
 0xa3a   : > { %s3729_s18 = sand.u32 1, %s7712_s25  }
 0xa3b   : > { %p7714_p13 = scmp.ne.s32.totalorder %s7713_s22, 0  ;;  %s3730_s20 = scalar_lea.sflag [#allocation7], %s3729_s18 }
 0xa3d   : > { %p4201_p7 = pnand %p4220_p4, %p7714_p13 }
 0xa3f   : > { %p4202_p8 = pneg %p4201_p7 }
 0xa41   : > { %4619 = dma.done.wait (%p4202_p8), %s3730_s20, 1024  }
 0xa42   : > { %4621 = vsyncadd (%p4202_p8), %s3730_s20, 4294966272  ;;  %s7715_s23 = sld [smem:[#allocation29_spill]]  ;;  %s7718_s20 = smov %s4628_s21 }
 0xa43   : > { %s7716_s19 = sld [smem:[#allocation27_spill]] }
 0xa44   : > { %s7717_s22 = sld [smem:[#allocation30_spill]] }
 0xa48   : > { %p32_p11 = scmp.ge.s32.totalorder %s7715_s23, 4  }
 0xa49   : > { %s7719_s21 = smov %s7716_s19 }
 0xa4a   :  { %34 = sbr.rel (!%p32_p11) target bundleno = 11 (0xb), region = 181 }
 0xa4f   :  { %3743 = vsyncpa [#allocation6], 1 }
 0xa50   :  { %3745 = vsyncpa [#allocation6 + $0x1], 1 }
 0xa51   :  { %3746 = vsyncpa [#allocation9], 1 }
 0xa52   :  { %3747 = vsyncpa [#allocation12], 1 }
 0xa53   :  { %3748 = vsyncpa [#allocation15], 1 }
 0xa54   :  { %3749 = vsyncpa [#allocation18], 1 }
 0xa55   :  { %3750 = vsyncpa [#allocation7], 1 }
 0xa56   :  { %3752 = vsyncpa [#allocation7 + $0x1], 1 }

</bundles_post_ra>
